<compile_context>
chip_gen: v6e
topology: v6e:2x2x1
jax: 0.10.0
libtpu: 0.0.40
codegen_flags: <defaults>
</compile_context>

<pallas_src>
from functools import partial

import numpy as np
import jax
import jax.numpy as jnp
from jax import lax
from jax.experimental import pallas as pl
from jax.experimental.pallas import tpu as pltpu

_MARGIN = 0.2                       # module __init__ default (no parameters)
_EPS = 1e-8                         # torch.cosine_similarity default eps
_EPS2 = np.float32(_EPS) * np.float32(_EPS)

# Abramowitz & Stegun 4.4.45 acos(x) approximation on [0, 1], |err| <= 2e-8
# (f32-exact).  Uses only VPU/EUP-friendly mul/add/sqrt/where.
_ACOS_COEFFS = (-0.0012624911, 0.0066700901, -0.0170881256, 0.0308918810,
                -0.0501743046, 0.0889789874, -0.2145988016, 1.5707963050)


def _acos(x):
    ax = jnp.abs(x)
    p = jnp.full_like(ax, _ACOS_COEFFS[0])
    for coef in _ACOS_COEFFS[1:]:
        p = p * ax + np.float32(coef)
    r = jnp.sqrt(jnp.maximum(1.0 - ax, 0.0)) * p
    return jnp.where(x < 0.0, np.float32(np.pi) - r, r)


def _segment_sum_matrix(K, D):
    """(K*D, K) f32 block-diagonal ones: column k is 1.0 on rows [k*D,(k+1)*D).

    Contracting a (TB, K*D) elementwise product with this matrix on the MXU
    performs the per-k sum over D without any XLU cross-lane reduction.  The
    weights are exactly 0/1 and the matmul uses HIGHEST precision, so the
    result is (f32-)exact."""
    rows = lax.broadcasted_iota(jnp.int32, (K * D, K), 0)
    cols = lax.broadcasted_iota(jnp.int32, (K * D, K), 1)
    lo = cols * D
    return jnp.logical_and(rows >= lo, rows < lo + D).astype(jnp.float32)


def _to_lanes(x):
    """(TB, Kt) -> (Kt, TB) relayout so the batch sits on the 128-lane axis.

    Implemented as an identity matmul on the MXU (guaranteed Mosaic lowering,
    exact at HIGHEST precision with 0/1 weights).  Called once per tile on the
    concatenated pos+neg cosines, so the eye is built exactly once."""
    k = x.shape[1]
    rows = lax.broadcasted_iota(jnp.int32, (k, k), 0)
    cols = lax.broadcasted_iota(jnp.int32, (k, k), 1)
    eye = (rows == cols).astype(x.dtype)
    return lax.dot_general(
        eye, x,
        dimension_numbers=(((1,), (1,)), ((), ())),
        precision=lax.Precision.HIGHEST,
        preferred_element_type=jnp.float32)            # (Kt, TB)


def _lower_median_rows(d):
    """torch.median(dim).values semantics (lower median) along axis 0 of
    d: (K, TB), lane-dense over the batch.

    Count-based order statistic: element i is the k-th smallest iff
    (#strictly smaller) <= k < (#less-or-equal).  With ties every selected
    element shares the same value, and d = acos(.) >= 0, so max(d * sel)
    recovers the median value.  K is tiny & static -> Python-unrolled."""
    K = d.shape[0]
    k = np.float32((K - 1) // 2)
    less = jnp.zeros_like(d)
    leq = jnp.zeros_like(d)
    for j in range(K):
        dj = d[j:j + 1, :]                             # (1, TB) sublane broadcast
        less = less + (dj < d).astype(jnp.float32)
        leq = leq + (dj <= d).astype(jnp.float32)
    sel = jnp.logical_and(less <= k, leq > k).astype(d.dtype)
    return jnp.max(d * sel, axis=0, keepdims=True)     # (1, TB)


def _make_kernel(P, N, D, margin):
    margin = np.float32(margin)

    def kernel(anc_ref, pos_ref, neg_ref, out_ref):
        anc = anc_ref[...].astype(jnp.float32)         # (TB, D) in-kernel upcast

        # ||anc||^2 via a ones-matmul on the MXU; computed once, reused by
        # both branches.
        ones_d = jnp.ones((D, 8), jnp.float32)
        w1 = lax.dot_general(anc * anc, ones_d,
                             (((1,), (0,)), ((), ())),
                             precision=lax.Precision.HIGHEST,
                             preferred_element_type=jnp.float32)[:, :1]   # (TB,1)

        def branch_cos(o_ref, K):
            o = o_ref[...].astype(jnp.float32)         # (TB, K*D) dense 2-D block
            # Replicate anchor along lanes (cheap vreg copies, D-aligned).
            anc_rep = jnp.concatenate([anc] * K, axis=1)       # (TB, K*D)
            S = _segment_sum_matrix(K, D)                      # (K*D, K)
            dn = (((1,), (0,)), ((), ()))
            w12 = lax.dot_general(anc_rep * o, S, dn,          # MXU row-sums
                                  precision=lax.Precision.HIGHEST,
                                  preferred_element_type=jnp.float32)  # (TB, K)
            w2 = lax.dot_general(o * o, S, dn,
                                 precision=lax.Precision.HIGHEST,
                                 preferred_element_type=jnp.float32)   # (TB, K)
            # torch.cosine_similarity: dot / max(|a|*|b|, eps)
            return w12 * lax.rsqrt(jnp.maximum(w1 * w2, _EPS2))        # (TB, K)

        c_all = jnp.concatenate([branch_cos(pos_ref, P),
                                 branch_cos(neg_ref, N)], axis=1)      # (TB, P+N)
        ct = _to_lanes(c_all)                          # (P+N, TB) lane-dense batch
        ct = jnp.minimum(jnp.maximum(ct, -1.0), 1.0)   # clip to [-1, 1]
        d = _acos(ct)                                  # (P+N, TB)
        d_p = _lower_median_rows(d[:P, :])             # (1, TB)
        d_n = _lower_median_rows(d[P:, :])             # (1, TB)

        div = d_p - d_n + margin                       # (1, TB)
        hinge = jnp.maximum(div, 0.0)                  # == max(cat([div,0],1),1)[0]
        out_ref[...] = jnp.log(1.0 + jnp.exp(hinge))   # soft margin, lane-dense

    return kernel


def _pick_tb(B, P, N, D):
    """Batch tile TB.  Per-step DMA block bytes (anc+poses+neges), budgeted as
    f32 since the kernel upcasts in VMEM.  Pallas double-buffers each input and
    the kernel's elementwise temporaries add roughly another 2x, so a ~2 MiB
    block set keeps the worst case (~8 MiB) inside even v5e's 16 MiB default
    scoped-VMEM limit while still giving several grid steps to pipeline and to
    split across v7x's two TensorCores."""
    row_bytes = (1 + P + N) * D * 4
    tb = (2 * 1024 * 1024) // max(row_bytes, 1)
    tb = max(128, min(512, (tb // 128) * 128))         # multiple of 128 (lane-dense)
    return int(min(tb, B))                             # B<=tb -> one full-size tile


@partial(jax.jit, static_argnames=("margin",))
def _loss_impl(anc, poses, neges, margin):
    B, D = anc.shape
    _, P, _ = poses.shape
    _, N, _ = neges.shape

    # Free (bitcast) reshape under jit: present dense (B, K*D) slabs so each
    # grid step's block is a single 2-D tile (no in-kernel 3-D relayout, and
    # the per-k sums become plain MXU matmuls).
    pos2d = poses.reshape(B, P * D)
    neg2d = neges.reshape(B, N * D)

    TB = _pick_tb(B, P, N, D)
    grid = (pl.cdiv(B, TB),)                           # partial last tile allowed

    cost = pl.CostEstimate(
        flops=int(6 * B * (P + N) * D + 2 * B * D + 48 * B * (P + N)),
        transcendentals=int(2 * B * (P + N) + 2 * B),
        bytes_accessed=int(B * ((1 + P + N) * D * anc.dtype.itemsize + 4)),
    )

    per_sample = pl.pallas_call(
        _make_kernel(P, N, D, margin),
        out_shape=jax.ShapeDtypeStruct((1, B), jnp.float32),
        grid=grid,
        in_specs=[
            pl.BlockSpec((TB, D), lambda i: (i, 0)),
            pl.BlockSpec((TB, P * D), lambda i: (i, 0)),
            pl.BlockSpec((TB, N * D), lambda i: (i, 0)),
        ],
        out_specs=pl.BlockSpec((1, TB), lambda i: (0, i)),
        compiler_params=pltpu.CompilerParams(
            dimension_semantics=("parallel",),
            vmem_limit_bytes=32 * 1024 * 1024),
        cost_estimate=cost,
    )(anc, pos2d, neg2d)

    # Output has exactly B valid entries (no padding anywhere).
    return jnp.mean(per_sample)


def multi_arccosine_triplet_loss_soft_margin(anc, poses, neges, margin=_MARGIN):
    return _loss_impl(anc, poses, neges, margin=float(margin))


def _reference(anc, poses, neges, margin=_MARGIN):
    """Pure-JAX reference mirroring the PyTorch forward (for self-check)."""
    def cos(a, o):
        w12 = jnp.sum(a[:, None, :] * o, axis=2)
        w1 = jnp.sum(a * a, axis=1, keepdims=True)
        w2 = jnp.sum(o * o, axis=2)
        return w12 / jnp.sqrt(jnp.maximum(w1 * w2, _EPS * _EPS))

    def med_acos(c):
        c = jnp.clip(c, -1.0, 1.0)
        d = jnp.arccos(c)
        k = (d.shape[1] - 1) // 2
        return jnp.sort(d, axis=1)[:, k]               # torch lower median

    d_p = med_acos(cos(anc, poses))
    d_n = med_acos(cos(anc, neges))
    div = d_p - d_n + margin
    return jnp.mean(jnp.log(1.0 + jnp.exp(jnp.maximum(div, 0.0))))


if __name__ == "__main__":
    key = jax.random.PRNGKey(0)
    k1, k2, k3, k4, k5, k6 = jax.random.split(key, 6)

    # Test 1: small single-tile case.
    B, P, N, D = 4, 6, 5, 32
    anc = jax.random.normal(k1, (B, D), dtype=jnp.float32)
    poses = jax.random.normal(k2, (B, P, D), dtype=jnp.float32)
    neges = jax.random.normal(k3, (B, N, D), dtype=jnp.float32)
    loss = multi_arccosine_triplet_loss_soft_margin(anc, poses, neges)
    jax.block_until_ready(loss)
    ref = _reference(anc, poses, neges)
    assert np.allclose(np.asarray(loss), np.asarray(ref), atol=1e-3), (loss, ref)

    # Test 2: multi-step grid with a partial (non-divisible) last batch tile,
    # no jnp.pad anywhere.
    B2, P2, N2, D2 = 1500, 6, 5, 128
    anc2 = jax.random.normal(k4, (B2, D2), dtype=jnp.float32)
    poses2 = jax.random.normal(k5, (B2, P2, D2), dtype=jnp.float32)
    neges2 = jax.random.normal(k6, (B2, N2, D2), dtype=jnp.float32)
    loss2 = multi_arccosine_triplet_loss_soft_margin(anc2, poses2, neges2)
    jax.block_until_ready(loss2)
    ref2 = _reference(anc2, poses2, neges2)
    assert np.allclose(np.asarray(loss2), np.asarray(ref2), atol=1e-3), (loss2, ref2)

    # Test 3: bf16 inputs flow through the same kernel (DMA in bf16, in-kernel
    # f32 upcast) and match an f32 reference on the bf16-rounded values.
    anc_b = anc.astype(jnp.bfloat16)
    poses_b = poses.astype(jnp.bfloat16)
    neges_b = neges.astype(jnp.bfloat16)
    loss_b = multi_arccosine_triplet_loss_soft_margin(anc_b, poses_b, neges_b)
    jax.block_until_ready(loss_b)
    ref_b = _reference(anc_b.astype(jnp.float32), poses_b.astype(jnp.float32),
                       neges_b.astype(jnp.float32))
    assert np.allclose(np.asarray(loss_b), np.asarray(ref_b), atol=2e-3), (loss_b, ref_b)

    print("KERNEL_OK")
</pallas_src>

<mosaic_0001>
module attributes {stable_mosaic.version = 11 : i64} {
  func.func @kernel(%arg0: i32, %arg1: memref<4x32xf32, #tpu.memory_space<vmem>>, %arg2: memref<4x192xf32, #tpu.memory_space<vmem>>, %arg3: memref<4x160xf32, #tpu.memory_space<vmem>>, %arg4: memref<1x4xf32, #tpu.memory_space<vmem>>) attributes {dimension_semantics = [#tpu.dimension_semantics<parallel>], iteration_bounds = array<i64: 1>, scalar_prefetch = 0 : i64, scratch_operands = 0 : i64, tpu.core_type = #tpu.core_type<tc>, window_params = [{transform_indices = @transform_0, window_bounds = array<i64: 4, 32>}, {transform_indices = @transform_1, window_bounds = array<i64: 4, 192>}, {transform_indices = @transform_2, window_bounds = array<i64: 4, 160>}, {transform_indices = @transform_3, window_bounds = array<i64: 1, 4>}]} {
    %c0 = arith.constant 0 : index
    %c0_0 = arith.constant 0 : index
    %0 = vector.load %arg1[%c0, %c0_0] : memref<4x32xf32, #tpu.memory_space<vmem>>, vector<4x32xf32>
    %cst = arith.constant 1.000000e+00 : f32
    %1 = vector.broadcast %cst : f32 to vector<32x8xf32>
    %2 = arith.mulf %0, %0 : vector<4x32xf32>
    %cst_1 = arith.constant dense<0.000000e+00> : vector<4x8xf32>
    %3 = tpu.matmul %2, %1, %cst_1 {dimension_numbers = #tpu.dot_dimension_numbers<[1], [0], [0], [1], [0, 0, 1, 1], [], []>, precision = #tpu.contract_precision<fp32>} : vector<4x32xf32>, vector<32x8xf32>, vector<4x8xf32> -> vector<4x8xf32>
    %4 = vector.extract_strided_slice %3 {offsets = [0, 0], sizes = [4, 1], strides = [1, 1]} : vector<4x8xf32> to vector<4x1xf32>
    %c0_2 = arith.constant 0 : index
    %c0_3 = arith.constant 0 : index
    %5 = vector.load %arg2[%c0_2, %c0_3] : memref<4x192xf32, #tpu.memory_space<vmem>>, vector<4x192xf32>
    %6 = tpu.concatenate %0, %0, %0, %0, %0, %0 in 1 : vector<4x32xf32>, vector<4x32xf32>, vector<4x32xf32>, vector<4x32xf32>, vector<4x32xf32>, vector<4x32xf32> -> vector<4x192xf32>
    %7 = tpu.iota {dimensions = array<i32: 0>} : vector<192x6xi32>
    %8 = tpu.iota {dimensions = array<i32: 1>} : vector<192x6xi32>
    %c32_i32 = arith.constant 32 : i32
    %9 = vector.broadcast %c32_i32 : i32 to vector<192x6xi32>
    %10 = arith.muli %8, %9 : vector<192x6xi32>
    %11 = arith.cmpi sge, %7, %10 : vector<192x6xi32>
    %c32_i32_4 = arith.constant 32 : i32
    %12 = vector.broadcast %c32_i32_4 : i32 to vector<192x6xi32>
    %13 = arith.addi %10, %12 : vector<192x6xi32>
    %14 = arith.cmpi slt, %7, %13 : vector<192x6xi32>
    %15 = arith.andi %11, %14 : vector<192x6xi1>
    %16 = arith.extui %15 : vector<192x6xi1> to vector<192x6xi32>
    %17 = arith.sitofp %16 : vector<192x6xi32> to vector<192x6xf32>
    %18 = arith.mulf %6, %5 : vector<4x192xf32>
    %cst_5 = arith.constant dense<0.000000e+00> : vector<4x6xf32>
    %19 = tpu.matmul %18, %17, %cst_5 {dimension_numbers = #tpu.dot_dimension_numbers<[1], [0], [0], [1], [0, 0, 1, 1], [], []>, precision = #tpu.contract_precision<fp32>} : vector<4x192xf32>, vector<192x6xf32>, vector<4x6xf32> -> vector<4x6xf32>
    %20 = arith.mulf %5, %5 : vector<4x192xf32>
    %cst_6 = arith.constant dense<0.000000e+00> : vector<4x6xf32>
    %21 = tpu.matmul %20, %17, %cst_6 {dimension_numbers = #tpu.dot_dimension_numbers<[1], [0], [0], [1], [0, 0, 1, 1], [], []>, precision = #tpu.contract_precision<fp32>} : vector<4x192xf32>, vector<192x6xf32>, vector<4x6xf32> -> vector<4x6xf32>
    %22 = vector.broadcast %4 : vector<4x1xf32> to vector<4x6xf32>
    %23 = arith.mulf %22, %21 : vector<4x6xf32>
    %cst_7 = arith.constant 1.000000e-16 : f32
    %24 = vector.broadcast %cst_7 : f32 to vector<4x6xf32>
    %25 = arith.maximumf %23, %24 : vector<4x6xf32>
    %26 = math.rsqrt %25 : vector<4x6xf32>
    %27 = arith.mulf %19, %26 : vector<4x6xf32>
    %c0_8 = arith.constant 0 : index
    %c0_9 = arith.constant 0 : index
    %28 = vector.load %arg3[%c0_8, %c0_9] : memref<4x160xf32, #tpu.memory_space<vmem>>, vector<4x160xf32>
    %29 = tpu.concatenate %0, %0, %0, %0, %0 in 1 : vector<4x32xf32>, vector<4x32xf32>, vector<4x32xf32>, vector<4x32xf32>, vector<4x32xf32> -> vector<4x160xf32>
    %30 = tpu.iota {dimensions = array<i32: 0>} : vector<160x5xi32>
    %31 = tpu.iota {dimensions = array<i32: 1>} : vector<160x5xi32>
    %c32_i32_10 = arith.constant 32 : i32
    %32 = vector.broadcast %c32_i32_10 : i32 to vector<160x5xi32>
    %33 = arith.muli %31, %32 : vector<160x5xi32>
    %34 = arith.cmpi sge, %30, %33 : vector<160x5xi32>
    %c32_i32_11 = arith.constant 32 : i32
    %35 = vector.broadcast %c32_i32_11 : i32 to vector<160x5xi32>
    %36 = arith.addi %33, %35 : vector<160x5xi32>
    %37 = arith.cmpi slt, %30, %36 : vector<160x5xi32>
    %38 = arith.andi %34, %37 : vector<160x5xi1>
    %39 = arith.extui %38 : vector<160x5xi1> to vector<160x5xi32>
    %40 = arith.sitofp %39 : vector<160x5xi32> to vector<160x5xf32>
    %41 = arith.mulf %29, %28 : vector<4x160xf32>
    %cst_12 = arith.constant dense<0.000000e+00> : vector<4x5xf32>
    %42 = tpu.matmul %41, %40, %cst_12 {dimension_numbers = #tpu.dot_dimension_numbers<[1], [0], [0], [1], [0, 0, 1, 1], [], []>, precision = #tpu.contract_precision<fp32>} : vector<4x160xf32>, vector<160x5xf32>, vector<4x5xf32> -> vector<4x5xf32>
    %43 = arith.mulf %28, %28 : vector<4x160xf32>
    %cst_13 = arith.constant dense<0.000000e+00> : vector<4x5xf32>
    %44 = tpu.matmul %43, %40, %cst_13 {dimension_numbers = #tpu.dot_dimension_numbers<[1], [0], [0], [1], [0, 0, 1, 1], [], []>, precision = #tpu.contract_precision<fp32>} : vector<4x160xf32>, vector<160x5xf32>, vector<4x5xf32> -> vector<4x5xf32>
    %45 = vector.broadcast %4 : vector<4x1xf32> to vector<4x5xf32>
    %46 = arith.mulf %45, %44 : vector<4x5xf32>
    %cst_14 = arith.constant 1.000000e-16 : f32
    %47 = vector.broadcast %cst_14 : f32 to vector<4x5xf32>
    %48 = arith.maximumf %46, %47 : vector<4x5xf32>
    %49 = math.rsqrt %48 : vector<4x5xf32>
    %50 = arith.mulf %42, %49 : vector<4x5xf32>
    %51 = tpu.concatenate %27, %50 in 1 : vector<4x6xf32>, vector<4x5xf32> -> vector<4x11xf32>
    %52 = tpu.iota {dimensions = array<i32: 0>} : vector<11x11xi32>
    %53 = tpu.iota {dimensions = array<i32: 1>} : vector<11x11xi32>
    %54 = arith.cmpi eq, %52, %53 : vector<11x11xi32>
    %55 = arith.extui %54 : vector<11x11xi1> to vector<11x11xi32>
    %56 = arith.sitofp %55 : vector<11x11xi32> to vector<11x11xf32>
    %cst_15 = arith.constant dense<0.000000e+00> : vector<11x4xf32>
    %57 = tpu.matmul %56, %51, %cst_15 {dimension_numbers = #tpu.dot_dimension_numbers<[1], [1], [0], [0], [0, 0, 1, 0], [], []>, precision = #tpu.contract_precision<fp32>} : vector<11x11xf32>, vector<4x11xf32>, vector<11x4xf32> -> vector<11x4xf32>
    %cst_16 = arith.constant -1.000000e+00 : f32
    %58 = vector.broadcast %cst_16 : f32 to vector<11x4xf32>
    %59 = arith.maximumf %57, %58 : vector<11x4xf32>
    %cst_17 = arith.constant 1.000000e+00 : f32
    %60 = vector.broadcast %cst_17 : f32 to vector<11x4xf32>
    %61 = arith.minimumf %59, %60 : vector<11x4xf32>
    %62 = math.absf %61 : vector<11x4xf32>
    %cst_18 = arith.constant -0.0012624911 : f32
    %63 = vector.broadcast %cst_18 : f32 to vector<11x4xf32>
    %64 = arith.mulf %63, %62 : vector<11x4xf32>
    %cst_19 = arith.constant 6.670090e-03 : f32
    %65 = vector.broadcast %cst_19 : f32 to vector<11x4xf32>
    %66 = arith.addf %64, %65 : vector<11x4xf32>
    %67 = arith.mulf %66, %62 : vector<11x4xf32>
    %cst_20 = arith.constant -0.0170881264 : f32
    %68 = vector.broadcast %cst_20 : f32 to vector<11x4xf32>
    %69 = arith.addf %67, %68 : vector<11x4xf32>
    %70 = arith.mulf %69, %62 : vector<11x4xf32>
    %cst_21 = arith.constant 0.0308918804 : f32
    %71 = vector.broadcast %cst_21 : f32 to vector<11x4xf32>
    %72 = arith.addf %70, %71 : vector<11x4xf32>
    %73 = arith.mulf %72, %62 : vector<11x4xf32>
    %cst_22 = arith.constant -0.0501743034 : f32
    %74 = vector.broadcast %cst_22 : f32 to vector<11x4xf32>
    %75 = arith.addf %73, %74 : vector<11x4xf32>
    %76 = arith.mulf %75, %62 : vector<11x4xf32>
    %cst_23 = arith.constant 0.0889789909 : f32
    %77 = vector.broadcast %cst_23 : f32 to vector<11x4xf32>
    %78 = arith.addf %76, %77 : vector<11x4xf32>
    %79 = arith.mulf %78, %62 : vector<11x4xf32>
    %cst_24 = arith.constant -0.214598805 : f32
    %80 = vector.broadcast %cst_24 : f32 to vector<11x4xf32>
    %81 = arith.addf %79, %80 : vector<11x4xf32>
    %82 = arith.mulf %81, %62 : vector<11x4xf32>
    %cst_25 = arith.constant 1.57079625 : f32
    %83 = vector.broadcast %cst_25 : f32 to vector<11x4xf32>
    %84 = arith.addf %82, %83 : vector<11x4xf32>
    %cst_26 = arith.constant 1.000000e+00 : f32
    %85 = vector.broadcast %cst_26 : f32 to vector<11x4xf32>
    %86 = arith.subf %85, %62 : vector<11x4xf32>
    %cst_27 = arith.constant 0.000000e+00 : f32
    %87 = vector.broadcast %cst_27 : f32 to vector<11x4xf32>
    %88 = arith.maximumf %86, %87 : vector<11x4xf32>
    %89 = math.sqrt %88 : vector<11x4xf32>
    %90 = arith.mulf %89, %84 : vector<11x4xf32>
    %cst_28 = arith.constant 0.000000e+00 : f32
    %91 = vector.broadcast %cst_28 : f32 to vector<11x4xf32>
    %92 = arith.cmpf olt, %61, %91 : vector<11x4xf32>
    %cst_29 = arith.constant 3.14159274 : f32
    %93 = vector.broadcast %cst_29 : f32 to vector<11x4xf32>
    %94 = arith.subf %93, %90 : vector<11x4xf32>
    %95 = arith.select %92, %94, %90 : vector<11x4xi1>, vector<11x4xf32>
    %96 = vector.extract_strided_slice %95 {offsets = [0, 0], sizes = [6, 4], strides = [1, 1]} : vector<11x4xf32> to vector<6x4xf32>
    %cst_30 = arith.constant 0.000000e+00 : f32
    %97 = vector.broadcast %cst_30 : f32 to vector<6x4xf32>
    %cst_31 = arith.constant 0.000000e+00 : f32
    %98 = vector.broadcast %cst_31 : f32 to vector<6x4xf32>
    %99 = vector.extract_strided_slice %96 {offsets = [0, 0], sizes = [1, 4], strides = [1, 1]} : vector<6x4xf32> to vector<1x4xf32>
    %100 = vector.broadcast %99 : vector<1x4xf32> to vector<6x4xf32>
    %101 = arith.cmpf olt, %100, %96 : vector<6x4xf32>
    %102 = arith.extui %101 : vector<6x4xi1> to vector<6x4xi32>
    %103 = arith.sitofp %102 : vector<6x4xi32> to vector<6x4xf32>
    %104 = arith.addf %97, %103 : vector<6x4xf32>
    %105 = vector.broadcast %99 : vector<1x4xf32> to vector<6x4xf32>
    %106 = arith.cmpf ole, %105, %96 : vector<6x4xf32>
    %107 = arith.extui %106 : vector<6x4xi1> to vector<6x4xi32>
    %108 = arith.sitofp %107 : vector<6x4xi32> to vector<6x4xf32>
    %109 = arith.addf %98, %108 : vector<6x4xf32>
    %110 = vector.extract_strided_slice %96 {offsets = [1, 0], sizes = [1, 4], strides = [1, 1]} : vector<6x4xf32> to vector<1x4xf32>
    %111 = vector.broadcast %110 : vector<1x4xf32> to vector<6x4xf32>
    %112 = arith.cmpf olt, %111, %96 : vector<6x4xf32>
    %113 = arith.extui %112 : vector<6x4xi1> to vector<6x4xi32>
    %114 = arith.sitofp %113 : vector<6x4xi32> to vector<6x4xf32>
    %115 = arith.addf %104, %114 : vector<6x4xf32>
    %116 = vector.broadcast %110 : vector<1x4xf32> to vector<6x4xf32>
    %117 = arith.cmpf ole, %116, %96 : vector<6x4xf32>
    %118 = arith.extui %117 : vector<6x4xi1> to vector<6x4xi32>
    %119 = arith.sitofp %118 : vector<6x4xi32> to vector<6x4xf32>
    %120 = arith.addf %109, %119 : vector<6x4xf32>
    %121 = vector.extract_strided_slice %96 {offsets = [2, 0], sizes = [1, 4], strides = [1, 1]} : vector<6x4xf32> to vector<1x4xf32>
    %122 = vector.broadcast %121 : vector<1x4xf32> to vector<6x4xf32>
    %123 = arith.cmpf olt, %122, %96 : vector<6x4xf32>
    %124 = arith.extui %123 : vector<6x4xi1> to vector<6x4xi32>
    %125 = arith.sitofp %124 : vector<6x4xi32> to vector<6x4xf32>
    %126 = arith.addf %115, %125 : vector<6x4xf32>
    %127 = vector.broadcast %121 : vector<1x4xf32> to vector<6x4xf32>
    %128 = arith.cmpf ole, %127, %96 : vector<6x4xf32>
    %129 = arith.extui %128 : vector<6x4xi1> to vector<6x4xi32>
    %130 = arith.sitofp %129 : vector<6x4xi32> to vector<6x4xf32>
    %131 = arith.addf %120, %130 : vector<6x4xf32>
    %132 = vector.extract_strided_slice %96 {offsets = [3, 0], sizes = [1, 4], strides = [1, 1]} : vector<6x4xf32> to vector<1x4xf32>
    %133 = vector.broadcast %132 : vector<1x4xf32> to vector<6x4xf32>
    %134 = arith.cmpf olt, %133, %96 : vector<6x4xf32>
    %135 = arith.extui %134 : vector<6x4xi1> to vector<6x4xi32>
    %136 = arith.sitofp %135 : vector<6x4xi32> to vector<6x4xf32>
    %137 = arith.addf %126, %136 : vector<6x4xf32>
    %138 = vector.broadcast %132 : vector<1x4xf32> to vector<6x4xf32>
    %139 = arith.cmpf ole, %138, %96 : vector<6x4xf32>
    %140 = arith.extui %139 : vector<6x4xi1> to vector<6x4xi32>
    %141 = arith.sitofp %140 : vector<6x4xi32> to vector<6x4xf32>
    %142 = arith.addf %131, %141 : vector<6x4xf32>
    %143 = vector.extract_strided_slice %96 {offsets = [4, 0], sizes = [1, 4], strides = [1, 1]} : vector<6x4xf32> to vector<1x4xf32>
    %144 = vector.broadcast %143 : vector<1x4xf32> to vector<6x4xf32>
    %145 = arith.cmpf olt, %144, %96 : vector<6x4xf32>
    %146 = arith.extui %145 : vector<6x4xi1> to vector<6x4xi32>
    %147 = arith.sitofp %146 : vector<6x4xi32> to vector<6x4xf32>
    %148 = arith.addf %137, %147 : vector<6x4xf32>
    %149 = vector.broadcast %143 : vector<1x4xf32> to vector<6x4xf32>
    %150 = arith.cmpf ole, %149, %96 : vector<6x4xf32>
    %151 = arith.extui %150 : vector<6x4xi1> to vector<6x4xi32>
    %152 = arith.sitofp %151 : vector<6x4xi32> to vector<6x4xf32>
    %153 = arith.addf %142, %152 : vector<6x4xf32>
    %154 = vector.extract_strided_slice %96 {offsets = [5, 0], sizes = [1, 4], strides = [1, 1]} : vector<6x4xf32> to vector<1x4xf32>
    %155 = vector.broadcast %154 : vector<1x4xf32> to vector<6x4xf32>
    %156 = arith.cmpf olt, %155, %96 : vector<6x4xf32>
    %157 = arith.extui %156 : vector<6x4xi1> to vector<6x4xi32>
    %158 = arith.sitofp %157 : vector<6x4xi32> to vector<6x4xf32>
    %159 = arith.addf %148, %158 : vector<6x4xf32>
    %160 = vector.broadcast %154 : vector<1x4xf32> to vector<6x4xf32>
    %161 = arith.cmpf ole, %160, %96 : vector<6x4xf32>
    %162 = arith.extui %161 : vector<6x4xi1> to vector<6x4xi32>
    %163 = arith.sitofp %162 : vector<6x4xi32> to vector<6x4xf32>
    %164 = arith.addf %153, %163 : vector<6x4xf32>
    %cst_32 = arith.constant 2.000000e+00 : f32
    %165 = vector.broadcast %cst_32 : f32 to vector<6x4xf32>
    %166 = arith.cmpf ole, %159, %165 : vector<6x4xf32>
    %cst_33 = arith.constant 2.000000e+00 : f32
    %167 = vector.broadcast %cst_33 : f32 to vector<6x4xf32>
    %168 = arith.cmpf ogt, %164, %167 : vector<6x4xf32>
    %169 = arith.andi %166, %168 : vector<6x4xi1>
    %170 = arith.extui %169 : vector<6x4xi1> to vector<6x4xi32>
    %171 = arith.sitofp %170 : vector<6x4xi32> to vector<6x4xf32>
    %172 = arith.mulf %96, %171 : vector<6x4xf32>
    %cst_34 = arith.constant dense<0xFF800000> : vector<4xf32>
    %173 = vector.multi_reduction <maximumf>, %172, %cst_34 [0] : vector<6x4xf32> to vector<4xf32>
    %174 = vector.shape_cast %173 : vector<4xf32> to vector<1x4xf32>
    %175 = vector.extract_strided_slice %95 {offsets = [6, 0], sizes = [5, 4], strides = [1, 1]} : vector<11x4xf32> to vector<5x4xf32>
    %cst_35 = arith.constant 0.000000e+00 : f32
    %176 = vector.broadcast %cst_35 : f32 to vector<5x4xf32>
    %cst_36 = arith.constant 0.000000e+00 : f32
    %177 = vector.broadcast %cst_36 : f32 to vector<5x4xf32>
    %178 = vector.extract_strided_slice %175 {offsets = [0, 0], sizes = [1, 4], strides = [1, 1]} : vector<5x4xf32> to vector<1x4xf32>
    %179 = vector.broadcast %178 : vector<1x4xf32> to vector<5x4xf32>
    %180 = arith.cmpf olt, %179, %175 : vector<5x4xf32>
    %181 = arith.extui %180 : vector<5x4xi1> to vector<5x4xi32>
    %182 = arith.sitofp %181 : vector<5x4xi32> to vector<5x4xf32>
    %183 = arith.addf %176, %182 : vector<5x4xf32>
    %184 = vector.broadcast %178 : vector<1x4xf32> to vector<5x4xf32>
    %185 = arith.cmpf ole, %184, %175 : vector<5x4xf32>
    %186 = arith.extui %185 : vector<5x4xi1> to vector<5x4xi32>
    %187 = arith.sitofp %186 : vector<5x4xi32> to vector<5x4xf32>
    %188 = arith.addf %177, %187 : vector<5x4xf32>
    %189 = vector.extract_strided_slice %175 {offsets = [1, 0], sizes = [1, 4], strides = [1, 1]} : vector<5x4xf32> to vector<1x4xf32>
    %190 = vector.broadcast %189 : vector<1x4xf32> to vector<5x4xf32>
    %191 = arith.cmpf olt, %190, %175 : vector<5x4xf32>
    %192 = arith.extui %191 : vector<5x4xi1> to vector<5x4xi32>
    %193 = arith.sitofp %192 : vector<5x4xi32> to vector<5x4xf32>
    %194 = arith.addf %183, %193 : vector<5x4xf32>
    %195 = vector.broadcast %189 : vector<1x4xf32> to vector<5x4xf32>
    %196 = arith.cmpf ole, %195, %175 : vector<5x4xf32>
    %197 = arith.extui %196 : vector<5x4xi1> to vector<5x4xi32>
    %198 = arith.sitofp %197 : vector<5x4xi32> to vector<5x4xf32>
    %199 = arith.addf %188, %198 : vector<5x4xf32>
    %200 = vector.extract_strided_slice %175 {offsets = [2, 0], sizes = [1, 4], strides = [1, 1]} : vector<5x4xf32> to vector<1x4xf32>
    %201 = vector.broadcast %200 : vector<1x4xf32> to vector<5x4xf32>
    %202 = arith.cmpf olt, %201, %175 : vector<5x4xf32>
    %203 = arith.extui %202 : vector<5x4xi1> to vector<5x4xi32>
    %204 = arith.sitofp %203 : vector<5x4xi32> to vector<5x4xf32>
    %205 = arith.addf %194, %204 : vector<5x4xf32>
    %206 = vector.broadcast %200 : vector<1x4xf32> to vector<5x4xf32>
    %207 = arith.cmpf ole, %206, %175 : vector<5x4xf32>
    %208 = arith.extui %207 : vector<5x4xi1> to vector<5x4xi32>
    %209 = arith.sitofp %208 : vector<5x4xi32> to vector<5x4xf32>
    %210 = arith.addf %199, %209 : vector<5x4xf32>
    %211 = vector.extract_strided_slice %175 {offsets = [3, 0], sizes = [1, 4], strides = [1, 1]} : vector<5x4xf32> to vector<1x4xf32>
    %212 = vector.broadcast %211 : vector<1x4xf32> to vector<5x4xf32>
    %213 = arith.cmpf olt, %212, %175 : vector<5x4xf32>
    %214 = arith.extui %213 : vector<5x4xi1> to vector<5x4xi32>
    %215 = arith.sitofp %214 : vector<5x4xi32> to vector<5x4xf32>
    %216 = arith.addf %205, %215 : vector<5x4xf32>
    %217 = vector.broadcast %211 : vector<1x4xf32> to vector<5x4xf32>
    %218 = arith.cmpf ole, %217, %175 : vector<5x4xf32>
    %219 = arith.extui %218 : vector<5x4xi1> to vector<5x4xi32>
    %220 = arith.sitofp %219 : vector<5x4xi32> to vector<5x4xf32>
    %221 = arith.addf %210, %220 : vector<5x4xf32>
    %222 = vector.extract_strided_slice %175 {offsets = [4, 0], sizes = [1, 4], strides = [1, 1]} : vector<5x4xf32> to vector<1x4xf32>
    %223 = vector.broadcast %222 : vector<1x4xf32> to vector<5x4xf32>
    %224 = arith.cmpf olt, %223, %175 : vector<5x4xf32>
    %225 = arith.extui %224 : vector<5x4xi1> to vector<5x4xi32>
    %226 = arith.sitofp %225 : vector<5x4xi32> to vector<5x4xf32>
    %227 = arith.addf %216, %226 : vector<5x4xf32>
    %228 = vector.broadcast %222 : vector<1x4xf32> to vector<5x4xf32>
    %229 = arith.cmpf ole, %228, %175 : vector<5x4xf32>
    %230 = arith.extui %229 : vector<5x4xi1> to vector<5x4xi32>
    %231 = arith.sitofp %230 : vector<5x4xi32> to vector<5x4xf32>
    %232 = arith.addf %221, %231 : vector<5x4xf32>
    %cst_37 = arith.constant 2.000000e+00 : f32
    %233 = vector.broadcast %cst_37 : f32 to vector<5x4xf32>
    %234 = arith.cmpf ole, %227, %233 : vector<5x4xf32>
    %cst_38 = arith.constant 2.000000e+00 : f32
    %235 = vector.broadcast %cst_38 : f32 to vector<5x4xf32>
    %236 = arith.cmpf ogt, %232, %235 : vector<5x4xf32>
    %237 = arith.andi %234, %236 : vector<5x4xi1>
    %238 = arith.extui %237 : vector<5x4xi1> to vector<5x4xi32>
    %239 = arith.sitofp %238 : vector<5x4xi32> to vector<5x4xf32>
    %240 = arith.mulf %175, %239 : vector<5x4xf32>
    %cst_39 = arith.constant dense<0xFF800000> : vector<4xf32>
    %241 = vector.multi_reduction <maximumf>, %240, %cst_39 [0] : vector<5x4xf32> to vector<4xf32>
    %242 = vector.shape_cast %241 : vector<4xf32> to vector<1x4xf32>
    %243 = arith.subf %174, %242 : vector<1x4xf32>
    %cst_40 = arith.constant 2.000000e-01 : f32
    %244 = vector.broadcast %cst_40 : f32 to vector<1x4xf32>
    %245 = arith.addf %243, %244 : vector<1x4xf32>
    %cst_41 = arith.constant 0.000000e+00 : f32
    %246 = vector.broadcast %cst_41 : f32 to vector<1x4xf32>
    %247 = arith.maximumf %245, %246 : vector<1x4xf32>
    %248 = math.exp %247 : vector<1x4xf32>
    %cst_42 = arith.constant 1.000000e+00 : f32
    %249 = vector.broadcast %cst_42 : f32 to vector<1x4xf32>
    %250 = arith.addf %249, %248 : vector<1x4xf32>
    %251 = math.log %250 : vector<1x4xf32>
    %c0_43 = arith.constant 0 : index
    %c0_44 = arith.constant 0 : index
    %252 = vector.load %arg4[%c0_43, %c0_44] : memref<1x4xf32, #tpu.memory_space<vmem>>, vector<1x4xf32>
    tpu.vector_store %arg4[%c0_43, %c0_44], %251 {strides = array<i32>} : memref<1x4xf32, #tpu.memory_space<vmem>>, vector<1x4xf32>,
    return
  }
  func.func @transform_0(%arg0: i32) -> (i32, i32) {
    %c0_i32 = arith.constant 0 : i32
    %c0_i32_0 = arith.constant 0 : i32
    return %arg0, %c0_i32 : i32, i32
  }
  func.func @transform_1(%arg0: i32) -> (i32, i32) {
    %c0_i32 = arith.constant 0 : i32
    %c0_i32_0 = arith.constant 0 : i32
    return %arg0, %c0_i32 : i32, i32
  }
  func.func @transform_2(%arg0: i32) -> (i32, i32) {
    %c0_i32 = arith.constant 0 : i32
    %c0_i32_0 = arith.constant 0 : i32
    return %arg0, %c0_i32 : i32, i32
  }
  func.func @transform_3(%arg0: i32) -> (i32, i32) {
    %c0_i32 = arith.constant 0 : i32
    %c0_i32_0 = arith.constant 0 : i32
    return %c0_i32, %arg0 : i32, i32
  }
}

</mosaic_0001>

<bundles_post_ra>
// kernel: _loss_impl.1
= control target key start
LH: loop header
LB: loop body
LE: loop exit
PB: predicated region body
PF: predicated region fallthrough
CT: control target
= control target key end

     0   :  { %v7402_v1 = vmov 0.0   ;;  %vm4856_vm0 = vmmov 0   ;;  %vm7386_vm1 = vcmask 261120   ;;  %v469_v2 = vlaneseq  ;;  %s4857_s14 = smov 32   ;;  %s4858_s15 = smov 96   ;;  %s7382_s0 = inlined_call_operand.vmem [shape: f32[4,32], index: 0, kind: input, shape index: {}]   ;;  %s7383_s1 = inlined_call_operand.vmem [shape: f32[4,192], index: 1, kind: input, shape index: {}]   ;;  %s7384_s2 = inlined_call_operand.vmem [shape: f32[4,160], index: 2, kind: input, shape index: {}]   ;;  %s7385_s3 = inlined_call_operand.vmem [shape: f32[1,4], index: 3, kind: output, shape index: {}]  }
   0x1   :  { %v4886_v0 = vld [vmem:[%s7382_s0] sm:$0xf]  ;;  %4752 = vmatprep.subr.mxu0 %v7402_v1  ;;  %4760 = vmatprep.mubr.msk.f32.mxu0 %vm4856_vm0, %v7402_v1  ;;  %v7395_v4 = vmov 1.0   ;;  %s4860_s16 = smov 64   ;;  %v7575_v19 = vmov 0  ;;  %v7577_v23 = vmov 0 }
   0x2   :  { %455 = vrot.lane.b32.xlu0 %v4886_v0, %s4857_s14  ;;  %461 = vrot.lane.b32.xlu1 %v4886_v0, %s4858_s15  ;;  %v15_v3 = vmul.f32 %v4886_v0, %v4886_v0  ;;  %v4897_v5 = vshrl.u32 %v469_v2, 7  ;;  %v4899_v6 = vand.u32 127, %v469_v2  ;;  %v7579_v26 = vmov 0 }
   0x3   :  { %4753 = vmatpush3.msra.mxu0 %v7395_v4  ;;  %4763 = vmatprep.subr.mxu1 %v7402_v1  ;;  %v7581_v31 = vmov 0  ;;  %v7584_v35 = vmov 0  ;;  %v7586_v36 = vmov 0  ;;  %v7590_v44 = vmov 0 }
   0x4   :  { %7573 = vst [vmem:[#allocation2_spill] sm:$0xff] %v4897_v5  ;;  %7574 = vst [vmem:[#allocation3_spill] sm:$0xff] %v4899_v6  ;;  %4754 = vmatprep.subr.mxu0 %v7402_v1  ;;  %v18_v7 = vsel %vm7386_vm1, %v15_v3, 0  ;;  %4764 = vmatpush3.msra.mxu1 %v7402_v1  ;;  %v485_v9 = vadd.s32 120, %v4897_v5  ;;  %v4911_v10 = vmul.u32 32, %v4899_v6  ;;  %v484_v11 = vadd.s32 112, %v4897_v5 }
   0x5   :  { %4755 = vmatpush3.msra.mxu0 %v7395_v4  ;;  %v4905_v8 = vand.u32 4294901760, %v18_v7  ;;  %4765 = vmatprep.mubr.msk.f32.mxu1 %vm4856_vm0, %v7402_v1  ;;  %v483_v12 = vadd.s32 104, %v4897_v5  ;;  %v482_v13 = vadd.s32 96, %v4897_v5  ;;  %v481_v14 = vadd.s32 88, %v4897_v5 }
   0x6   :  { %458 = vrot.lane.b32.xlu0 %v4886_v0, %s4860_s16  ;;  %4756 = vmatprep.subr.mxu0 %v7402_v1  ;;  %vm512_vm2 = vcmp.ge.s32.totalorder %v485_v9, %v4911_v10  ;;  %v4926_v16 = vadd.s32 32, %v4911_v10  ;;  %v480_v17 = vadd.s32 80, %v4897_v5  ;;  %vm511_vm3 = vcmp.ge.s32.totalorder %v484_v11, %v4911_v10 }
   0x7   :  { %4757 = vmatpush3.msra.mxu0 %v7395_v4  ;;  %v4921_v15 = vsub.f32 %v18_v7, %v4905_v8  ;;  %4766 = vmatmul.mubr.f32.vlgmr.msra.gmra.mxu1 %v4905_v8  ;;  %vm510_vm4 = vcmp.ge.s32.totalorder %v483_v12, %v4911_v10  ;;  %vm509_vm9 = vcmp.ge.s32.totalorder %v482_v13, %v4911_v10  ;;  %v479_v20 = vadd.s32 72, %v4897_v5 }
   0x8   :  { %4758 = vmatprep.subr.mxu0 %v7402_v1  ;;  %4768 = vmatprep.subr.mxu1 %v7402_v1  ;;  %vm537_vm5 = vcmp.lt.s32.totalorder %v485_v9, %v4926_v16  ;;  %vm536_vm6 = vcmp.lt.s32.totalorder %v484_v11, %v4926_v16  ;;  %vm535_vm7 = vcmp.lt.s32.totalorder %v483_v12, %v4926_v16  ;;  %v478_v27 = vadd.s32 64, %v4897_v5 }
   0x9   :  { %4759 = vmatpush3.msra.mxu0 %v7395_v4  ;;  %v87_v18 = vand.u32 4294901760, %v4921_v15  ;;  %4769 = vmatpush3.msra.mxu1 %v7402_v1  ;;  %vm4944_vm8 = vmand %vm512_vm2, %vm537_vm5  ;;  %vm534_vm10 = vcmp.lt.s32.totalorder %v482_v13, %v4926_v16  ;;  %vm508_vm11 = vcmp.ge.s32.totalorder %v481_v14, %v4911_v10  ;;  %vm533_vm13 = vcmp.lt.s32.totalorder %v481_v14, %v4926_v16 }
   0xa   :  { %4784 = vmatprep.subr.mxu0 %v7402_v1  ;;  %4770 = vmatprep.mubr.msk.f32.mxu1 %vm4856_vm0, %v7402_v1  ;;  %v7576_v19 = vsel %vm4944_vm8, 4294967295, %v7575_v19  ;;  %v4395_v22 = vsel %vm4944_vm8, 1.0, %v7402_v1  ;;  %vm4962_vm12 = vmand %vm511_vm3, %vm536_vm6  ;;  %vm507_vm14 = vcmp.ge.s32.totalorder %v480_v17, %v4911_v10  ;;  %vm532_vm2 = vcmp.lt.s32.totalorder %v480_v17, %v4926_v16 }
   0xb   :  { %v88_v21 = vsub.f32 %v4921_v15, %v87_v18  ;;  %4773 = vmatprep.subr.mxu1 %v7402_v1  ;;  %4771 = vmatmul.mubr.f32.vlgmr.msra.gmra.mxu1 %v4921_v15  ;;  %v7578_v23 = vsel %vm4962_vm12, 4294967295, %v7577_v23  ;;  %v4971_v24 = vsub.f32 %v4395_v22, %v4395_v22  ;;  %v4394_v25 = vsel %vm4962_vm12, 1.0, %v7402_v1  ;;  %vm4980_vm15 = vmand %vm510_vm4, %vm535_vm7 }
   0xc   :  { %4774 = vmatpush3.msra.mxu1 %v7395_v4  ;;  %4781 = vmatprep.mubr.msk.f32.mxu1 %vm4856_vm0, %v7402_v1  ;;  %v7580_v26 = vsel %vm4980_vm15, 4294967295, %v7579_v26  ;;  %v4987_v29 = vsub.f32 %v4394_v25, %v4394_v25  ;;  %v4393_v30 = vsel %vm4980_vm15, 1.0, %v7402_v1  ;;  %vm4996_vm3 = vmand %vm509_vm9, %vm534_vm10  ;;  %vm506_vm6 = vcmp.ge.s32.totalorder %v479_v20, %v4911_v10 }
   0xd   :  { %v89_v28 = vand.u32 4294901760, %v88_v21  ;;  %4775 = vmatprep.subr.mxu1 %v7402_v1  ;;  %v7582_v31 = vsel %vm4996_vm3, 4294967295, %v7581_v31  ;;  %v5002_v32 = vand.u32 4294901760, %v4971_v24  ;;  %v5004_v33 = vsub.f32 %v4393_v30, %v4393_v30  ;;  %vm5013_vm4 = vmand %vm508_vm11, %vm533_vm13 }
   0xe   :  { %4776 = vmatpush3.msra.mxu1 %v7395_v4  ;;  %v4392_v34 = vsel %vm4996_vm3, 1.0, %v7402_v1  ;;  %v7585_v35 = vsel %vm5013_vm4, 4294967295, %v7584_v35  ;;  %vm5020_vm5 = vmand %vm507_vm14, %vm532_vm2  ;;  %vm531_vm7 = vcmp.lt.s32.totalorder %v479_v20, %v4926_v16  ;;  %v4391_v38 = vsel %vm5013_vm4, 1.0, %v7402_v1 }
   0xf   :  { %7583 = vst [vmem:[#allocation4_spill] sm:$0xff] %v5002_v32  ;;  %4761 = vmatmul.mubr.f32.vlgmr.msra.gmra.mxu0 %v89_v28  ;;  %4777 = vmatprep.subr.mxu1 %v7402_v1  ;;  %v7587_v36 = vsel %vm5020_vm5, 4294967295, %v7586_v36  ;;  %v5029_v37 = vsub.f32 %v4392_v34, %v4392_v34  ;;  %vm505_vm9 = vcmp.ge.s32.totalorder %v478_v27, %v4911_v10  ;;  %v5039_v39 = vand.u32 4294901760, %v4987_v29  ;;  %vm5055_vm11 = vmand %vm506_vm6, %vm531_vm7 }
  0x10   :  { %4785 = vmatpush3.msra.mxu0 %v7402_v1  ;;  %4786 = vmatprep.mubr.msk.f32.mxu0 %vm4856_vm0, %v7402_v1  ;;  %vm530_vm10 = vcmp.lt.s32.totalorder %v478_v27, %v4926_v16  ;;  %v4390_v40 = vsel %vm5020_vm5, 1.0, %v7402_v1  ;;  %v477_v41 = vadd.s32 56, %v4897_v5  ;;  %v734_v42 = vsub.f32 %v4971_v24, %v5002_v32 }
  0x11   :  { %4789 = vmatprep.subr.mxu0 %v7402_v1  ;;  %4778 = vmatpush3.msra.mxu1 %v7395_v4  ;;  %7588 = vst [vmem:[#allocation5_spill] sm:$0xff] %v5039_v39  ;;  %v5049_v43 = vand.u32 4294901760, %v5004_v33  ;;  %v7591_v44 = vsel %vm5055_vm11, 4294967295, %v7590_v44  ;;  %v476_v45 = vadd.s32 48, %v4897_v5  ;;  %v5062_v46 = vsub.f32 %v4391_v38, %v4391_v38  ;;  %vm5066_vm13 = vmand %vm505_vm9, %vm530_vm10 }
  0x12   :  { %4779 = vmatprep.subr.mxu1 %v7402_v1  ;;  %v7592_v47 = vmov 0  ;;  %v5074_v48 = vand.u32 4294901760, %v5029_v37  ;;  %v5076_v49 = vsub.f32 %v4390_v40, %v4390_v40  ;;  %v741_v50 = vsub.f32 %v4987_v29, %v5039_v39 }
  0x13   :  { %7589 = vst [vmem:[#allocation6_spill] sm:$0xff] %v5049_v43  ;;  %4787 = vmatmul.mubr.f32.vlgmr.msra.gmra.mxu0 %v4905_v8  ;;  %4780 = vmatpush3.msra.mxu1 %v7395_v4  ;;  %v7593_v47 = vsel %vm5066_vm13, 4294967295, %v7592_v47  ;;  %v4389_v51 = vsel %vm5055_vm11, 1.0, %v7402_v1  ;;  %vm504_vm14 = vcmp.ge.s32.totalorder %v477_v41, %v4911_v10  ;;  %v5089_v52 = vand.u32 4294901760, %v734_v42 }
  0x14   :  { %4790 = vmatpush3.msra.mxu0 %v7395_v4  ;;  %4797 = vmatprep.mubr.msk.f32.mxu0 %vm4856_vm0, %v7402_v1  ;;  %7594 = vst [vmem:[#allocation7_spill] sm:$0xff] %v5074_v48  ;;  %vm529_vm0 = vcmp.lt.s32.totalorder %v477_v41, %v4926_v16  ;;  %v748_v53 = vsub.f32 %v5004_v33, %v5049_v43  ;;  %v4388_v54 = vsel %vm5066_vm13, 1.0, %v7402_v1  ;;  %v7596_v55 = vmov 0 }
  0x15   :  { %4791 = vmatprep.subr.mxu0 %v7402_v1  ;;  %4782 = vmatmul.mubr.f32.vlgmr.msra.gmra.mxu1 %v87_v18  ;;  %7595 = vst [vmem:[#allocation8_spill] sm:$0xff] %v5089_v52  ;;  %vm5097_vm2 = vmand %vm504_vm14, %vm529_vm0  ;;  %vm503_vm6 = vcmp.ge.s32.totalorder %v476_v45, %v4911_v10  ;;  %v5107_v56 = vand.u32 4294901760, %v5062_v46  ;;  %vm528_vm7 = vcmp.lt.s32.totalorder %v476_v45, %v4926_v16  ;;  %v475_v58 = vadd.s32 40, %v4897_v5 }
  0x16   :  { %4792 = vmatpush3.msra.mxu0 %v7395_v4  ;;  %626 = vmatprep.subr.mxu1 %v7402_v1  ;;  %v7597_v55 = vsel %vm5097_vm2, 4294967295, %v7596_v55  ;;  %v4387_v57 = vsel %vm5097_vm2, 1.0, %v7402_v1  ;;  %v755_v59 = vsub.f32 %v5029_v37, %v5074_v48  ;;  %v5119_v60 = vand.u32 4294901760, %v5076_v49  ;;  %vm5123_vm9 = vmand %vm503_vm6, %vm528_vm7 }
  0x17   :  { %4793 = vmatprep.subr.mxu0 %v7402_v1  ;;  %4404 = vmatpush1.msk.msra.mxu1 %vm4944_vm8, %v7395_v4  ;;  %7598 = vst [vmem:[#allocation9_spill] sm:$0xff] %v5107_v56  ;;  %v5121_v61 = vsub.f32 %v4389_v51, %v4389_v51  ;;  %v7600_v62 = vmov 0  ;;  %v474_v63 = vadd.s32 32, %v4897_v5  ;;  %v5132_v2 = vsub.f32 %v4388_v54, %v4388_v54 }
  0x18   :  { %4794 = vmatpush3.msra.mxu0 %v7395_v4  ;;  %629 = vmatprep.subr.mxu1 %v7402_v1  ;;  %7599 = vst [vmem:[#allocation10_spill] sm:$0xff] %v5119_v60  ;;  %v7601_v62 = vsel %vm5123_vm9, 4294967295, %v7600_v62  ;;  %vm502_vm10 = vcmp.ge.s32.totalorder %v475_v58, %v4911_v10  ;;  %vm527_vm14 = vcmp.lt.s32.totalorder %v475_v58, %v4926_v16  ;;  %v473_v3 = vadd.s32 24, %v4897_v5 }
  0x19   :  { %4795 = vmatprep.subr.mxu0 %v7402_v1  ;;  %4405 = vmatpush1.msk.msra.mxu1 %vm4962_vm12, %v7395_v4  ;;  %v5138_v7 = vand.u32 4294901760, %v741_v50  ;;  %v5140_v9 = vand.u32 4294901760, %v748_v53  ;;  %v5143_v11 = vsub.f32 %v4387_v57, %v4387_v57  ;;  %vm5145_vm0 = vmand %vm502_vm10, %vm527_vm14  ;;  %v7604_v12 = vmov 0 }
  0x1a   :  { %4796 = vmatpush3.msra.mxu0 %v7395_v4  ;;  %632 = vmatprep.subr.mxu1 %v7402_v1  ;;  %v7605_v12 = vsel %vm5145_vm0, 4294967295, %v7604_v12  ;;  %vm501_vm6 = vcmp.ge.s32.totalorder %v474_v63, %v4911_v10  ;;  %v4386_v13 = vsel %vm5123_vm9, 1.0, %v7402_v1  ;;  %vm526_vm7 = vcmp.lt.s32.totalorder %v474_v63, %v4926_v16 }
  0x1b   :  { %7602 = vst [vmem:[#allocation11_spill] sm:$0xff] %v5138_v7  ;;  %7603 = vst [vmem:[#allocation12_spill] sm:$0xff] %v5140_v9  ;;  %730 = vmatprep.subr.mxu0 %v7402_v1  ;;  %4798 = vmatmul.mubr.f32.vlgmr.msra.gmra.mxu0 %v4905_v8  ;;  %vm500_vm1 = vcmp.ge.s32.totalorder %v473_v3, %v4911_v10  ;;  %vm525_vm12 = vcmp.lt.s32.totalorder %v473_v3, %v4926_v16  ;;  %v5159_v14 = vand.u32 4294901760, %v755_v59  ;;  %v7608_v17 = vmov 0 }
  0x1c   :  { %736 = vmatpush1.msra.mxu0 %v5089_v52  ;;  %v762_v15 = vsub.f32 %v5062_v46, %v5107_v56  ;;  %4406 = vmatpush1.msk.msra.mxu1 %vm4980_vm15, %v7395_v4  ;;  %v5167_v8 = vand.u32 4294901760, %v5121_v61  ;;  %vm5169_vm10 = vmand %vm501_vm6, %vm526_vm7  ;;  %v472_v18 = vadd.s32 16, %v4897_v5  ;;  %v769_v20 = vsub.f32 %v5076_v49, %v5119_v60 }
  0x1d   :  { %7606 = vst [vmem:[#allocation13_spill] sm:$0xff] %v5159_v14  ;;  %v7609_v17 = vsel %vm5169_vm10, 4294967295, %v7608_v17  ;;  %737 = vmatprep.subr.mxu0 %v7402_v1  ;;  %635 = vmatprep.subr.mxu1 %v7402_v1  ;;  %v5179_v21 = vand.u32 4294901760, %v5132_v2  ;;  %v4385_v22 = vsel %vm5145_vm0, 1.0, %v7402_v1  ;;  %v5185_v25 = vadd.s32 8, %v4897_v5  ;;  %vm5200_vm14 = vmand %vm500_vm1, %vm525_vm12 }
  0x1e   :  { %7607 = vst [vmem:[#allocation14_spill] sm:$0xff] %v5167_v8  ;;  %743 = vmatpush1.msra.mxu0 %v5138_v7  ;;  %4407 = vmatpush1.msk.msra.mxu1 %vm4996_vm3, %v7395_v4  ;;  %v5192_v27 = vand.u32 4294901760, %v5143_v11  ;;  %v5194_v28 = vsub.f32 %v4386_v13, %v4386_v13  ;;  %v7613_v30 = vmov 0  ;;  %vm522_vm7 = vcmp.lt.s32.totalorder %v4897_v5, %v4926_v16 }
  0x1f   :  { %7610 = vst [vmem:[#allocation15_spill] sm:$0xff] %v5179_v21  ;;  %7611 = vst [vmem:[#allocation16_spill] sm:$0xff] %v5185_v25  ;;  %v7614_v30 = vsel %vm5200_vm14, 4294967295, %v7613_v30  ;;  %744 = vmatprep.subr.mxu0 %v7402_v1  ;;  %638 = vmatprep.subr.mxu1 %v7402_v1  ;;  %v4384_v34 = vsel %vm5169_vm10, 1.0, %v7402_v1  ;;  %vm499_vm3 = vcmp.ge.s32.totalorder %v472_v18, %v4911_v10  ;;  %v5218_v38 = vand.u32 4294901760, %v762_v15 }
  0x20   :  { %7612 = vst [vmem:[#allocation17_spill] sm:$0xff] %v5192_v27  ;;  %vm524_vm1 = vcmp.lt.s32.totalorder %v472_v18, %v4926_v16  ;;  %750 = vmatpush1.msra.mxu0 %v5140_v9  ;;  %v776_v40 = vsub.f32 %v5121_v61, %v5167_v8  ;;  %4408 = vmatpush1.msk.msra.mxu1 %vm5013_vm4, %v7395_v4  ;;  %v7616_v42 = vmov 0  ;;  %v4383_v50 = vsel %vm5200_vm14, 1.0, %v7402_v1 }
  0x21   :  { %7615 = vst [vmem:[#allocation18_spill] sm:$0xff] %v5218_v38  ;;  %v5225_v41 = vsub.f32 %v4385_v22, %v4385_v22  ;;  %vm5227_vm6 = vmand %vm499_vm3, %vm524_vm1  ;;  %751 = vmatprep.subr.mxu0 %v7402_v1  ;;  %v783_v45 = vsub.f32 %v5132_v2, %v5179_v21  ;;  %641 = vmatprep.subr.mxu1 %v7402_v1  ;;  %v7619_v51 = vmov 0  ;;  %v493_v53 = vadd.s32 184, %v4897_v5 }
  0x22   :  { %v7617_v42 = vsel %vm5227_vm6, 4294967295, %v7616_v42  ;;  %vm523_vm12 = vcmp.lt.s32.totalorder %v5185_v25, %v4926_v16  ;;  %vm7618_vm3 = vcmp.ge.s32.totalorder %v4897_v5, %v4911_v10  ;;  %757 = vmatpush1.msra.mxu0 %v5159_v14  ;;  %v5252_v54 = vand.u32 4294901760, %v769_v20  ;;  %4409 = vmatpush1.msk.msra.mxu1 %vm5020_vm5, %v7395_v4 }
  0x23   :  { %vm5246_vm1 = vmand %vm7618_vm3, %vm522_vm7  ;;  %v790_v57 = vsub.f32 %v5143_v11, %v5192_v27  ;;  %v5260_v58 = vand.u32 4294901760, %v5194_v28  ;;  %v5262_v59 = vsub.f32 %v4384_v34, %v4384_v34  ;;  %vm7623_vm7 = vcmp.ge.s32.totalorder %v5185_v25, %v4911_v10  ;;  %758 = vmatprep.subr.mxu0 %v7402_v1  ;;  %644 = vmatprep.subr.mxu1 %v7402_v1 }
  0x24   :  { %v7620_v51 = vsel %vm5246_vm1, 4294967295, %v7619_v51  ;;  %7621 = vst [vmem:[#allocation19_spill] sm:$0xff] %v5252_v54  ;;  %vm5267_vm3 = vmand %vm7623_vm7, %vm523_vm12  ;;  %v7624_v63 = vmov 0  ;;  %v4382_v3 = vsel %vm5227_vm6, 1.0, %v7402_v1  ;;  %vm520_vm5 = vcmp.ge.s32.totalorder %v493_v53, %v4911_v10  ;;  %764 = vmatpush1.msra.mxu0 %v5218_v38  ;;  %4410 = vmatpush1.msk.msra.mxu1 %vm5055_vm11, %v7395_v4 }
  0x25   :  { %7622 = vst [vmem:[#allocation20_spill] sm:$0xff] %v5260_v58  ;;  %v7625_v63 = vsel %vm5267_vm3, 4294967295, %v7624_v63  ;;  %vm545_vm4 = vcmp.lt.s32.totalorder %v493_v53, %v4926_v16  ;;  %v5279_v13 = vand.u32 4294901760, %v776_v40  ;;  %v5285_v15 = vand.u32 4294901760, %v5225_v41  ;;  %765 = vmatprep.subr.mxu0 %v7402_v1  ;;  %647 = vmatprep.subr.mxu1 %v7402_v1 }
  0x26   :  { %v5287_v18 = vsub.f32 %v4383_v50, %v4383_v50  ;;  %v4381_v20 = vsel %vm5267_vm3, 1.0, %v7402_v1  ;;  %v5293_v22 = vand.u32 4294901760, %v783_v45  ;;  %v4380_v34 = vsel %vm5246_vm1, 1.0, %v7402_v1  ;;  %771 = vmatpush1.msra.mxu0 %v5252_v54  ;;  %vm5318_vm12 = vmand %vm520_vm5, %vm545_vm4 }
  0x27   :  { %7626 = vst [vmem:[#allocation21_spill] sm:$0xff] %v5279_v13  ;;  %7627 = vst [vmem:[#allocation22_spill] sm:$0xff] %v5285_v15  ;;  %v492_v40 = vadd.s32 176, %v4897_v5  ;;  %v491_v4 = vadd.s32 168, %v4897_v5  ;;  %v5302_v50 = vand.u32 4294901760, %v790_v57  ;;  %v797_v25 = vsub.f32 %v5194_v28, %v5260_v58 }
  0x28   :  { %7628 = vst [vmem:[#allocation23_spill] sm:$0xff] %v5293_v22  ;;  %v7630_v6 = vmov 1.0   ;;  %v5310_v45 = vand.u32 4294901760, %v5262_v59  ;;  %v5312_v38 = vsub.f32 %v4382_v3, %v4382_v3  ;;  %v7632_v1 = vmov 0 }
  0x29   :  { %7629 = vst [vmem:[#allocation24_spill] sm:$0xff] %v5302_v50  ;;  %4411 = vmatpush1.msk.msra.mxu1 %vm5066_vm13, %v7630_v6  ;;  %v7633_v1 = vsel %vm5318_vm12, 4294967295, %v7632_v1  ;;  %v7634_v57 = vmov 0.0   ;;  %v5324_v54 = vsub.f32 %v4381_v20, %v4381_v20  ;;  %vm519_vm7 = vcmp.ge.s32.totalorder %v492_v40, %v4911_v10 }
  0x2a   :  { %7631 = vst [vmem:[#allocation25_spill] sm:$0xff] %v5310_v45  ;;  %772 = vmatprep.subr.mxu0 %v7634_v57  ;;  %650 = vmatprep.subr.mxu1 %v7634_v57  ;;  %vm544_vm13 = vcmp.lt.s32.totalorder %v492_v40, %v4926_v16  ;;  %v490_v3 = vadd.s32 160, %v4897_v5  ;;  %v804_v53 = vsub.f32 %v5225_v41, %v5285_v15  ;;  %v5336_v14 = vand.u32 4294901760, %v5287_v18 }
  0x2b   :  { %778 = vmatpush1.msra.mxu0 %v5279_v13  ;;  %4412 = vmatpush1.msk.msra.mxu1 %vm5097_vm2, %v7630_v6  ;;  %v5338_v20 = vsub.f32 %v4380_v34, %v4380_v34  ;;  %vm5340_vm4 = vmand %vm519_vm7, %vm544_vm13  ;;  %v7636_v9 = vmov 0  ;;  %vm518_vm5 = vcmp.ge.s32.totalorder %v491_v4, %v4911_v10  ;;  %v4403_v40 = vsel %vm5318_vm12, 1.0, %v7634_v57 }
  0x2c   :  { %7635 = vst [vmem:[#allocation26_spill] sm:$0xff] %v5336_v14  ;;  %v7637_v9 = vsel %vm5340_vm4, 4294967295, %v7636_v9  ;;  %779 = vmatprep.subr.mxu0 %v7634_v57  ;;  %653 = vmatprep.subr.mxu1 %v7634_v57  ;;  %vm543_vm2 = vcmp.lt.s32.totalorder %v491_v4, %v4926_v16  ;;  %vm517_vm11 = vcmp.ge.s32.totalorder %v490_v3, %v4911_v10  ;;  %v5353_v34 = vand.u32 4294901760, %v797_v25 }
  0x2d   :  { %785 = vmatpush1.msra.mxu0 %v5293_v22  ;;  %v811_v13 = vsub.f32 %v5262_v59, %v5310_v45  ;;  %4413 = vmatpush1.msk.msra.mxu1 %vm5123_vm9, %v7630_v6  ;;  %v5361_v7 = vand.u32 4294901760, %v5312_v38  ;;  %vm5363_vm13 = vmand %vm518_vm5, %vm543_vm2  ;;  %vm542_vm7 = vcmp.lt.s32.totalorder %v490_v3, %v4926_v16  ;;  %v5371_v4 = vand.u32 4294901760, %v5324_v54 }
  0x2e   :  { %7638 = vst [vmem:[#allocation27_spill] sm:$0xff] %v5353_v34  ;;  %786 = vmatprep.subr.mxu0 %v7634_v57  ;;  %656 = vmatprep.subr.mxu1 %v7634_v57  ;;  %v4402_v25 = vsel %vm5340_vm4, 1.0, %v7634_v57  ;;  %v489_v22 = vadd.s32 152, %v4897_v5  ;;  %v5378_v45 = vand.u32 4294901760, %v804_v53  ;;  %v818_v15 = vsub.f32 %v5287_v18, %v5336_v14  ;;  %vm5392_vm2 = vmand %vm517_vm11, %vm542_vm7 }
  0x2f   :  { %7639 = vst [vmem:[#allocation28_spill] sm:$0xff] %v5361_v7  ;;  %7642 = vst [vmem:[#allocation29_spill] sm:$0xff] %v5371_v4  ;;  %792 = vmatpush1.msra.mxu0 %v5302_v50  ;;  %4414 = vmatpush1.msk.msra.mxu1 %vm5145_vm0, %v7630_v6  ;;  %v5386_v58 = vand.u32 4294901760, %v5338_v20  ;;  %v5388_v27 = vsub.f32 %v4403_v40, %v4403_v40  ;;  %v7645_v21 = vmov 0  ;;  %v4401_v53 = vsel %vm5363_vm13, 1.0, %v7634_v57 }
  0x30   :  { %7643 = vst [vmem:[#allocation30_spill] sm:$0xff] %v5378_v45  ;;  %v7646_v21 = vsel %vm5392_vm2, 4294967295, %v7645_v21  ;;  %793 = vmatprep.subr.mxu0 %v7634_v57  ;;  %659 = vmatprep.subr.mxu1 %v7634_v57  ;;  %vm516_vm5 = vcmp.ge.s32.totalorder %v489_v22, %v4911_v10  ;;  %vm541_vm0 = vcmp.lt.s32.totalorder %v489_v22, %v4926_v16  ;;  %v5404_v40 = vand.u32 4294901760, %v811_v13 }
  0x31   :  { %7644 = vst [vmem:[#allocation31_spill] sm:$0xff] %v5386_v58  ;;  %799 = vmatpush1.msra.mxu0 %v5353_v34  ;;  %v825_v3 = vsub.f32 %v5312_v38, %v5361_v7  ;;  %4415 = vmatpush1.msk.msra.mxu1 %vm5169_vm10, %v7630_v6  ;;  %v5411_v50 = vsub.f32 %v4402_v25, %v4402_v25  ;;  %vm5413_vm11 = vmand %vm516_vm5, %vm541_vm0  ;;  %v7648_v14 = vmov 0  ;;  %v4400_v13 = vsel %vm5392_vm2, 1.0, %v7634_v57 }
  0x32   :  { %7647 = vst [vmem:[#allocation32_spill] sm:$0xff] %v5404_v40  ;;  %v7649_v14 = vsel %vm5413_vm11, 4294967295, %v7648_v14  ;;  %800 = vmatprep.subr.mxu0 %v7634_v57  ;;  %v832_v22 = vsub.f32 %v5324_v54, %v5371_v4  ;;  %662 = vmatprep.subr.mxu1 %v7634_v57  ;;  %v488_v34 = vadd.s32 144, %v4897_v5  ;;  %v5426_v25 = vand.u32 4294901760, %v818_v15 }
  0x33   :  { %806 = vmatpush1.msra.mxu0 %v5378_v45  ;;  %v839_v7 = vsub.f32 %v5338_v20, %v5386_v58  ;;  %4416 = vmatpush1.msk.msra.mxu1 %vm5200_vm14, %v7630_v6  ;;  %v5434_v4 = vand.u32 4294901760, %v5388_v27  ;;  %v5436_v8 = vsub.f32 %v4401_v53, %v4401_v53  ;;  %v4399_v15 = vsel %vm5413_vm11, 1.0, %v7634_v57 }
  0x34   :  { %7650 = vst [vmem:[#allocation33_spill] sm:$0xff] %v5426_v25  ;;  %807 = vmatprep.subr.mxu0 %v7634_v57  ;;  %665 = vmatprep.subr.mxu1 %v7634_v57  ;;  %vm515_vm0 = vcmp.ge.s32.totalorder %v488_v34, %v4911_v10  ;;  %vm540_vm7 = vcmp.lt.s32.totalorder %v488_v34, %v4926_v16  ;;  %v487_v45 = vadd.s32 136, %v4897_v5  ;;  %v5447_v58 = vand.u32 4294901760, %v825_v3 }
  0x35   :  { %7651 = vst [vmem:[#allocation34_spill] sm:$0xff] %v5434_v4  ;;  %813 = vmatpush1.msra.mxu0 %v5404_v40  ;;  %4417 = vmatpush1.msk.msra.mxu1 %vm5227_vm6, %v7630_v6  ;;  %v5453_v53 = vand.u32 4294901760, %v5411_v50  ;;  %v5455_v60 = vsub.f32 %v4400_v13, %v4400_v13  ;;  %vm5457_vm5 = vmand %vm515_vm0, %vm540_vm7  ;;  %v7654_v56 = vmov 0  ;;  %v486_v34 = vadd.s32 128, %v4897_v5 }
  0x36   :  { %7652 = vst [vmem:[#allocation35_spill] sm:$0xff] %v5447_v58  ;;  %v7655_v56 = vsel %vm5457_vm5, 4294967295, %v7654_v56  ;;  %814 = vmatprep.subr.mxu0 %v7634_v57  ;;  %v5463_v40 = vand.u32 4294901760, %v832_v22  ;;  %668 = vmatprep.subr.mxu1 %v7634_v57  ;;  %v4398_v3 = vsel %vm5457_vm5, 1.0, %v7634_v57  ;;  %vm514_vm6 = vcmp.ge.s32.totalorder %v487_v45, %v4911_v10 }
  0x37   :  { %7653 = vst [vmem:[#allocation36_spill] sm:$0xff] %v5453_v53  ;;  %vm539_vm14 = vcmp.lt.s32.totalorder %v487_v45, %v4926_v16  ;;  %820 = vmatpush1.msra.mxu0 %v5426_v25  ;;  %v862_v13 = vsub.f32 %v5388_v27, %v5434_v4  ;;  %4418 = vmatpush1.msk.msra.mxu1 %vm5267_vm3, %v7630_v6  ;;  %v5478_v22 = vand.u32 4294901760, %v5436_v8  ;;  %v7658_v48 = vmov 0 }
  0x38   :  { %7656 = vst [vmem:[#allocation37_spill] sm:$0xff] %v5463_v40  ;;  %v5480_v5 = vsub.f32 %v4399_v15, %v4399_v15  ;;  %vm5482_vm0 = vmand %vm514_vm6, %vm539_vm14  ;;  %vm513_vm7 = vcmp.ge.s32.totalorder %v486_v34, %v4911_v10  ;;  %821 = vmatprep.subr.mxu0 %v7634_v57  ;;  %671 = vmatprep.subr.mxu1 %v7634_v57  ;;  %v5494_v15 = vand.u32 4294901760, %v839_v7  ;;  %v5502_v10 = vand.u32 4294901760, %v5455_v60 }
  0x39   :  { %7657 = vst [vmem:[#allocation38_spill] sm:$0xff] %v5478_v22  ;;  %v7659_v48 = vsel %vm5482_vm0, 4294967295, %v7658_v48  ;;  %v4397_v45 = vsel %vm5482_vm0, 1.0, %v7634_v57  ;;  %vm538_vm3 = vcmp.lt.s32.totalorder %v486_v34, %v4926_v16  ;;  %827 = vmatpush1.msra.mxu0 %v5447_v58  ;;  %v869_v25 = vsub.f32 %v5411_v50, %v5453_v53  ;;  %4419 = vmatpush1.msk.msra.mxu1 %vm5246_vm1, %v7630_v6 }
  0x3a   :  { %7660 = vst [vmem:[#allocation39_spill] sm:$0xff] %v5494_v15  ;;  %7661 = vst [vmem:[#allocation40_spill] sm:$0xff] %v5502_v10  ;;  %v5504_v4 = vsub.f32 %v4398_v3, %v4398_v3  ;;  %v7662_v43 = vmov 0  ;;  %828 = vmatprep.subr.mxu0 %v7634_v57  ;;  %690 = vmatprep.subr.mxu1 %v7634_v57  ;;  %v5516_v7 = vand.u32 4294901760, %v862_v13  ;;  %v876_v34 = vsub.f32 %v5436_v8, %v5478_v22 }
  0x3b   :  { %vm5506_vm14 = vmand %vm513_vm7, %vm538_vm3  ;;  %834 = vmatpush1.msra.mxu0 %v5463_v40  ;;  %4420 = vmatpush2.msk.msra.mxu1 %vm5318_vm12, %v7630_v6  ;;  %v5524_v3 = vand.u32 4294901760, %v5480_v5  ;;  %v5526_v58 = vsub.f32 %v4397_v45, %v4397_v45  ;;  %v5531_v13 = vand.u32 4294901760, %v869_v25  ;;  %v883_v40 = vsub.f32 %v5455_v60, %v5502_v10 }
  0x3c   :  { %v7663_v43 = vsel %vm5506_vm14, 4294967295, %v7662_v43  ;;  %v4396_v16 = vsel %vm5506_vm14, 1.0, %v7634_v57  ;;  %7664 = vst [vmem:[#allocation41_spill] sm:$0xff] %v5516_v7  ;;  %835 = vmatprep.subr.mxu0 %v7634_v57  ;;  %693 = vmatprep.subr.mxu1 %v7634_v57  ;;  %v5539_v22 = vand.u32 4294901760, %v5504_v4  ;;  %v5546_v25 = vand.u32 4294901760, %v876_v34 }
  0x3d   :  { %7665 = vst [vmem:[#allocation42_spill] sm:$0xff] %v5524_v3  ;;  %841 = vmatpush1.msra.mxu0 %v5494_v15  ;;  %7666 = vst [vmem:[#allocation43_spill] sm:$0xff] %v5531_v13  ;;  %4421 = vmatpush2.msk.msra.mxu1 %vm5340_vm4, %v7630_v6  ;;  %v5541_v45 = vsub.f32 %v4396_v16, %v4396_v16  ;;  %v890_v15 = vsub.f32 %v5480_v5, %v5524_v3  ;;  %v5554_v10 = vand.u32 4294901760, %v5526_v58  ;;  %vm7676_vm6 = vcmask 261120  }
  0x3e   :  { %7667 = vst [vmem:[#allocation44_spill] sm:$0xff] %v5539_v22  ;;  %858 = vmatprep.subr.mxu0 %v7634_v57  ;;  %696 = vmatprep.subr.mxu1 %v7634_v57  ;;  %7668 = vst [vmem:[#allocation45_spill] sm:$0xff] %v5546_v25  ;;  %v5559_v16 = vand.u32 4294901760, %v883_v40  ;;  %v897_v34 = vsub.f32 %v5504_v4, %v5539_v22  ;;  %vm7510_vm3 = vcmask 523264   ;;  %vm467_vm7 = vcmask 785408   ;;  %v7789_v52 = vld [vmem:[#allocation36_spill] sm:$0xff] }
  0x3f   :  { %864 = vmatpush2.msra.mxu0 %v5516_v7  ;;  %4422 = vmatpush2.msk.msra.mxu1 %vm5363_vm13, %v7630_v6  ;;  %7669 = vst [vmem:[#allocation46_spill] sm:$0xff] %v5554_v10  ;;  %v5567_v7 = vand.u32 4294901760, %v5541_v45  ;;  %v5572_v3 = vand.u32 4294901760, %v890_v15  ;;  %v904_v40 = vsub.f32 %v5526_v58, %v5554_v10 }
  0x40   :  { %865 = vmatprep.subr.mxu0 %v7634_v57  ;;  %699 = vmatprep.subr.mxu1 %v7634_v57  ;;  %7670 = vst [vmem:[#allocation47_spill] sm:$0xff] %v5559_v16 }
  0x41   :  { %871 = vmatpush2.msra.mxu0 %v5531_v13  ;;  %4423 = vmatpush2.msk.msra.mxu1 %vm5392_vm2, %v7630_v6  ;;  %7671 = vst [vmem:[#allocation48_spill] sm:$0xff] %v5567_v7  ;;  %7672 = vst [vmem:[#allocation49_spill] sm:$0xff] %v5572_v3  ;;  %v5582_v13 = vand.u32 4294901760, %v897_v34  ;;  %v5592_v15 = vand.u32 4294901760, %v904_v40 }
  0x42   :  { %872 = vmatprep.subr.mxu0 %v7634_v57  ;;  %702 = vmatprep.subr.mxu1 %v7634_v57 }
  0x43   :  { %878 = vmatpush2.msra.mxu0 %v5546_v25  ;;  %4424 = vmatpush2.msk.msra.mxu1 %vm5413_vm11, %v7630_v6  ;;  %7673 = vst [vmem:[#allocation50_spill] sm:$0xff] %v5582_v13  ;;  %v911_v25 = vsub.f32 %v5541_v45, %v5567_v7  ;;  %7674 = vst [vmem:[#allocation51_spill] sm:$0xff] %v5592_v15 }
  0x44   :  { %879 = vmatprep.subr.mxu0 %v7634_v57  ;;  %705 = vmatprep.subr.mxu1 %v7634_v57 }
  0x45   :  { %885 = vmatpush2.msra.mxu0 %v5559_v16  ;;  %4425 = vmatpush2.msk.msra.mxu1 %vm5457_vm5, %v7630_v6  ;;  %v5600_v34 = vand.u32 4294901760, %v911_v25  ;;  %v5614_v25 = vld [vmem:[%s7383_s1] sm:$0xff] }
  0x46   :  { %886 = vmatprep.subr.mxu0 %v7634_v57  ;;  %708 = vmatprep.subr.mxu1 %v7634_v57  ;;  %v619_v40 = vcombine.high %v5614_v25, %v5614_v25 }
  0x47   :  { %892 = vmatpush2.msra.mxu0 %v5572_v3  ;;  %4426 = vmatpush2.msk.msra.mxu1 %vm5482_vm0, %v7630_v6  ;;  %7675 = vst [vmem:[#allocation52_spill] sm:$0xff] %v5600_v34 }
  0x48   :  { %893 = vmatprep.subr.mxu0 %v7634_v57  ;;  %711 = vmatprep.subr.mxu1 %v7634_v57 }
  0x49   :  { %899 = vmatpush2.msra.mxu0 %v5582_v13  ;;  %4427 = vmatpush2.msk.msra.mxu1 %vm5506_vm14, %v7630_v6 }
  0x4a   :  { %900 = vmatprep.subr.mxu0 %v7634_v57  ;;  %922 = vmatprep.subr.mxu1 %v7634_v57 }
  0x4b   :  { %906 = vmatpush2.msra.mxu0 %v5592_v15 }
  0x4c   :  { %907 = vmatprep.subr.mxu0 %v7634_v57 }
  0x4d   :  { %913 = vmatpush2.msra.mxu0 %v5600_v34 }
  0x4e   :  { %1044 = vmatprep.subr.mxu0 %v7634_v57 }
  0x74   :  { %v456_v13 = vpop.permute.xlu0 %455  ;;  %v462_v16 = vpop.permute.xlu1 %461 }
  0x75   :  { %v464_v3 = vsel %vm7676_vm6, %v4886_v0, %v456_v13  ;;  %vm7678_vm6 = vnez %v7578_v23 }
  0x76   :  { %v622_v15 = vmul.f32 %v619_v40, %v464_v3 }
  0x78   :  { %v624_v34 = vsel %vm7510_vm3, %v622_v15, 0  ;;  %v459_v7 = vpop.permute.xlu0 %458 }
  0x79   :  { %v5621_v10 = vand.u32 4294901760, %v624_v34  ;;  %v466_v22 = vsel %vm7510_vm3, %v464_v3, %v459_v7  ;;  %vm7680_vm3 = vnez %v7585_v35 }
  0x7a   :  { %v5624_v53 = vsel %vm467_vm7, %v466_v22, %v462_v16  ;;  %vm7679_vm7 = vnez %v7582_v31  ;;  %v7693_v16 = vld [vmem:[#allocation5_spill] sm:$0xff] }
  0x7b   :  { %7677 = vst [vmem:[#allocation53_spill] sm:$0xff] %v5624_v53  ;;  %v715_v39 = vsub.f32 %v624_v34, %v5621_v10  ;;  %v621_v32 = vmul.f32 %v5624_v53, %v5614_v25  ;;  %915 = vmatprep.mubr.f32.mxu0 %v5621_v10  ;;  %v7695_v34 = vld [vmem:[#allocation6_spill] sm:$0xff] }
  0x7d   :  { %v5630_v0 = vand.u32 4294901760, %v621_v32  ;;  %v716_v13 = vand.u32 4294901760, %v715_v39 }
  0x7f   :  { %v5633_v40 = vsub.f32 %v621_v32, %v5630_v0  ;;  %917 = vmatmul.mubr.f32.vlgmr.msra.gmra.mxu0 %v5630_v0  ;;  %v717_v15 = vsub.f32 %v715_v39, %v716_v13 }
  0x80   :  { %4428 = vmatpush1.msk.msra.mxu0 %vm4944_vm8, %v7630_v6  ;;  %1135 = vmatprep.mubr.f32.mxu0 %v716_v13  ;;  %v7698_v13 = vld [vmem:[#allocation9_spill] sm:$0xff] }
  0x81   :  { %v722_v22 = vand.u32 4294901760, %v5633_v40  ;;  %1047 = vmatprep.subr.mxu0 %v7634_v57  ;;  %v718_v7 = vand.u32 4294901760, %v717_v15  ;;  %v7701_v15 = vld [vmem:[#allocation14_spill] sm:$0xff] }
  0x82   :  { %4429 = vmatpush1.msk.msra.mxu0 %vm7678_vm6, %v7630_v6 }
  0x83   :  { %1050 = vmatprep.subr.mxu0 %v7634_v57  ;;  %719 = vmatprep.mubr.f32.mxu1 %v718_v7  ;;  %v723_v32 = vsub.f32 %v5633_v40, %v722_v22  ;;  %v7703_v7 = vld [vmem:[#allocation15_spill] sm:$0xff] }
  0x84   :  { %4430 = vmatpush1.msk.msra.mxu0 %vm4980_vm15, %v7630_v6  ;;  %vm7681_vm15 = vnez %v7587_v36 }
  0x85   :  { %1053 = vmatprep.subr.mxu0 %v7634_v57  ;;  %v724_v3 = vand.u32 4294901760, %v723_v32 }
  0x86   :  { %4431 = vmatpush1.msk.msra.mxu0 %vm7679_vm7, %v7630_v6  ;;  %vm7683_vm7 = vnez %v7593_v47 }
  0x87   :  { %1056 = vmatprep.subr.mxu0 %v7634_v57  ;;  %725 = vmatmul.mubr.f32.vlgmr.msra.gmra.mxu1 %v724_v3  ;;  %v7705_v3 = vld [vmem:[#allocation17_spill] sm:$0xff] }
  0x88   :  { %925 = vmatpush1.msra.mxu1 %v4971_v24  ;;  %4432 = vmatpush1.msk.msra.mxu0 %vm7680_vm3, %v7630_v6  ;;  %vm7682_vm3 = vnez %v7591_v44 }
  0x89   :  { %926 = vmatprep.subr.mxu1 %v7634_v57  ;;  %1036 = vmatprep.mubr.f32.mxu1 %v715_v39  ;;  %v7691_v39 = vld [vmem:[#allocation4_spill] sm:$0xff] }
  0x8a   :  { %1059 = vmatprep.subr.mxu0 %v7634_v57  ;;  %929 = vmatpush1.msra.mxu1 %v4987_v29 }
  0x8b   :  { %4433 = vmatpush1.msk.msra.mxu0 %vm7681_vm15, %v7630_v6  ;;  %930 = vmatprep.subr.mxu1 %v7634_v57  ;;  %vm7684_vm15 = vnez %v7597_v55  ;;  %v7889_v55 = vld [vmem:[#allocation28_spill] sm:$0xff] }
  0x8c   :  { %1062 = vmatprep.subr.mxu0 %v7634_v57  ;;  %933 = vmatpush1.msra.mxu1 %v5004_v33 }
  0x8d   :  { %4434 = vmatpush1.msk.msra.mxu0 %vm7682_vm3, %v7630_v6  ;;  %934 = vmatprep.subr.mxu1 %v7634_v57 }
  0x8e   :  { %1065 = vmatprep.subr.mxu0 %v7634_v57  ;;  %937 = vmatpush1.msra.mxu1 %v5029_v37 }
  0x8f   :  { %4435 = vmatpush1.msk.msra.mxu0 %vm7683_vm7, %v7630_v6  ;;  %938 = vmatprep.subr.mxu1 %v7634_v57  ;;  %vm7685_vm7 = vnez %v7605_v12 }
  0x90   :  { %1068 = vmatprep.subr.mxu0 %v7634_v57  ;;  %941 = vmatpush1.msra.mxu1 %v5062_v46 }
  0x91   :  { %4436 = vmatpush1.msk.msra.mxu0 %vm7684_vm15, %v7630_v6  ;;  %942 = vmatprep.subr.mxu1 %v7634_v57 }
  0x92   :  { %1071 = vmatprep.subr.mxu0 %v7634_v57  ;;  %945 = vmatpush1.msra.mxu1 %v5076_v49 }
  0x93   :  { %4437 = vmatpush1.msk.msra.mxu0 %vm5123_vm9, %v7630_v6  ;;  %946 = vmatprep.subr.mxu1 %v7634_v57  ;;  %vm7686_vm9 = vnez %v7614_v30 }
  0x94   :  { %1074 = vmatprep.subr.mxu0 %v7634_v57  ;;  %949 = vmatpush1.msra.mxu1 %v5121_v61 }
  0x95   :  { %4438 = vmatpush1.msk.msra.mxu0 %vm7685_vm7, %v7630_v6  ;;  %950 = vmatprep.subr.mxu1 %v7634_v57  ;;  %vm7687_vm7 = vnez %v7617_v42 }
  0x96   :  { %1077 = vmatprep.subr.mxu0 %v7634_v57  ;;  %953 = vmatpush1.msra.mxu1 %v5132_v2 }
  0x97   :  { %4439 = vmatpush1.msk.msra.mxu0 %vm5169_vm10, %v7630_v6  ;;  %954 = vmatprep.subr.mxu1 %v7634_v57  ;;  %vm7688_vm10 = vnez %v7625_v63 }
  0x98   :  { %1080 = vmatprep.subr.mxu0 %v7634_v57  ;;  %957 = vmatpush1.msra.mxu1 %v5143_v11 }
  0x99   :  { %4440 = vmatpush1.msk.msra.mxu0 %vm7686_vm9, %v7630_v6  ;;  %958 = vmatprep.subr.mxu1 %v7634_v57 }
  0x9a   :  { %1083 = vmatprep.subr.mxu0 %v7634_v57  ;;  %961 = vmatpush1.msra.mxu1 %v5194_v28 }
  0x9b   :  { %4441 = vmatpush1.msk.msra.mxu0 %vm7687_vm7, %v7630_v6  ;;  %962 = vmatprep.subr.mxu1 %v7634_v57 }
  0x9c   :  { %1086 = vmatprep.subr.mxu0 %v7634_v57  ;;  %965 = vmatpush1.msra.mxu1 %v5225_v41 }
  0x9d   :  { %4442 = vmatpush1.msk.msra.mxu0 %vm7688_vm10, %v7630_v6  ;;  %966 = vmatprep.subr.mxu1 %v7634_v57 }
  0x9e   :  { %1089 = vmatprep.subr.mxu0 %v7634_v57  ;;  %969 = vmatpush1.msra.mxu1 %v5262_v59 }
  0x9f   :  { %4443 = vmatpush1.msk.msra.mxu0 %vm5246_vm1, %v7630_v6  ;;  %970 = vmatprep.subr.mxu1 %v7634_v57 }
  0xa0   :  { %1108 = vmatprep.subr.mxu0 %v7634_v57  ;;  %973 = vmatpush1.msra.mxu1 %v5287_v18 }
  0xa1   :  { %4444 = vmatpush2.msk.msra.mxu0 %vm5318_vm12, %v7630_v6  ;;  %974 = vmatprep.subr.mxu1 %v7634_v57 }
  0xa2   :  { %1111 = vmatprep.subr.mxu0 %v7634_v57  ;;  %977 = vmatpush1.msra.mxu1 %v5312_v38 }
  0xa3   :  { %4445 = vmatpush2.msk.msra.mxu0 %vm5340_vm4, %v7630_v6  ;;  %978 = vmatprep.subr.mxu1 %v7634_v57 }
  0xa4   :  { %1114 = vmatprep.subr.mxu0 %v7634_v57  ;;  %981 = vmatpush1.msra.mxu1 %v5324_v54 }
  0xa5   :  { %4446 = vmatpush2.msk.msra.mxu0 %vm5363_vm13, %v7630_v6  ;;  %982 = vmatprep.subr.mxu1 %v7634_v57 }
  0xa6   :  { %1117 = vmatprep.subr.mxu0 %v7634_v57  ;;  %985 = vmatpush1.msra.mxu1 %v5338_v20 }
  0xa7   :  { %4447 = vmatpush2.msk.msra.mxu0 %vm5392_vm2, %v7630_v6  ;;  %1002 = vmatprep.subr.mxu1 %v7634_v57 }
  0xa8   :  { %1120 = vmatprep.subr.mxu0 %v7634_v57  ;;  %1005 = vmatpush2.msra.mxu1 %v5388_v27 }
  0xa9   :  { %4448 = vmatpush2.msk.msra.mxu0 %vm5413_vm11, %v7630_v6  ;;  %1006 = vmatprep.subr.mxu1 %v7634_v57 }
  0xaa   :  { %1123 = vmatprep.subr.mxu0 %v7634_v57  ;;  %1009 = vmatpush2.msra.mxu1 %v5411_v50 }
  0xab   :  { %4449 = vmatpush2.msk.msra.mxu0 %vm5457_vm5, %v7630_v6  ;;  %1010 = vmatprep.subr.mxu1 %v7634_v57 }
  0xac   :  { %1126 = vmatprep.subr.mxu0 %v7634_v57  ;;  %1013 = vmatpush2.msra.mxu1 %v5436_v8 }
  0xad   :  { %4450 = vmatpush2.msk.msra.mxu0 %vm5482_vm0, %v7630_v6  ;;  %1014 = vmatprep.subr.mxu1 %v7634_v57 }
  0xae   :  { %1129 = vmatprep.subr.mxu0 %v7634_v57  ;;  %1017 = vmatpush2.msra.mxu1 %v5455_v60 }
  0xaf   :  { %4451 = vmatpush2.msk.msra.mxu0 %vm5506_vm14, %v7630_v6  ;;  %1018 = vmatprep.subr.mxu1 %v7634_v57  ;;  %vm7690_vm14 = vnez %v7582_v31 }
  0xb0   :  { %1139 = vmatmul.mubr.f32.vlgmr.msra.gmra.mxu0 %v722_v22  ;;  %1288 = vmatprep.subr.mxu0 %v7634_v57 }
  0xb1   :  { %1021 = vmatpush2.msra.mxu1 %v5480_v5  ;;  %4452 = vmatpush1.msk.msra.mxu0 %vm4944_vm8, %v7630_v6  ;;  %vm7689_vm8 = vnez %v7580_v26 }
  0xb2   :  { %1377 = vmatprep.mubr.f32.mxu0 %v5621_v10  ;;  %1022 = vmatprep.subr.mxu1 %v7634_v57 }
  0xb3   :  { %1291 = vmatprep.subr.mxu0 %v7634_v57  ;;  %1025 = vmatpush2.msra.mxu1 %v5504_v4 }
  0xb4   :  { %4453 = vmatpush1.msk.msra.mxu0 %vm7678_vm6, %v7630_v6  ;;  %1026 = vmatprep.subr.mxu1 %v7634_v57 }
  0xb5   :  { %1294 = vmatprep.subr.mxu0 %v7634_v57  ;;  %1029 = vmatpush2.msra.mxu1 %v5526_v58 }
  0xb6   :  { %4454 = vmatpush1.msk.msra.mxu0 %vm7689_vm8, %v7630_v6  ;;  %1030 = vmatprep.subr.mxu1 %v7634_v57  ;;  %vm7692_vm8 = vnez %v7585_v35 }
  0xb7   :  { %1297 = vmatprep.subr.mxu0 %v7634_v57  ;;  %1033 = vmatpush2.msra.mxu1 %v5541_v45 }
  0xb8   :  { %4455 = vmatpush1.msk.msra.mxu0 %vm7690_vm14, %v7630_v6  ;;  %1039 = vmatmul.mubr.f32.vlgmr.msra.gmra.mxu1 %v5633_v40  ;;  %vm7694_vm14 = vnez %v7587_v36  ;;  %v7699_v40 = vld [vmem:[#allocation10_spill] sm:$0xff] }
  0xb9   :  { %1144 = vmatprep.subr.mxu1 %v7634_v57  ;;  %1300 = vmatprep.subr.mxu0 %v7634_v57 }
  0xba   :  { %1148 = vmatpush1.msra.mxu1 %v7691_v39  ;;  %1281 = vmatprep.mubr.f32.mxu1 %v5621_v10  ;;  %v7696_v10 = vld [vmem:[#allocation7_spill] sm:$0xff] }
  0xbb   :  { %4456 = vmatpush1.msk.msra.mxu0 %vm7692_vm8, %v7630_v6  ;;  %1149 = vmatprep.subr.mxu1 %v7634_v57  ;;  %vm7697_vm8 = vnez %v7593_v47 }
  0xbc   :  { %1303 = vmatprep.subr.mxu0 %v7634_v57  ;;  %1153 = vmatpush1.msra.mxu1 %v7693_v16 }
  0xbd   :  { %4457 = vmatpush1.msk.msra.mxu0 %vm7694_vm14, %v7630_v6  ;;  %1154 = vmatprep.subr.mxu1 %v7634_v57 }
  0xbe   :  { %1306 = vmatprep.subr.mxu0 %v7634_v57  ;;  %1158 = vmatpush1.msra.mxu1 %v7695_v34 }
  0xbf   :  { %4458 = vmatpush1.msk.msra.mxu0 %vm7682_vm3, %v7630_v6  ;;  %1159 = vmatprep.subr.mxu1 %v7634_v57  ;;  %vm7700_vm3 = vnez %v7601_v62 }
  0xc0   :  { %1309 = vmatprep.subr.mxu0 %v7634_v57  ;;  %1163 = vmatpush1.msra.mxu1 %v7696_v10 }
  0xc1   :  { %4459 = vmatpush1.msk.msra.mxu0 %vm7697_vm8, %v7630_v6  ;;  %1164 = vmatprep.subr.mxu1 %v7634_v57  ;;  %vm7702_vm8 = vnez %v7605_v12 }
  0xc2   :  { %1312 = vmatprep.subr.mxu0 %v7634_v57  ;;  %1168 = vmatpush1.msra.mxu1 %v7698_v13 }
  0xc3   :  { %4460 = vmatpush1.msk.msra.mxu0 %vm7684_vm15, %v7630_v6  ;;  %1169 = vmatprep.subr.mxu1 %v7634_v57 }
  0xc4   :  { %1315 = vmatprep.subr.mxu0 %v7634_v57  ;;  %1173 = vmatpush1.msra.mxu1 %v7699_v40 }
  0xc5   :  { %4461 = vmatpush1.msk.msra.mxu0 %vm7700_vm3, %v7630_v6  ;;  %1174 = vmatprep.subr.mxu1 %v7634_v57  ;;  %vm7704_vm3 = vnez %v7609_v17 }
  0xc6   :  { %1318 = vmatprep.subr.mxu0 %v7634_v57  ;;  %1178 = vmatpush1.msra.mxu1 %v7701_v15 }
  0xc7   :  { %4462 = vmatpush1.msk.msra.mxu0 %vm7702_vm8, %v7630_v6  ;;  %1179 = vmatprep.subr.mxu1 %v7634_v57  ;;  %v162_v22 = vpop.f32.mrf.mxu1 }
  0xc8   :  { %1321 = vmatprep.subr.mxu0 %v7634_v57  ;;  %1183 = vmatpush1.msra.mxu1 %v7703_v7  ;;  %v7706_v7 = vld [vmem:[#allocation20_spill] sm:$0xff] }
  0xc9   :  { %4463 = vmatpush1.msk.msra.mxu0 %vm7704_vm3, %v7630_v6  ;;  %1184 = vmatprep.subr.mxu1 %v7634_v57  ;;  %v4767_v32 = vpop.f32.mrf.mxu1 }
  0xca   :  { %1324 = vmatprep.subr.mxu0 %v7634_v57  ;;  %1188 = vmatpush1.msra.mxu1 %v7705_v3  ;;  %v7707_v3 = vld [vmem:[#allocation22_spill] sm:$0xff] }
  0xcb   :  { %4464 = vmatpush1.msk.msra.mxu0 %vm7686_vm9, %v7630_v6  ;;  %1189 = vmatprep.subr.mxu1 %v7634_v57  ;;  %v234_v53 = vpop.f32.mrf.mxu1 }
  0xcc   :  { %1327 = vmatprep.subr.mxu0 %v7634_v57  ;;  %1193 = vmatpush1.msra.mxu1 %v7706_v7  ;;  %v7708_v7 = vld [vmem:[#allocation25_spill] sm:$0xff] }
  0xcd   :  { %4465 = vmatpush1.msk.msra.mxu0 %vm7687_vm7, %v7630_v6  ;;  %1194 = vmatprep.subr.mxu1 %v7634_v57  ;;  %v4772_v32 = vpop.f32.mrf.mxu1 }
  0xce   :  { %1330 = vmatprep.subr.mxu0 %v7634_v57  ;;  %1198 = vmatpush1.msra.mxu1 %v7707_v3  ;;  %v7709_v3 = vld [vmem:[#allocation26_spill] sm:$0xff] }
  0xcf   :  { %4466 = vmatpush1.msk.msra.mxu0 %vm7688_vm10, %v7630_v6  ;;  %1199 = vmatprep.subr.mxu1 %v7634_v57  ;;  %v91_v15 = vpop.f32.mrf.mxu0 }
  0xd0   :  { %1333 = vmatprep.subr.mxu0 %v7634_v57  ;;  %1203 = vmatpush1.msra.mxu1 %v7708_v7  ;;  %v163_v40 = vadd.f32 %v162_v22, %v91_v15  ;;  %v7710_v15 = vld [vmem:[#allocation28_spill] sm:$0xff] }
  0xd1   :  { %4467 = vmatpush1.msk.msra.mxu0 %vm5246_vm1, %v7630_v6  ;;  %1204 = vmatprep.subr.mxu1 %v7634_v57  ;;  %v4762_v32 = vpop.f32.mrf.mxu0 }
  0xd2   :  { %1352 = vmatprep.subr.mxu0 %v7634_v57  ;;  %1208 = vmatpush1.msra.mxu1 %v7709_v3  ;;  %v235_v13 = vadd.f32 %v234_v53, %v163_v40  ;;  %v7711_v53 = vld [vmem:[#allocation29_spill] sm:$0xff]  ;;  %v7712_v3 = vld [vmem:[#allocation31_spill] sm:$0xff] }
  0xd3   :  { %4468 = vmatpush2.msk.msra.mxu0 %vm5318_vm12, %v7630_v6  ;;  %1209 = vmatprep.subr.mxu1 %v7634_v57  ;;  %v378_v7 = vpop.f32.mrf.mxu0 }
  0xd4   :  { %1355 = vmatprep.subr.mxu0 %v7634_v57  ;;  %1213 = vmatpush1.msra.mxu1 %v7710_v15 }
  0xd5   :  { %4469 = vmatpush2.msk.msra.mxu0 %vm5340_vm4, %v7630_v6  ;;  %1214 = vmatprep.subr.mxu1 %v7634_v57  ;;  %v307_v22 = vpop.f32.mrf.mxu1  ;;  %v4788_v32 = vpop.f32.mrf.mxu0 }
  0xd6   :  { %1358 = vmatprep.subr.mxu0 %v7634_v57  ;;  %1218 = vmatpush1.msra.mxu1 %v7711_v53  ;;  %v308_v40 = vadd.f32 %v307_v22, %v235_v13  ;;  %v7713_v13 = vld [vmem:[#allocation34_spill] sm:$0xff] }
  0xd7   :  { %4470 = vmatpush2.msk.msra.mxu0 %vm5363_vm13, %v7630_v6  ;;  %1219 = vmatprep.subr.mxu1 %v7634_v57  ;;  %v4783_v15 = vpop.f32.mrf.mxu1 }
  0xd8   :  { %1361 = vmatprep.subr.mxu0 %v7634_v57  ;;  %1223 = vmatpush1.msra.mxu1 %v7712_v3  ;;  %v379_v10 = vadd.f32 %v378_v7, %v308_v40  ;;  %v7714_v7 = vld [vmem:[#allocation36_spill] sm:$0xff]  ;;  %v7715_v40 = vld [vmem:[#allocation38_spill] sm:$0xff] }
  0xd9   :  { %4471 = vmatpush2.msk.msra.mxu0 %vm5392_vm2, %v7630_v6  ;;  %1240 = vmatprep.subr.mxu1 %v7634_v57 }
  0xda   :  { %1364 = vmatprep.subr.mxu0 %v7634_v57  ;;  %1244 = vmatpush2.msra.mxu1 %v7713_v13  ;;  %v7723_v13 = vld [vmem:[#allocation12_spill] sm:$0xff] }
  0xdb   :  { %4472 = vmatpush2.msk.msra.mxu0 %vm5413_vm11, %v7630_v6  ;;  %1245 = vmatprep.subr.mxu1 %v7634_v57  ;;  %v449_v15 = vpop.f32.mrf.mxu0 }
  0xdc   :  { %1367 = vmatprep.subr.mxu0 %v7634_v57  ;;  %1249 = vmatpush2.msra.mxu1 %v7714_v7  ;;  %v5908_v22 = vadd.f32 %v449_v15, %v379_v10  ;;  %v7716_v10 = vld [vmem:[#allocation40_spill] sm:$0xff]  ;;  %v7718_v15 = vld [vmem:[#allocation42_spill] sm:$0xff] }
  0xdd   :  { %4473 = vmatpush2.msk.msra.mxu0 %vm5457_vm5, %v7630_v6  ;;  %1250 = vmatprep.subr.mxu1 %v7634_v57  ;;  %v4799_v32 = vpop.f32.mrf.mxu0  ;;  %vm7717_vm5 = vnez %v7663_v43  ;;  %v7722_v7 = vld [vmem:[#allocation46_spill] sm:$0xff] }
  0xde   :  { %1370 = vmatprep.subr.mxu0 %v7634_v57  ;;  %1254 = vmatpush2.msra.mxu1 %v7715_v40  ;;  %v7719_v32 = vld [vmem:[#allocation8_spill] sm:$0xff] }
  0xdf   :  { %4474 = vmatpush2.msk.msra.mxu0 %vm5482_vm0, %v7630_v6  ;;  %1255 = vmatprep.subr.mxu1 %v7634_v57  ;;  %v7720_v40 = vld [vmem:[#allocation44_spill] sm:$0xff]  ;;  %vm7729_vm0 = vnez %v7580_v26 }
  0xe0   :  { %1373 = vmatprep.subr.mxu0 %v7634_v57  ;;  %1259 = vmatpush2.msra.mxu1 %v7716_v10  ;;  %v7721_v10 = vld [vmem:[#allocation11_spill] sm:$0xff] }
  0xe1   :  { %4475 = vmatpush2.msk.msra.mxu0 %vm7717_vm5, %v7630_v6  ;;  %1260 = vmatprep.subr.mxu1 %v7634_v57  ;;  %vm7726_vm5 = vnez %v7576_v19 }
  0xe2   :  { %1379 = vmatmul.mubr.f32.vlgmr.msra.gmra.mxu0 %v5630_v0  ;;  %1493 = vmatprep.subr.mxu0 %v7634_v57 }
  0xe3   :  { %1264 = vmatpush2.msra.mxu1 %v7718_v15  ;;  %1499 = vmatpush1.msra.mxu0 %v7719_v32  ;;  %v7724_v32 = vld [vmem:[#allocation48_spill] sm:$0xff]  ;;  %v7725_v15 = vld [vmem:[#allocation13_spill] sm:$0xff] }
  0xe4   :  { %1265 = vmatprep.subr.mxu1 %v7634_v57  ;;  %1500 = vmatprep.subr.mxu0 %v7634_v57 }
  0xe5   :  { %1269 = vmatpush2.msra.mxu1 %v7720_v40  ;;  %1506 = vmatpush1.msra.mxu0 %v7721_v10 }
  0xe6   :  { %1270 = vmatprep.subr.mxu1 %v7634_v57  ;;  %1507 = vmatprep.subr.mxu0 %v7634_v57 }
  0xe7   :  { %1274 = vmatpush2.msra.mxu1 %v7722_v7  ;;  %1513 = vmatpush1.msra.mxu0 %v7723_v13  ;;  %v7727_v7 = vld [vmem:[#allocation18_spill] sm:$0xff] }
  0xe8   :  { %1275 = vmatprep.subr.mxu1 %v7634_v57  ;;  %1514 = vmatprep.subr.mxu0 %v7634_v57 }
  0xe9   :  { %1279 = vmatpush2.msra.mxu1 %v7724_v32  ;;  %1520 = vmatpush1.msra.mxu0 %v7725_v15  ;;  %v7728_v15 = vld [vmem:[#allocation19_spill] sm:$0xff]  ;;  %v7746_v32 = vld [vmem:[#allocation41_spill] sm:$0xff] }
  0xea   :  { %1283 = vmatmul.mubr.f32.vlgmr.msra.gmra.mxu1 %v5630_v0  ;;  %1389 = vmatprep.subr.mxu1 %v7634_v57  ;;  %v7730_v0 = vld [vmem:[#allocation21_spill] sm:$0xff] }
  0xeb   :  { %1521 = vmatprep.subr.mxu0 %v7634_v57  ;;  %4476 = vmatpush1.msk.msra.mxu1 %vm7726_vm5, %v7630_v6  ;;  %vm7731_vm5 = vnez %v7582_v31 }
  0xec   :  { %1527 = vmatpush1.msra.mxu0 %v7727_v7  ;;  %1392 = vmatprep.subr.mxu1 %v7634_v57  ;;  %v7732_v7 = vld [vmem:[#allocation23_spill] sm:$0xff] }
  0xed   :  { %1528 = vmatprep.subr.mxu0 %v7634_v57  ;;  %4477 = vmatpush1.msk.msra.mxu1 %vm7678_vm6, %v7630_v6  ;;  %vm7733_vm6 = vnez %v7585_v35 }
  0xee   :  { %1534 = vmatpush1.msra.mxu0 %v7728_v15  ;;  %1395 = vmatprep.subr.mxu1 %v7634_v57  ;;  %v7734_v15 = vld [vmem:[#allocation24_spill] sm:$0xff] }
  0xef   :  { %1535 = vmatprep.subr.mxu0 %v7634_v57  ;;  %4478 = vmatpush1.msk.msra.mxu1 %vm7729_vm0, %v7630_v6 }
  0xf0   :  { %1541 = vmatpush1.msra.mxu0 %v7730_v0  ;;  %1398 = vmatprep.subr.mxu1 %v7634_v57  ;;  %v7735_v0 = vld [vmem:[#allocation27_spill] sm:$0xff] }
  0xf1   :  { %1542 = vmatprep.subr.mxu0 %v7634_v57  ;;  %4479 = vmatpush1.msk.msra.mxu1 %vm7731_vm5, %v7630_v6  ;;  %vm7736_vm5 = vnez %v7591_v44 }
  0xf2   :  { %1548 = vmatpush1.msra.mxu0 %v7732_v7  ;;  %1401 = vmatprep.subr.mxu1 %v7634_v57  ;;  %v7737_v7 = vld [vmem:[#allocation30_spill] sm:$0xff] }
  0xf3   :  { %1549 = vmatprep.subr.mxu0 %v7634_v57  ;;  %4480 = vmatpush1.msk.msra.mxu1 %vm7733_vm6, %v7630_v6  ;;  %vm7738_vm6 = vnez %v7593_v47 }
  0xf4   :  { %1555 = vmatpush1.msra.mxu0 %v7734_v15  ;;  %1404 = vmatprep.subr.mxu1 %v7634_v57  ;;  %v7739_v15 = vld [vmem:[#allocation32_spill] sm:$0xff] }
  0xf5   :  { %1556 = vmatprep.subr.mxu0 %v7634_v57  ;;  %4481 = vmatpush1.msk.msra.mxu1 %vm7694_vm14, %v7630_v6 }
  0xf6   :  { %1562 = vmatpush1.msra.mxu0 %v7735_v0  ;;  %1407 = vmatprep.subr.mxu1 %v7634_v57  ;;  %v7740_v0 = vld [vmem:[#allocation33_spill] sm:$0xff] }
  0xf7   :  { %1563 = vmatprep.subr.mxu0 %v7634_v57  ;;  %4482 = vmatpush1.msk.msra.mxu1 %vm7736_vm5, %v7630_v6 }
  0xf8   :  { %1569 = vmatpush1.msra.mxu0 %v7737_v7  ;;  %1410 = vmatprep.subr.mxu1 %v7634_v57  ;;  %v1384_v7 = vmul.f32 %v5614_v25, %v5614_v25 }
  0xf9   :  { %1570 = vmatprep.subr.mxu0 %v7634_v57  ;;  %4483 = vmatpush1.msk.msra.mxu1 %vm7738_vm6, %v7630_v6  ;;  %vm7741_vm6 = vnez %v7601_v62 }
  0xfa   :  { %1576 = vmatpush1.msra.mxu0 %v7739_v15  ;;  %1413 = vmatprep.subr.mxu1 %v7634_v57  ;;  %v7742_v15 = vld [vmem:[#allocation35_spill] sm:$0xff]  ;;  %v1386_v25 = vcombine.high %v1384_v7, %v1384_v7 }
  0xfb   :  { %1577 = vmatprep.subr.mxu0 %v7634_v57  ;;  %4484 = vmatpush1.msk.msra.mxu1 %vm7684_vm15, %v7630_v6 }
  0xfc   :  { %1583 = vmatpush1.msra.mxu0 %v7740_v0  ;;  %1416 = vmatprep.subr.mxu1 %v7634_v57  ;;  %v7743_v0 = vld [vmem:[#allocation37_spill] sm:$0xff] }
  0xfd   :  { %1584 = vmatprep.subr.mxu0 %v7634_v57  ;;  %4485 = vmatpush1.msk.msra.mxu1 %vm7741_vm6, %v7630_v6 }
  0xfe   :  { %1590 = vmatpush1.msra.mxu0 %v7742_v15  ;;  %1419 = vmatprep.subr.mxu1 %v7634_v57  ;;  %v7744_v15 = vld [vmem:[#allocation39_spill] sm:$0xff] }
  0xff   :  { %1591 = vmatprep.subr.mxu0 %v7634_v57  ;;  %4486 = vmatpush1.msk.msra.mxu1 %vm7702_vm8, %v7630_v6  ;;  %vm7745_vm8 = vcmask 523264  }
 0x100   :  { %1597 = vmatpush1.msra.mxu0 %v7743_v0  ;;  %1422 = vmatprep.subr.mxu1 %v7634_v57  ;;  %v1387_v0 = vsel %vm7745_vm8, %v1386_v25, 0  ;;  %v6039_v25 = vand.u32 4294901760, %v1384_v7  ;;  %vm7755_vm8 = vnez %v7576_v19 }
 0x101   :  { %1598 = vmatprep.subr.mxu0 %v7634_v57  ;;  %4487 = vmatpush1.msk.msra.mxu1 %vm7704_vm3, %v7630_v6  ;;  %v6031_v13 = vand.u32 4294901760, %v1387_v0 }
 0x102   :  { %1604 = vmatpush1.msra.mxu0 %v7744_v15  ;;  %1425 = vmatprep.subr.mxu1 %v7634_v57  ;;  %v7747_v15 = vld [vmem:[#allocation43_spill] sm:$0xff]  ;;  %7749 = vst [vmem:[#allocation4_spill] sm:$0xff] %v6039_v25  ;;  %v6057_v40 = vsub.f32 %v1384_v7, %v6039_v25 }
 0x103   :  { %1621 = vmatprep.subr.mxu0 %v7634_v57  ;;  %4488 = vmatpush1.msk.msra.mxu1 %vm7686_vm9, %v7630_v6  ;;  %v6048_v10 = vsub.f32 %v1387_v0, %v6031_v13  ;;  %v7752_v0 = vld [vmem:[#allocation50_spill] sm:$0xff]  ;;  %v7753_v7 = vld [vmem:[#allocation51_spill] sm:$0xff] }
 0x104   :  { %1627 = vmatpush2.msra.mxu0 %v7746_v32  ;;  %1428 = vmatprep.subr.mxu1 %v7634_v57  ;;  %v7748_v32 = vld [vmem:[#allocation45_spill] sm:$0xff] }
 0x105   :  { %1628 = vmatprep.subr.mxu0 %v7634_v57  ;;  %4489 = vmatpush1.msk.msra.mxu1 %vm7687_vm7, %v7630_v6 }
 0x106   :  { %1634 = vmatpush2.msra.mxu0 %v7747_v15  ;;  %1431 = vmatprep.subr.mxu1 %v7634_v57  ;;  %v7750_v15 = vld [vmem:[#allocation47_spill] sm:$0xff] }
 0x107   :  { %1635 = vmatprep.subr.mxu0 %v7634_v57  ;;  %4490 = vmatpush1.msk.msra.mxu1 %vm7688_vm10, %v7630_v6 }
 0x108   :  { %1641 = vmatpush2.msra.mxu0 %v7748_v32  ;;  %1434 = vmatprep.subr.mxu1 %v7634_v57  ;;  %v7751_v32 = vld [vmem:[#allocation49_spill] sm:$0xff] }
 0x109   :  { %1642 = vmatprep.subr.mxu0 %v7634_v57  ;;  %4491 = vmatpush1.msk.msra.mxu1 %vm5246_vm1, %v7630_v6 }
 0x10a   :  { %1648 = vmatpush2.msra.mxu0 %v7750_v15  ;;  %1453 = vmatprep.subr.mxu1 %v7634_v57  ;;  %v7533_v15 = vand.u32 4294901760, %v6048_v10 }
 0x10b   :  { %1649 = vmatprep.subr.mxu0 %v7634_v57  ;;  %4492 = vmatpush2.msk.msra.mxu1 %vm5318_vm12, %v7630_v6 }
 0x10c   :  { %1655 = vmatpush2.msra.mxu0 %v7751_v32  ;;  %1456 = vmatprep.subr.mxu1 %v7634_v57  ;;  %v7534_v32 = vand.u32 4294901760, %v6057_v40 }
 0x10d   :  { %1656 = vmatprep.subr.mxu0 %v7634_v57  ;;  %4493 = vmatpush2.msk.msra.mxu1 %vm5340_vm4, %v7630_v6 }
 0x10e   :  { %1662 = vmatpush2.msra.mxu0 %v7752_v0  ;;  %1459 = vmatprep.subr.mxu1 %v7634_v57  ;;  %v7754_v0 = vld [vmem:[#allocation52_spill] sm:$0xff] }
 0x10f   :  { %1663 = vmatprep.subr.mxu0 %v7634_v57  ;;  %4494 = vmatpush2.msk.msra.mxu1 %vm5363_vm13, %v7630_v6 }
 0x110   :  { %1669 = vmatpush2.msra.mxu0 %v7753_v7  ;;  %1462 = vmatprep.subr.mxu1 %v7634_v57  ;;  %v1480_v7 = vsub.f32 %v6048_v10, %v7533_v15 }
 0x111   :  { %1670 = vmatprep.subr.mxu0 %v7634_v57  ;;  %4495 = vmatpush2.msk.msra.mxu1 %vm5392_vm2, %v7630_v6  ;;  %vm7756_vm2 = vnez %v7655_v56 }
 0x112   :  { %1676 = vmatpush2.msra.mxu0 %v7754_v0  ;;  %1465 = vmatprep.subr.mxu1 %v7634_v57  ;;  %v1486_v0 = vsub.f32 %v6057_v40, %v7534_v32  ;;  %v1481_v15 = vand.u32 4294901760, %v1480_v7  ;;  %v7777_v7 = vld [vmem:[#allocation14_spill] sm:$0xff] }
 0x113   :  { %1678 = vmatprep.mubr.f32.mxu0 %v6031_v13  ;;  %1807 = vmatprep.subr.mxu0 %v7634_v57 }
 0x114   :  { %4496 = vmatpush2.msk.msra.mxu1 %vm5413_vm11, %v7630_v6  ;;  %1680 = vmatmul.mubr.f32.vlgmr.msra.gmra.mxu0 %v6039_v25  ;;  %vm7757_vm11 = vnez %v7578_v23  ;;  %v1487_v32 = vand.u32 4294901760, %v1486_v0  ;;  %v7542_v25 = vmov 0  }
 0x115   :  { %4500 = vmatpush1.msk.msra.mxu0 %vm7755_vm8, %v7630_v6  ;;  %1468 = vmatprep.subr.mxu1 %v7634_v57  ;;  %vm7758_vm8 = vnez %v7659_v48 }
 0x116   :  { %1810 = vmatprep.subr.mxu0 %v7634_v57  ;;  %4497 = vmatpush2.msk.msra.mxu1 %vm7756_vm2, %v7630_v6 }
 0x117   :  { %4501 = vmatpush1.msk.msra.mxu0 %vm7757_vm11, %v7630_v6  ;;  %1471 = vmatprep.subr.mxu1 %v7634_v57  ;;  %vm7759_vm11 = vnez %v7663_v43 }
 0x118   :  { %1813 = vmatprep.subr.mxu0 %v7634_v57  ;;  %4498 = vmatpush2.msk.msra.mxu1 %vm7758_vm8, %v7630_v6  ;;  %vm7760_vm8 = vnez %v7582_v31 }
 0x119   :  { %4502 = vmatpush1.msk.msra.mxu0 %vm7729_vm0, %v7630_v6  ;;  %1474 = vmatprep.subr.mxu1 %v7634_v57  ;;  %vm7761_vm0 = vnez %v7585_v35 }
 0x11a   :  { %1816 = vmatprep.subr.mxu0 %v7634_v57  ;;  %4838 = vset.pattern.permute.xlu1 %v7542_v25  ;;  %v7785_v25 = vld [vmem:[#allocation28_spill] sm:$0xff] }
 0x11b   :  { %4499 = vmatpush2.msk.msra.mxu1 %vm7759_vm11, %v7630_v6  ;;  %1482 = vmatprep.mubr.f32.mxu1 %v1481_v15  ;;  %v7776_v15 = vld [vmem:[#allocation10_spill] sm:$0xff] }
 0x11c   :  { %4503 = vmatpush1.msk.msra.mxu0 %vm7760_vm8, %v7630_v6  ;;  %1488 = vmatmul.mubr.f32.vlgmr.msra.gmra.mxu1 %v1487_v32 }
 0x11d   :  { %1685 = vmatprep.subr.mxu1 %v7634_v57  ;;  %1819 = vmatprep.subr.mxu0 %v7634_v57 }
 0x11e   :  { %2149 = vperm.xlu1 %4838, %v5908_v22   ;;  %1688 = vmatpush1.msra.mxu1 %v4971_v24 }
 0x11f   :  { %4504 = vmatpush1.msk.msra.mxu0 %vm7761_vm0, %v7630_v6  ;;  %1689 = vmatprep.subr.mxu1 %v7634_v57  ;;  %vm7762_vm0 = vnez %v7593_v47 }
 0x120   :  { %1822 = vmatprep.subr.mxu0 %v7634_v57  ;;  %1692 = vmatpush1.msra.mxu1 %v4987_v29 }
 0x121   :  { %4505 = vmatpush1.msk.msra.mxu0 %vm7694_vm14, %v7630_v6  ;;  %1693 = vmatprep.subr.mxu1 %v7634_v57 }
 0x122   :  { %1825 = vmatprep.subr.mxu0 %v7634_v57  ;;  %1696 = vmatpush1.msra.mxu1 %v5004_v33 }
 0x123   :  { %4506 = vmatpush1.msk.msra.mxu0 %vm7736_vm5, %v7630_v6  ;;  %1697 = vmatprep.subr.mxu1 %v7634_v57 }
 0x124   :  { %1828 = vmatprep.subr.mxu0 %v7634_v57  ;;  %1700 = vmatpush1.msra.mxu1 %v5029_v37 }
 0x125   :  { %4507 = vmatpush1.msk.msra.mxu0 %vm7762_vm0, %v7630_v6  ;;  %1701 = vmatprep.subr.mxu1 %v7634_v57  ;;  %vm7763_vm0 = vnez %v7605_v12  ;;  %v7890_v12 = vld [vmem:[#allocation29_spill] sm:$0xff] }
 0x126   :  { %1831 = vmatprep.subr.mxu0 %v7634_v57  ;;  %1704 = vmatpush1.msra.mxu1 %v5062_v46 }
 0x127   :  { %4508 = vmatpush1.msk.msra.mxu0 %vm7684_vm15, %v7630_v6  ;;  %1705 = vmatprep.subr.mxu1 %v7634_v57 }
 0x128   :  { %1834 = vmatprep.subr.mxu0 %v7634_v57  ;;  %1708 = vmatpush1.msra.mxu1 %v5076_v49 }
 0x129   :  { %4509 = vmatpush1.msk.msra.mxu0 %vm7741_vm6, %v7630_v6  ;;  %1709 = vmatprep.subr.mxu1 %v7634_v57 }
 0x12a   :  { %1837 = vmatprep.subr.mxu0 %v7634_v57  ;;  %1712 = vmatpush1.msra.mxu1 %v5121_v61 }
 0x12b   :  { %4510 = vmatpush1.msk.msra.mxu0 %vm7763_vm0, %v7630_v6  ;;  %1713 = vmatprep.subr.mxu1 %v7634_v57 }
 0x12c   :  { %1840 = vmatprep.subr.mxu0 %v7634_v57  ;;  %1716 = vmatpush1.msra.mxu1 %v5132_v2 }
 0x12d   :  { %4511 = vmatpush1.msk.msra.mxu0 %vm7704_vm3, %v7630_v6  ;;  %1717 = vmatprep.subr.mxu1 %v7634_v57 }
 0x12e   :  { %1843 = vmatprep.subr.mxu0 %v7634_v57  ;;  %1720 = vmatpush1.msra.mxu1 %v5143_v11 }
 0x12f   :  { %4512 = vmatpush1.msk.msra.mxu0 %vm7686_vm9, %v7630_v6  ;;  %1721 = vmatprep.subr.mxu1 %v7634_v57 }
 0x130   :  { %1846 = vmatprep.subr.mxu0 %v7634_v57  ;;  %1724 = vmatpush1.msra.mxu1 %v5194_v28 }
 0x131   :  { %4513 = vmatpush1.msk.msra.mxu0 %vm7687_vm7, %v7630_v6  ;;  %1725 = vmatprep.subr.mxu1 %v7634_v57 }
 0x132   :  { %1849 = vmatprep.subr.mxu0 %v7634_v57  ;;  %1728 = vmatpush1.msra.mxu1 %v5225_v41 }
 0x133   :  { %4514 = vmatpush1.msk.msra.mxu0 %vm7688_vm10, %v7630_v6  ;;  %1729 = vmatprep.subr.mxu1 %v7634_v57 }
 0x134   :  { %1852 = vmatprep.subr.mxu0 %v7634_v57  ;;  %1732 = vmatpush1.msra.mxu1 %v5262_v59 }
 0x135   :  { %4515 = vmatpush1.msk.msra.mxu0 %vm5246_vm1, %v7630_v6  ;;  %1733 = vmatprep.subr.mxu1 %v7634_v57 }
 0x136   :  { %1871 = vmatprep.subr.mxu0 %v7634_v57  ;;  %1736 = vmatpush1.msra.mxu1 %v5287_v18 }
 0x137   :  { %4516 = vmatpush2.msk.msra.mxu0 %vm5318_vm12, %v7630_v6  ;;  %1737 = vmatprep.subr.mxu1 %v7634_v57  ;;  %vm7764_vm12 = vnez %v7646_v21  ;;  %v7790_v21 = vld [vmem:[#allocation38_spill] sm:$0xff] }
 0x138   :  { %1874 = vmatprep.subr.mxu0 %v7634_v57  ;;  %1740 = vmatpush1.msra.mxu1 %v5312_v38 }
 0x139   :  { %4517 = vmatpush2.msk.msra.mxu0 %vm5340_vm4, %v7630_v6  ;;  %1741 = vmatprep.subr.mxu1 %v7634_v57  ;;  %vm7765_vm4 = vnez %v7649_v14 }
 0x13a   :  { %1877 = vmatprep.subr.mxu0 %v7634_v57  ;;  %1744 = vmatpush1.msra.mxu1 %v5324_v54 }
 0x13b   :  { %4518 = vmatpush2.msk.msra.mxu0 %vm5363_vm13, %v7630_v6  ;;  %1745 = vmatprep.subr.mxu1 %v7634_v57 }
 0x13c   :  { %1880 = vmatprep.subr.mxu0 %v7634_v57  ;;  %1748 = vmatpush1.msra.mxu1 %v5338_v20 }
 0x13d   :  { %4519 = vmatpush2.msk.msra.mxu0 %vm7764_vm12, %v7630_v6  ;;  %1765 = vmatprep.subr.mxu1 %v7634_v57 }
 0x13e   :  { %1883 = vmatprep.subr.mxu0 %v7634_v57  ;;  %1768 = vmatpush2.msra.mxu1 %v5388_v27  ;;  %v7767_v27 = vand.u32 4294901760, %v6048_v10 }
 0x13f   :  { %4520 = vmatpush2.msk.msra.mxu0 %vm7765_vm4, %v7630_v6  ;;  %1769 = vmatprep.subr.mxu1 %v7634_v57  ;;  %v918_v22 = vpop.f32.mrf.mxu0  ;;  %vm7766_vm4 = vnez %v7659_v48 }
 0x140   :  { %1886 = vmatprep.subr.mxu0 %v7634_v57  ;;  %1772 = vmatpush2.msra.mxu1 %v5411_v50 }
 0x141   :  { %4521 = vmatpush2.msk.msra.mxu0 %vm7756_vm2, %v7630_v6  ;;  %1773 = vmatprep.subr.mxu1 %v7634_v57  ;;  %v920_v32 = vpop.f32.mrf.mxu0 }
 0x142   :  { %1889 = vmatprep.subr.mxu0 %v7634_v57  ;;  %1776 = vmatpush2.msra.mxu1 %v5436_v8  ;;  %v7768_v8 = vand.u32 4294901760, %v6057_v40  ;;  %v7779_v32 = vld [vmem:[#allocation17_spill] sm:$0xff] }
 0x143   :  { %4522 = vmatpush2.msk.msra.mxu0 %vm7766_vm4, %v7630_v6  ;;  %1777 = vmatprep.subr.mxu1 %v7634_v57  ;;  %vm7769_vm4 = vnez %v7576_v19 }
 0x144   :  { %1892 = vmatprep.subr.mxu0 %v7634_v57  ;;  %1780 = vmatpush2.msra.mxu1 %v5455_v60 }
 0x145   :  { %4523 = vmatpush2.msk.msra.mxu0 %vm7759_vm11, %v7630_v6  ;;  %1781 = vmatprep.subr.mxu1 %v7634_v57  ;;  %vm7770_vm11 = vnez %v7578_v23 }
 0x146   :  { %1898 = vmatprep.mubr.f32.mxu0 %v7767_v27  ;;  %2051 = vmatprep.subr.mxu0 %v7634_v57  ;;  %v7780_v27 = vld [vmem:[#allocation20_spill] sm:$0xff] }
 0x147   :  { %1784 = vmatpush2.msra.mxu1 %v5480_v5  ;;  %1902 = vmatmul.mubr.f32.vlgmr.msra.gmra.mxu0 %v7768_v8  ;;  %v726_v50 = vpop.f32.mrf.mxu1  ;;  %v7781_v8 = vld [vmem:[#allocation22_spill] sm:$0xff] }
 0x148   :  { %4524 = vmatpush1.msk.msra.mxu0 %vm7769_vm4, %v7630_v6  ;;  %1785 = vmatprep.subr.mxu1 %v7634_v57  ;;  %v6251_v60 = vadd.f32 %v918_v22, %v726_v50  ;;  %vm7771_vm4 = vnez %v7580_v26  ;;  %v7778_v22 = vld [vmem:[#allocation15_spill] sm:$0xff]  ;;  %v7782_v50 = vld [vmem:[#allocation25_spill] sm:$0xff] }
 0x149   :  { %2054 = vmatprep.subr.mxu0 %v7634_v57  ;;  %1788 = vmatpush2.msra.mxu1 %v5504_v4  ;;  %v728_v0 = vpop.f32.mrf.mxu1 }
 0x14a   :  { %4525 = vmatpush1.msk.msra.mxu0 %vm7770_vm11, %v7630_v6  ;;  %1789 = vmatprep.subr.mxu1 %v7634_v57  ;;  %v7783_v0 = vld [vmem:[#allocation26_spill] sm:$0xff] }
 0x14b   :  { %2057 = vmatprep.subr.mxu0 %v7634_v57  ;;  %1792 = vmatpush2.msra.mxu1 %v5526_v58 }
 0x14c   :  { %4526 = vmatpush1.msk.msra.mxu0 %vm7771_vm4, %v7630_v6  ;;  %1793 = vmatprep.subr.mxu1 %v7634_v57  ;;  %vm7772_vm4 = vnez %v7585_v35 }
 0x14d   :  { %2060 = vmatprep.subr.mxu0 %v7634_v57  ;;  %1796 = vmatpush2.msra.mxu1 %v5541_v45 }
 0x14e   :  { %1799 = vmatprep.mubr.f32.mxu1 %v6048_v10  ;;  %4527 = vmatpush1.msk.msra.mxu0 %vm7760_vm8, %v7630_v6  ;;  %v7775_v10 = vld [vmem:[#allocation9_spill] sm:$0xff] }
 0x14f   :  { %1802 = vmatmul.mubr.f32.vlgmr.msra.gmra.mxu1 %v6057_v40  ;;  %1907 = vmatprep.subr.mxu1 %v7634_v57  ;;  %v7773_v40 = vld [vmem:[#allocation7_spill] sm:$0xff] }
 0x150   :  { %2063 = vmatprep.subr.mxu0 %v7634_v57  ;;  %1911 = vmatpush1.msra.mxu1 %v7691_v39 }
 0x151   :  { %4528 = vmatpush1.msk.msra.mxu0 %vm7772_vm4, %v7630_v6  ;;  %1912 = vmatprep.subr.mxu1 %v7634_v57  ;;  %vm7774_vm4 = vnez %v7593_v47 }
 0x152   :  { %2066 = vmatprep.subr.mxu0 %v7634_v57  ;;  %1916 = vmatpush1.msra.mxu1 %v7693_v16 }
 0x153   :  { %4529 = vmatpush1.msk.msra.mxu0 %vm7694_vm14, %v7630_v6  ;;  %1917 = vmatprep.subr.mxu1 %v7634_v57 }
 0x154   :  { %2069 = vmatprep.subr.mxu0 %v7634_v57  ;;  %1921 = vmatpush1.msra.mxu1 %v7695_v34 }
 0x155   :  { %4530 = vmatpush1.msk.msra.mxu0 %vm7736_vm5, %v7630_v6  ;;  %1922 = vmatprep.subr.mxu1 %v7634_v57 }
 0x156   :  { %2072 = vmatprep.subr.mxu0 %v7634_v57  ;;  %1926 = vmatpush1.msra.mxu1 %v7773_v40 }
 0x157   :  { %4531 = vmatpush1.msk.msra.mxu0 %vm7774_vm4, %v7630_v6  ;;  %1927 = vmatprep.subr.mxu1 %v7634_v57 }
 0x158   :  { %2075 = vmatprep.subr.mxu0 %v7634_v57  ;;  %1931 = vmatpush1.msra.mxu1 %v7775_v10 }
 0x159   :  { %4532 = vmatpush1.msk.msra.mxu0 %vm7684_vm15, %v7630_v6  ;;  %1932 = vmatprep.subr.mxu1 %v7634_v57 }
 0x15a   :  { %2078 = vmatprep.subr.mxu0 %v7634_v57  ;;  %1936 = vmatpush1.msra.mxu1 %v7776_v15 }
 0x15b   :  { %4533 = vmatpush1.msk.msra.mxu0 %vm7741_vm6, %v7630_v6  ;;  %1937 = vmatprep.subr.mxu1 %v7634_v57 }
 0x15c   :  { %2081 = vmatprep.subr.mxu0 %v7634_v57  ;;  %1941 = vmatpush1.msra.mxu1 %v7777_v7 }
 0x15d   :  { %4534 = vmatpush1.msk.msra.mxu0 %vm7763_vm0, %v7630_v6  ;;  %1942 = vmatprep.subr.mxu1 %v7634_v57 }
 0x15e   :  { %2084 = vmatprep.subr.mxu0 %v7634_v57  ;;  %1946 = vmatpush1.msra.mxu1 %v7778_v22 }
 0x15f   :  { %4535 = vmatpush1.msk.msra.mxu0 %vm7704_vm3, %v7630_v6  ;;  %1947 = vmatprep.subr.mxu1 %v7634_v57 }
 0x160   :  { %2087 = vmatprep.subr.mxu0 %v7634_v57  ;;  %1951 = vmatpush1.msra.mxu1 %v7779_v32 }
 0x161   :  { %4536 = vmatpush1.msk.msra.mxu0 %vm7686_vm9, %v7630_v6  ;;  %1952 = vmatprep.subr.mxu1 %v7634_v57 }
 0x162   :  { %2090 = vmatprep.subr.mxu0 %v7634_v57  ;;  %1956 = vmatpush1.msra.mxu1 %v7780_v27 }
 0x163   :  { %4537 = vmatpush1.msk.msra.mxu0 %vm7687_vm7, %v7630_v6  ;;  %1957 = vmatprep.subr.mxu1 %v7634_v57  ;;  %vm7784_vm7 = vnez %v7633_v1  ;;  %v7787_v1 = vld [vmem:[#allocation34_spill] sm:$0xff] }
 0x164   :  { %2093 = vmatprep.subr.mxu0 %v7634_v57  ;;  %1961 = vmatpush1.msra.mxu1 %v7781_v8  ;;  %v7798_v8 = vld [vmem:[#allocation11_spill] sm:$0xff] }
 0x165   :  { %4538 = vmatpush1.msk.msra.mxu0 %vm7688_vm10, %v7630_v6  ;;  %1962 = vmatprep.subr.mxu1 %v7634_v57  ;;  %vm7786_vm10 = vnez %v7637_v9 }
 0x166   :  { %2096 = vmatprep.subr.mxu0 %v7634_v57  ;;  %1966 = vmatpush1.msra.mxu1 %v7782_v50 }
 0x167   :  { %4539 = vmatpush1.msk.msra.mxu0 %vm5246_vm1, %v7630_v6  ;;  %1967 = vmatprep.subr.mxu1 %v7634_v57 }
 0x168   :  { %2115 = vmatprep.subr.mxu0 %v7634_v57  ;;  %1971 = vmatpush1.msra.mxu1 %v7783_v0  ;;  %v7797_v0 = vld [vmem:[#allocation44_spill] sm:$0xff] }
 0x169   :  { %4540 = vmatpush2.msk.msra.mxu0 %vm7784_vm7, %v7630_v6  ;;  %1972 = vmatprep.subr.mxu1 %v7634_v57  ;;  %vm7803_vm7 = vnez %v7576_v19 }
 0x16a   :  { %2118 = vmatprep.subr.mxu0 %v7634_v57  ;;  %1976 = vmatpush1.msra.mxu1 %v7785_v25  ;;  %v7796_v25 = vld [vmem:[#allocation8_spill] sm:$0xff] }
 0x16b   :  { %4541 = vmatpush2.msk.msra.mxu0 %vm7786_vm10, %v7630_v6  ;;  %1977 = vmatprep.subr.mxu1 %v7634_v57  ;;  %vm7788_vm10 = vnez %v7649_v14 }
 0x16c   :  { %2121 = vmatprep.subr.mxu0 %v7634_v57  ;;  %1981 = vmatpush1.msra.mxu1 %v7711_v53 }
 0x16d   :  { %4542 = vmatpush2.msk.msra.mxu0 %vm5363_vm13, %v7630_v6  ;;  %1982 = vmatprep.subr.mxu1 %v7634_v57  ;;  %vm7793_vm13 = vnez %v7663_v43 }
 0x16e   :  { %2124 = vmatprep.subr.mxu0 %v7634_v57  ;;  %1986 = vmatpush1.msra.mxu1 %v7712_v3 }
 0x16f   :  { %4543 = vmatpush2.msk.msra.mxu0 %vm7764_vm12, %v7630_v6  ;;  %2003 = vmatprep.subr.mxu1 %v7634_v57  ;;  %vm7791_vm12 = vnez %v7659_v48 }
 0x170   :  { %2127 = vmatprep.subr.mxu0 %v7634_v57  ;;  %2007 = vmatpush2.msra.mxu1 %v7787_v1  ;;  %v1140_v9 = vpop.f32.mrf.mxu0  ;;  %v7792_v1 = vld [vmem:[#allocation40_spill] sm:$0xff] }
 0x171   :  { %4544 = vmatpush2.msk.msra.mxu0 %vm7788_vm10, %v7630_v6  ;;  %2008 = vmatprep.subr.mxu1 %v7634_v57 }
 0x172   :  { %2130 = vmatprep.subr.mxu0 %v7634_v57  ;;  %2012 = vmatpush2.msra.mxu1 %v7789_v52  ;;  %v1142_v3 = vpop.f32.mrf.mxu0  ;;  %v7794_v52 = vld [vmem:[#allocation42_spill] sm:$0xff] }
 0x173   :  { %4545 = vmatpush2.msk.msra.mxu0 %vm7756_vm2, %v7630_v6  ;;  %2013 = vmatprep.subr.mxu1 %v7634_v57 }
 0x174   :  { %2133 = vmatprep.subr.mxu0 %v7634_v57  ;;  %2017 = vmatpush2.msra.mxu1 %v7790_v21  ;;  %v7795_v21 = vld [vmem:[#allocation4_spill] sm:$0xff] }
 0x175   :  { %4546 = vmatpush2.msk.msra.mxu0 %vm7791_vm12, %v7630_v6  ;;  %2018 = vmatprep.subr.mxu1 %v7634_v57 }
 0x176   :  { %2136 = vmatprep.subr.mxu0 %v7634_v57  ;;  %2022 = vmatpush2.msra.mxu1 %v7792_v1 }
 0x177   :  { %4547 = vmatpush2.msk.msra.mxu0 %vm7793_vm13, %v7630_v6  ;;  %2023 = vmatprep.subr.mxu1 %v7634_v57  ;;  %vm7806_vm13 = vnez %v7580_v26 }
 0x178   :  { %2140 = vmatprep.mubr.f32.mxu0 %v6031_v13  ;;  %2265 = vmatprep.subr.mxu0 %v7634_v57  ;;  %v1040_v3 = vpop.f32.mrf.mxu1 }
 0x179   :  { %2027 = vmatpush2.msra.mxu1 %v7794_v52  ;;  %2142 = vmatmul.mubr.f32.vlgmr.msra.gmra.mxu0 %v7795_v21  ;;  %v1041_v53 = vadd.f32 %v1040_v3, %v6251_v60  ;;  %v7799_v52 = vld [vmem:[#allocation46_spill] sm:$0xff]  ;;  %v7800_v60 = vld [vmem:[#allocation12_spill] sm:$0xff] }
 0x17a   :  { %2271 = vmatpush1.msra.mxu0 %v7796_v25  ;;  %2028 = vmatprep.subr.mxu1 %v7634_v57  ;;  %v1042_v1 = vpop.f32.mrf.mxu1  ;;  %v7801_v3 = vld [vmem:[#allocation48_spill] sm:$0xff] }
 0x17b   :  { %2272 = vmatprep.subr.mxu0 %v7634_v57  ;;  %2032 = vmatpush2.msra.mxu1 %v7797_v0  ;;  %v6402_v50 = vadd.f32 %v1140_v9, %v1041_v53  ;;  %v7802_v53 = vld [vmem:[#allocation13_spill] sm:$0xff]  ;;  %v7804_v9 = vld [vmem:[#allocation18_spill] sm:$0xff]  ;;  %v7808_v1 = vld [vmem:[#allocation23_spill] sm:$0xff] }
 0x17c   :  { %2278 = vmatpush1.msra.mxu0 %v7798_v8  ;;  %2033 = vmatprep.subr.mxu1 %v7634_v57  ;;  %v7823_v8 = vld [vmem:[#allocation50_spill] sm:$0xff] }
 0x17d   :  { %2279 = vmatprep.subr.mxu0 %v7634_v57  ;;  %2037 = vmatpush2.msra.mxu1 %v7799_v52 }
 0x17e   :  { %2285 = vmatpush1.msra.mxu0 %v7800_v60  ;;  %2038 = vmatprep.subr.mxu1 %v7634_v57  ;;  %v7813_v60 = vld [vmem:[#allocation30_spill] sm:$0xff] }
 0x17f   :  { %2286 = vmatprep.subr.mxu0 %v7634_v57  ;;  %2042 = vmatpush2.msra.mxu1 %v7801_v3  ;;  %v7818_v3 = vld [vmem:[#allocation35_spill] sm:$0xff] }
 0x180   :  { %2044 = vmatprep.mubr.f32.mxu1 %v6031_v13  ;;  %2292 = vmatpush1.msra.mxu0 %v7802_v53  ;;  %v7805_v13 = vld [vmem:[#allocation19_spill] sm:$0xff] }
 0x181   :  { %2046 = vmatmul.mubr.f32.vlgmr.msra.gmra.mxu1 %v7795_v21  ;;  %2165 = vmatprep.subr.mxu1 %v7634_v57  ;;  %v7807_v21 = vld [vmem:[#allocation21_spill] sm:$0xff] }
 0x182   :  { %2293 = vmatprep.subr.mxu0 %v7634_v57  ;;  %4548 = vmatpush1.msk.msra.mxu1 %vm7803_vm7, %v7630_v6 }
 0x183   :  { %2299 = vmatpush1.msra.mxu0 %v7804_v9  ;;  %2168 = vmatprep.subr.mxu1 %v7634_v57  ;;  %v7811_v9 = vld [vmem:[#allocation24_spill] sm:$0xff] }
 0x184   :  { %2300 = vmatprep.subr.mxu0 %v7634_v57  ;;  %4549 = vmatpush1.msk.msra.mxu1 %vm7770_vm11, %v7630_v6 }
 0x185   :  { %2306 = vmatpush1.msra.mxu0 %v7805_v13  ;;  %2171 = vmatprep.subr.mxu1 %v7634_v57  ;;  %v6443_v13 = vld [vmem:[%s7384_s2] sm:$0xff] }
 0x186   :  { %2307 = vmatprep.subr.mxu0 %v7634_v57  ;;  %4550 = vmatpush1.msk.msra.mxu1 %vm7806_vm13, %v7630_v6  ;;  %7809 = vst [vmem:[#allocation5_spill] sm:$0xff] %v6443_v13  ;;  %vm7810_vm13 = vnez %v7585_v35 }
 0x187   :  { %2313 = vmatpush1.msra.mxu0 %v7807_v21  ;;  %2174 = vmatprep.subr.mxu1 %v7634_v57  ;;  %v2158_v21 = vcombine.high %v6443_v13, %v6443_v13 }
 0x188   :  { %2314 = vmatprep.subr.mxu0 %v7634_v57  ;;  %4551 = vmatpush1.msk.msra.mxu1 %vm7760_vm8, %v7630_v6 }
 0x189   :  { %2320 = vmatpush1.msra.mxu0 %v7808_v1  ;;  %2177 = vmatprep.subr.mxu1 %v7634_v57  ;;  %v7812_v1 = vld [vmem:[#allocation27_spill] sm:$0xff] }
 0x18a   :  { %2321 = vmatprep.subr.mxu0 %v7634_v57  ;;  %4552 = vmatpush1.msk.msra.mxu1 %vm7810_vm13, %v7630_v6 }
 0x18b   :  { %2327 = vmatpush1.msra.mxu0 %v7811_v9  ;;  %2180 = vmatprep.subr.mxu1 %v7634_v57  ;;  %v4854_v9 = vld [vmem:[%s7382_s0] sm:$0xf]  ;;  %s4862_s0 = smov 6  }
 0x18c   :  { %2328 = vmatprep.subr.mxu0 %v7634_v57  ;;  %4553 = vmatpush1.msk.msra.mxu1 %vm7694_vm14, %v7630_v6  ;;  %v2161_v53 = vmul.f32 %v4854_v9, %v2158_v21  ;;  %v7815_v9 = vld [vmem:[#allocation33_spill] sm:$0xff] }
 0x18d   :  { %2334 = vmatpush1.msra.mxu0 %v7812_v1  ;;  %2183 = vmatprep.subr.mxu1 %v7634_v57  ;;  %v7814_v1 = vld [vmem:[#allocation32_spill] sm:$0xff] }
 0x18e   :  { %2335 = vmatprep.subr.mxu0 %v7634_v57  ;;  %4554 = vmatpush1.msk.msra.mxu1 %vm7736_vm5, %v7630_v6  ;;  %vm7816_vm5 = vcmask 261120  }
 0x18f   :  { %2341 = vmatpush1.msra.mxu0 %v7813_v60  ;;  %2186 = vmatprep.subr.mxu1 %v7634_v57  ;;  %v2163_v21 = vsel %vm7816_vm5, %v2161_v53, 0  ;;  %vm7822_vm5 = vnez %v7617_v42  ;;  %v7895_v42 = vld [vmem:[#allocation46_spill] sm:$0xff] }
 0x190   :  { %2342 = vmatprep.subr.mxu0 %v7634_v57  ;;  %4555 = vmatpush1.msk.msra.mxu1 %vm7774_vm4, %v7630_v6  ;;  %v6493_v53 = vand.u32 4294901760, %v2163_v21 }
 0x191   :  { %2348 = vmatpush1.msra.mxu0 %v7814_v1  ;;  %2189 = vmatprep.subr.mxu1 %v7634_v57  ;;  %v7817_v1 = vld [vmem:[#allocation53_spill] sm:$0xff] }
 0x192   :  { %2349 = vmatprep.subr.mxu0 %v7634_v57  ;;  %4556 = vmatpush1.msk.msra.mxu1 %vm7684_vm15, %v7630_v6  ;;  %v2160_v60 = vmul.f32 %v6443_v13, %v7817_v1  ;;  %v7821_v13 = vld [vmem:[#allocation49_spill] sm:$0xff] }
 0x193   :  { %2355 = vmatpush1.msra.mxu0 %v7815_v9  ;;  %2192 = vmatprep.subr.mxu1 %v7634_v57  ;;  %v7819_v9 = vld [vmem:[#allocation37_spill] sm:$0xff] }
 0x194   :  { %2356 = vmatprep.subr.mxu0 %v7634_v57  ;;  %4557 = vmatpush1.msk.msra.mxu1 %vm7741_vm6, %v7630_v6  ;;  %v6501_v1 = vand.u32 4294901760, %v2160_v60 }
 0x195   :  { %2362 = vmatpush1.msra.mxu0 %v7818_v3  ;;  %2195 = vmatprep.subr.mxu1 %v7634_v57  ;;  %v7820_v3 = vld [vmem:[#allocation39_spill] sm:$0xff] }
 0x196   :  { %2363 = vmatprep.subr.mxu0 %v7634_v57  ;;  %4558 = vmatpush1.msk.msra.mxu1 %vm7763_vm0, %v7630_v6 }
 0x197   :  { %2369 = vmatpush1.msra.mxu0 %v7819_v9  ;;  %2198 = vmatprep.subr.mxu1 %v7634_v57  ;;  %v6510_v9 = vsub.f32 %v2163_v21, %v6493_v53 }
 0x198   :  { %2370 = vmatprep.subr.mxu0 %v7634_v57  ;;  %4559 = vmatpush1.msk.msra.mxu1 %vm7704_vm3, %v7630_v6 }
 0x199   :  { %2376 = vmatpush1.msra.mxu0 %v7820_v3  ;;  %2201 = vmatprep.subr.mxu1 %v7634_v57  ;;  %v6519_v3 = vsub.f32 %v2160_v60, %v6501_v1  ;;  %v7549_v21 = vand.u32 4294901760, %v6510_v9 }
 0x19a   :  { %2401 = vmatprep.subr.mxu0 %v7634_v57  ;;  %4560 = vmatpush1.msk.msra.mxu1 %vm7686_vm9, %v7630_v6  ;;  %vm7824_vm9 = vnez %v7625_v63 }
 0x19b   :  { %2407 = vmatpush2.msra.mxu0 %v7821_v13  ;;  %2204 = vmatprep.subr.mxu1 %v7634_v57  ;;  %v7825_v13 = vld [vmem:[#allocation51_spill] sm:$0xff] }
 0x19c   :  { %2408 = vmatprep.subr.mxu0 %v7634_v57  ;;  %4561 = vmatpush1.msk.msra.mxu1 %vm7822_vm5, %v7630_v6 }
 0x19d   :  { %2414 = vmatpush2.msra.mxu0 %v7823_v8  ;;  %2207 = vmatprep.subr.mxu1 %v7634_v57  ;;  %v7826_v8 = vld [vmem:[#allocation52_spill] sm:$0xff] }
 0x19e   :  { %2415 = vmatprep.subr.mxu0 %v7634_v57  ;;  %4562 = vmatpush1.msk.msra.mxu1 %vm7824_vm9, %v7630_v6 }
 0x19f   :  { %2421 = vmatpush2.msra.mxu0 %v7825_v13  ;;  %2210 = vmatprep.subr.mxu1 %v7634_v57  ;;  %v2252_v13 = vsub.f32 %v6510_v9, %v7549_v21  ;;  %v7827_v21 = vand.u32 4294901760, %v6519_v3 }
 0x1a0   :  { %2422 = vmatprep.subr.mxu0 %v7634_v57  ;;  %4563 = vmatpush1.msk.msra.mxu1 %vm5246_vm1, %v7630_v6 }
 0x1a1   :  { %2428 = vmatpush2.msra.mxu0 %v7826_v8  ;;  %2430 = vmatprep.mubr.f32.mxu0 %v6493_v53  ;;  %v2258_v8 = vsub.f32 %v6519_v3, %v7827_v21  ;;  %v2253_v25 = vand.u32 4294901760, %v2252_v13 }
 0x1a2   :  { %2237 = vmatprep.subr.mxu1 %v7634_v57  ;;  %2432 = vmatmul.mubr.f32.vlgmr.msra.gmra.mxu0 %v6501_v1  ;;  %v1380_v52 = vpop.f32.mrf.mxu0 }
 0x1a3   :  { %2551 = vmatprep.subr.mxu0 %v7634_v57  ;;  %4564 = vmatpush2.msk.msra.mxu1 %vm7788_vm10, %v7630_v6  ;;  %v2259_v21 = vand.u32 4294901760, %v2258_v8  ;;  %v7832_v8 = vand.u32 4294901760, %v6510_v9 }
 0x1a4   :  { %4568 = vmatpush1.msk.msra.mxu0 %vm7803_vm7, %v7630_v6  ;;  %2240 = vmatprep.subr.mxu1 %v7634_v57  ;;  %v1382_v60 = vpop.f32.mrf.mxu0  ;;  %vm7828_vm7 = vnez %v7580_v26 }
 0x1a5   :  { %2554 = vmatprep.subr.mxu0 %v7634_v57  ;;  %4565 = vmatpush2.msk.msra.mxu1 %vm7756_vm2, %v7630_v6 }
 0x1a6   :  { %4569 = vmatpush1.msk.msra.mxu0 %vm7770_vm11, %v7630_v6  ;;  %2243 = vmatprep.subr.mxu1 %v7634_v57  ;;  %vm7829_vm11 = vnez %v7663_v43 }
 0x1a7   :  { %2557 = vmatprep.subr.mxu0 %v7634_v57  ;;  %4566 = vmatpush2.msk.msra.mxu1 %vm7791_vm12, %v7630_v6 }
 0x1a8   :  { %4570 = vmatpush1.msk.msra.mxu0 %vm7828_vm7, %v7630_v6  ;;  %2246 = vmatprep.subr.mxu1 %v7634_v57 }
 0x1a9   :  { %2560 = vmatprep.subr.mxu0 %v7634_v57  ;;  %4567 = vmatpush2.msk.msra.mxu1 %vm7829_vm11, %v7630_v6 }
 0x1aa   :  { %2254 = vmatprep.mubr.f32.mxu1 %v2253_v25  ;;  %4571 = vmatpush1.msk.msra.mxu0 %vm7760_vm8, %v7630_v6  ;;  %v1284_v13 = vpop.f32.mrf.mxu1 }
 0x1ab   :  { %2260 = vmatmul.mubr.f32.vlgmr.msra.gmra.mxu1 %v2259_v21  ;;  %2437 = vmatprep.subr.mxu1 %v7634_v57  ;;  %v1285_v60 = vadd.f32 %v1284_v13, %v6402_v50  ;;  %v7833_v50 = vand.u32 4294901760, %v6519_v3  ;;  %v7838_v13 = vld [vmem:[#allocation22_spill] sm:$0xff] }
 0x1ac   :  { %2563 = vmatprep.subr.mxu0 %v7634_v57  ;;  %2440 = vmatpush1.msra.mxu1 %v4971_v24  ;;  %v1286_v0 = vpop.f32.mrf.mxu1 }
 0x1ad   :  { %4572 = vmatpush1.msk.msra.mxu0 %vm7810_vm13, %v7630_v6  ;;  %2441 = vmatprep.subr.mxu1 %v7634_v57  ;;  %v6584_v25 = vadd.f32 %v1380_v52, %v1285_v60  ;;  %vm7830_vm13 = vnez %v7591_v44  ;;  %v7839_v60 = vld [vmem:[#allocation25_spill] sm:$0xff] }
 0x1ae   :  { %2566 = vmatprep.subr.mxu0 %v7634_v57  ;;  %2444 = vmatpush1.msra.mxu1 %v4987_v29  ;;  %v7886_v44 = vld [vmem:[#allocation25_spill] sm:$0xff] }
 0x1af   :  { %4573 = vmatpush1.msk.msra.mxu0 %vm7694_vm14, %v7630_v6  ;;  %2445 = vmatprep.subr.mxu1 %v7634_v57 }
 0x1b0   :  { %2569 = vmatprep.subr.mxu0 %v7634_v57  ;;  %2448 = vmatpush1.msra.mxu1 %v5004_v33 }
 0x1b1   :  { %4574 = vmatpush1.msk.msra.mxu0 %vm7830_vm13, %v7630_v6  ;;  %2449 = vmatprep.subr.mxu1 %v7634_v57 }
 0x1b2   :  { %2572 = vmatprep.subr.mxu0 %v7634_v57  ;;  %2452 = vmatpush1.msra.mxu1 %v5029_v37 }
 0x1b3   :  { %4575 = vmatpush1.msk.msra.mxu0 %vm7774_vm4, %v7630_v6  ;;  %2453 = vmatprep.subr.mxu1 %v7634_v57 }
 0x1b4   :  { %2575 = vmatprep.subr.mxu0 %v7634_v57  ;;  %2456 = vmatpush1.msra.mxu1 %v5062_v46 }
 0x1b5   :  { %4576 = vmatpush1.msk.msra.mxu0 %vm7684_vm15, %v7630_v6  ;;  %2457 = vmatprep.subr.mxu1 %v7634_v57 }
 0x1b6   :  { %2578 = vmatprep.subr.mxu0 %v7634_v57  ;;  %2460 = vmatpush1.msra.mxu1 %v5076_v49 }
 0x1b7   :  { %4577 = vmatpush1.msk.msra.mxu0 %vm7741_vm6, %v7630_v6  ;;  %2461 = vmatprep.subr.mxu1 %v7634_v57  ;;  %vm7831_vm6 = vnez %v7614_v30 }
 0x1b8   :  { %2581 = vmatprep.subr.mxu0 %v7634_v57  ;;  %2464 = vmatpush1.msra.mxu1 %v5121_v61 }
 0x1b9   :  { %4578 = vmatpush1.msk.msra.mxu0 %vm7763_vm0, %v7630_v6  ;;  %2465 = vmatprep.subr.mxu1 %v7634_v57 }
 0x1ba   :  { %2584 = vmatprep.subr.mxu0 %v7634_v57  ;;  %2468 = vmatpush1.msra.mxu1 %v5132_v2 }
 0x1bb   :  { %4579 = vmatpush1.msk.msra.mxu0 %vm7704_vm3, %v7630_v6  ;;  %2469 = vmatprep.subr.mxu1 %v7634_v57 }
 0x1bc   :  { %2587 = vmatprep.subr.mxu0 %v7634_v57  ;;  %2472 = vmatpush1.msra.mxu1 %v5143_v11 }
 0x1bd   :  { %4580 = vmatpush1.msk.msra.mxu0 %vm7831_vm6, %v7630_v6  ;;  %2473 = vmatprep.subr.mxu1 %v7634_v57 }
 0x1be   :  { %2590 = vmatprep.subr.mxu0 %v7634_v57  ;;  %2476 = vmatpush1.msra.mxu1 %v5194_v28 }
 0x1bf   :  { %4581 = vmatpush1.msk.msra.mxu0 %vm7822_vm5, %v7630_v6  ;;  %2477 = vmatprep.subr.mxu1 %v7634_v57 }
 0x1c0   :  { %2593 = vmatprep.subr.mxu0 %v7634_v57  ;;  %2480 = vmatpush1.msra.mxu1 %v5225_v41 }
 0x1c1   :  { %4582 = vmatpush1.msk.msra.mxu0 %vm7824_vm9, %v7630_v6  ;;  %2481 = vmatprep.subr.mxu1 %v7634_v57 }
 0x1c2   :  { %2596 = vmatprep.subr.mxu0 %v7634_v57  ;;  %2484 = vmatpush1.msra.mxu1 %v5262_v59 }
 0x1c3   :  { %4583 = vmatpush1.msk.msra.mxu0 %vm5246_vm1, %v7630_v6  ;;  %2485 = vmatprep.subr.mxu1 %v7634_v57 }
 0x1c4   :  { %2623 = vmatprep.subr.mxu0 %v7634_v57  ;;  %2488 = vmatpush1.msra.mxu1 %v5287_v18 }
 0x1c5   :  { %4584 = vmatpush2.msk.msra.mxu0 %vm7788_vm10, %v7630_v6  ;;  %2489 = vmatprep.subr.mxu1 %v7634_v57 }
 0x1c6   :  { %2626 = vmatprep.subr.mxu0 %v7634_v57  ;;  %2492 = vmatpush1.msra.mxu1 %v5312_v38 }
 0x1c7   :  { %4585 = vmatpush2.msk.msra.mxu0 %vm7756_vm2, %v7630_v6  ;;  %2493 = vmatprep.subr.mxu1 %v7634_v57 }
 0x1c8   :  { %2629 = vmatprep.subr.mxu0 %v7634_v57  ;;  %2496 = vmatpush1.msra.mxu1 %v5324_v54 }
 0x1c9   :  { %4586 = vmatpush2.msk.msra.mxu0 %vm7791_vm12, %v7630_v6  ;;  %2497 = vmatprep.subr.mxu1 %v7634_v57  ;;  %vm7834_vm12 = vnez %v7576_v19 }
 0x1ca   :  { %2632 = vmatprep.subr.mxu0 %v7634_v57  ;;  %2500 = vmatpush1.msra.mxu1 %v5338_v20 }
 0x1cb   :  { %4587 = vmatpush2.msk.msra.mxu0 %vm7829_vm11, %v7630_v6  ;;  %2638 = vmatprep.mubr.f32.mxu0 %v7832_v8  ;;  %vm7835_vm11 = vnez %v7578_v23  ;;  %v7840_v8 = vld [vmem:[#allocation26_spill] sm:$0xff]  ;;  %v7883_v23 = vld [vmem:[#allocation17_spill] sm:$0xff] }
 0x1cc   :  { %2525 = vmatprep.subr.mxu1 %v7634_v57  ;;  %2642 = vmatmul.mubr.f32.vlgmr.msra.gmra.mxu0 %v7833_v50  ;;  %v7841_v50 = vld [vmem:[#allocation28_spill] sm:$0xff] }
 0x1cd   :  { %2779 = vmatprep.subr.mxu0 %v7634_v57  ;;  %2528 = vmatpush2.msra.mxu1 %v5480_v5 }
 0x1ce   :  { %4588 = vmatpush1.msk.msra.mxu0 %vm7834_vm12, %v7630_v6  ;;  %2529 = vmatprep.subr.mxu1 %v7634_v57 }
 0x1cf   :  { %2782 = vmatprep.subr.mxu0 %v7634_v57  ;;  %2532 = vmatpush2.msra.mxu1 %v5504_v4 }
 0x1d0   :  { %4589 = vmatpush1.msk.msra.mxu0 %vm7835_vm11, %v7630_v6  ;;  %2533 = vmatprep.subr.mxu1 %v7634_v57 }
 0x1d1   :  { %2785 = vmatprep.subr.mxu0 %v7634_v57  ;;  %2536 = vmatpush2.msra.mxu1 %v5526_v58 }
 0x1d2   :  { %4590 = vmatpush1.msk.msra.mxu0 %vm7828_vm7, %v7630_v6  ;;  %2537 = vmatprep.subr.mxu1 %v7634_v57  ;;  %vm7836_vm7 = vnez %v7585_v35  ;;  %v7885_v35 = vld [vmem:[#allocation22_spill] sm:$0xff] }
 0x1d3   :  { %2788 = vmatprep.subr.mxu0 %v7634_v57  ;;  %2540 = vmatpush2.msra.mxu1 %v5541_v45 }
 0x1d4   :  { %2543 = vmatprep.mubr.f32.mxu1 %v6510_v9  ;;  %4591 = vmatpush1.msk.msra.mxu0 %vm7760_vm8, %v7630_v6  ;;  %v1681_v0 = vpop.f32.mrf.mxu0 }
 0x1d5   :  { %2546 = vmatmul.mubr.f32.vlgmr.msra.gmra.mxu1 %v6519_v3  ;;  %2647 = vmatprep.subr.mxu1 %v7634_v57 }
 0x1d6   :  { %2791 = vmatprep.subr.mxu0 %v7634_v57  ;;  %2651 = vmatpush1.msra.mxu1 %v7691_v39  ;;  %v1683_v52 = vpop.f32.mrf.mxu0 }
 0x1d7   :  { %4592 = vmatpush1.msk.msra.mxu0 %vm7836_vm7, %v7630_v6  ;;  %2652 = vmatprep.subr.mxu1 %v7634_v57  ;;  %v7844_v52 = vld [vmem:[#allocation31_spill] sm:$0xff] }
 0x1d8   :  { %2794 = vmatprep.subr.mxu0 %v7634_v57  ;;  %2656 = vmatpush1.msra.mxu1 %v7693_v16 }
 0x1d9   :  { %4593 = vmatpush1.msk.msra.mxu0 %vm7694_vm14, %v7630_v6  ;;  %2657 = vmatprep.subr.mxu1 %v7634_v57 }
 0x1da   :  { %2797 = vmatprep.subr.mxu0 %v7634_v57  ;;  %2661 = vmatpush1.msra.mxu1 %v7695_v34 }
 0x1db   :  { %4594 = vmatpush1.msk.msra.mxu0 %vm7830_vm13, %v7630_v6  ;;  %2662 = vmatprep.subr.mxu1 %v7634_v57 }
 0x1dc   :  { %2800 = vmatprep.subr.mxu0 %v7634_v57  ;;  %2666 = vmatpush1.msra.mxu1 %v7773_v40  ;;  %v1489_v3 = vpop.f32.mrf.mxu1 }
 0x1dd   :  { %4595 = vmatpush1.msk.msra.mxu0 %vm7774_vm4, %v7630_v6  ;;  %2667 = vmatprep.subr.mxu1 %v7634_v57  ;;  %v6730_v9 = vadd.f32 %v1681_v0, %v1489_v3  ;;  %vm7837_vm4 = vnez %v7601_v62  ;;  %v7842_v0 = vld [vmem:[#allocation29_spill] sm:$0xff]  ;;  %v7846_v3 = vld [vmem:[#allocation42_spill] sm:$0xff] }
 0x1de   :  { %2803 = vmatprep.subr.mxu0 %v7634_v57  ;;  %2671 = vmatpush1.msra.mxu1 %v7775_v10  ;;  %v1491_v21 = vpop.f32.mrf.mxu1 }
 0x1df   :  { %4596 = vmatpush1.msk.msra.mxu0 %vm7684_vm15, %v7630_v6  ;;  %2672 = vmatprep.subr.mxu1 %v7634_v57  ;;  %v7847_v21 = vld [vmem:[#allocation44_spill] sm:$0xff] }
 0x1e0   :  { %2806 = vmatprep.subr.mxu0 %v7634_v57  ;;  %2676 = vmatpush1.msra.mxu1 %v7776_v15 }
 0x1e1   :  { %4597 = vmatpush1.msk.msra.mxu0 %vm7837_vm4, %v7630_v6  ;;  %2677 = vmatprep.subr.mxu1 %v7634_v57 }
 0x1e2   :  { %2809 = vmatprep.subr.mxu0 %v7634_v57  ;;  %2681 = vmatpush1.msra.mxu1 %v7777_v7 }
 0x1e3   :  { %4598 = vmatpush1.msk.msra.mxu0 %vm7763_vm0, %v7630_v6  ;;  %2682 = vmatprep.subr.mxu1 %v7634_v57 }
 0x1e4   :  { %2812 = vmatprep.subr.mxu0 %v7634_v57  ;;  %2686 = vmatpush1.msra.mxu1 %v7778_v22 }
 0x1e5   :  { %4599 = vmatpush1.msk.msra.mxu0 %vm7704_vm3, %v7630_v6  ;;  %2687 = vmatprep.subr.mxu1 %v7634_v57 }
 0x1e6   :  { %2815 = vmatprep.subr.mxu0 %v7634_v57  ;;  %2691 = vmatpush1.msra.mxu1 %v7779_v32  ;;  %v7866_v32 = vld [vmem:[#allocation33_spill] sm:$0xff] }
 0x1e7   :  { %4600 = vmatpush1.msk.msra.mxu0 %vm7831_vm6, %v7630_v6  ;;  %2692 = vmatprep.subr.mxu1 %v7634_v57 }
 0x1e8   :  { %2818 = vmatprep.subr.mxu0 %v7634_v57  ;;  %2696 = vmatpush1.msra.mxu1 %v7780_v27 }
 0x1e9   :  { %4601 = vmatpush1.msk.msra.mxu0 %vm7822_vm5, %v7630_v6  ;;  %2697 = vmatprep.subr.mxu1 %v7634_v57 }
 0x1ea   :  { %2821 = vmatprep.subr.mxu0 %v7634_v57  ;;  %2701 = vmatpush1.msra.mxu1 %v7838_v13 }
 0x1eb   :  { %4602 = vmatpush1.msk.msra.mxu0 %vm7824_vm9, %v7630_v6  ;;  %2702 = vmatprep.subr.mxu1 %v7634_v57 }
 0x1ec   :  { %2824 = vmatprep.subr.mxu0 %v7634_v57  ;;  %2706 = vmatpush1.msra.mxu1 %v7839_v60 }
 0x1ed   :  { %4603 = vmatpush1.msk.msra.mxu0 %vm5246_vm1, %v7630_v6  ;;  %2707 = vmatprep.subr.mxu1 %v7634_v57  ;;  %vm7843_vm1 = vnez %v7659_v48 }
 0x1ee   :  { %2851 = vmatprep.subr.mxu0 %v7634_v57  ;;  %2711 = vmatpush1.msra.mxu1 %v7840_v8 }
 0x1ef   :  { %4604 = vmatpush2.msk.msra.mxu0 %vm7788_vm10, %v7630_v6  ;;  %2712 = vmatprep.subr.mxu1 %v7634_v57  ;;  %vm7845_vm10 = vnez %v7663_v43 }
 0x1f0   :  { %2854 = vmatprep.subr.mxu0 %v7634_v57  ;;  %2716 = vmatpush1.msra.mxu1 %v7841_v50  ;;  %v7850_v50 = vld [vmem:[#allocation11_spill] sm:$0xff] }
 0x1f1   :  { %4605 = vmatpush2.msk.msra.mxu0 %vm7756_vm2, %v7630_v6  ;;  %2717 = vmatprep.subr.mxu1 %v7634_v57 }
 0x1f2   :  { %2857 = vmatprep.subr.mxu0 %v7634_v57  ;;  %2721 = vmatpush1.msra.mxu1 %v7842_v0  ;;  %v7849_v0 = vld [vmem:[#allocation46_spill] sm:$0xff] }
 0x1f3   :  { %4606 = vmatpush2.msk.msra.mxu0 %vm7843_vm1, %v7630_v6  ;;  %2722 = vmatprep.subr.mxu1 %v7634_v57 }
 0x1f4   :  { %2860 = vmatprep.subr.mxu0 %v7634_v57  ;;  %2726 = vmatpush1.msra.mxu1 %v7844_v52  ;;  %v7848_v52 = vld [vmem:[#allocation8_spill] sm:$0xff] }
 0x1f5   :  { %4607 = vmatpush2.msk.msra.mxu0 %vm7845_vm10, %v7630_v6  ;;  %2864 = vmatprep.mubr.f32.mxu0 %v6493_v53 }
 0x1f6   :  { %2751 = vmatprep.subr.mxu1 %v7634_v57  ;;  %2866 = vmatmul.mubr.f32.vlgmr.msra.gmra.mxu0 %v6501_v1 }
 0x1f7   :  { %2755 = vmatpush2.msra.mxu1 %v7846_v3  ;;  %2772 = vmatprep.mubr.f32.mxu1 %v6493_v53  ;;  %v7851_v53 = vld [vmem:[#allocation48_spill] sm:$0xff] }
 0x1f8   :  { %2756 = vmatprep.subr.mxu1 %v7634_v57  ;;  %2976 = vmatprep.subr.mxu0 %v7634_v57  ;;  %v7852_v3 = vld [vmem:[#allocation12_spill] sm:$0xff] }
 0x1f9   :  { %2760 = vmatpush2.msra.mxu1 %v7847_v21  ;;  %2982 = vmatpush1.msra.mxu0 %v7848_v52  ;;  %v7854_v52 = vld [vmem:[#allocation5_spill] sm:$0xff]  ;;  %v7861_v21 = vld [vmem:[#allocation24_spill] sm:$0xff] }
 0x1fa   :  { %2761 = vmatprep.subr.mxu1 %v7634_v57  ;;  %2983 = vmatprep.subr.mxu0 %v7634_v57 }
 0x1fb   :  { %2765 = vmatpush2.msra.mxu1 %v7849_v0  ;;  %2989 = vmatpush1.msra.mxu0 %v7850_v50  ;;  %v7853_v50 = vld [vmem:[#allocation13_spill] sm:$0xff]  ;;  %v2871_v0 = vmul.f32 %v7854_v52, %v7854_v52 }
 0x1fc   :  { %2766 = vmatprep.subr.mxu1 %v7634_v57  ;;  %2990 = vmatprep.subr.mxu0 %v7634_v57  ;;  %v7858_v52 = vld [vmem:[#allocation21_spill] sm:$0xff] }
 0x1fd   :  { %2770 = vmatpush2.msra.mxu1 %v7851_v53  ;;  %2996 = vmatpush1.msra.mxu0 %v7852_v3  ;;  %v7857_v3 = vld [vmem:[#allocation19_spill] sm:$0xff]  ;;  %v6889_v13 = vand.u32 4294901760, %v2871_v0 }
 0x1fe   :  { %2774 = vmatmul.mubr.f32.vlgmr.msra.gmra.mxu1 %v6501_v1  ;;  %2876 = vmatprep.subr.mxu1 %v7634_v57  ;;  %v7855_v1 = vld [vmem:[#allocation18_spill] sm:$0xff] }
 0x1ff   :  { %4608 = vmatpush1.msk.msra.mxu1 %vm7834_vm12, %v7630_v6  ;;  %2997 = vmatprep.subr.mxu0 %v7634_v57  ;;  %vm7856_vm12 = vnez %v7580_v26 }
 0x200   :  { %2879 = vmatprep.subr.mxu1 %v7634_v57  ;;  %3003 = vmatpush1.msra.mxu0 %v7853_v50  ;;  %v2873_v50 = vcombine.high %v2871_v0, %v2871_v0 }
 0x201   :  { %4609 = vmatpush1.msk.msra.mxu1 %vm7835_vm11, %v7630_v6  ;;  %3004 = vmatprep.subr.mxu0 %v7634_v57 }
 0x202   :  { %2882 = vmatprep.subr.mxu1 %v7634_v57  ;;  %3010 = vmatpush1.msra.mxu0 %v7855_v1 }
 0x203   :  { %4610 = vmatpush1.msk.msra.mxu1 %vm7856_vm12, %v7630_v6  ;;  %3011 = vmatprep.subr.mxu0 %v7634_v57 }
 0x204   :  { %2885 = vmatprep.subr.mxu1 %v7634_v57  ;;  %3017 = vmatpush1.msra.mxu0 %v7857_v3  ;;  %v7859_v3 = vld [vmem:[#allocation23_spill] sm:$0xff] }
 0x205   :  { %4611 = vmatpush1.msk.msra.mxu1 %vm7760_vm8, %v7630_v6  ;;  %3018 = vmatprep.subr.mxu0 %v7634_v57  ;;  %vm7860_vm8 = vcmask 261120  }
 0x206   :  { %2888 = vmatprep.subr.mxu1 %v7634_v57  ;;  %3024 = vmatpush1.msra.mxu0 %v7858_v52  ;;  %v2874_v52 = vsel %vm7860_vm8, %v2873_v50, 0  ;;  %v7865_v50 = vld [vmem:[#allocation32_spill] sm:$0xff]  ;;  %vm7872_vm8 = vnez %v7620_v51 }
 0x207   :  { %4612 = vmatpush1.msk.msra.mxu1 %vm7836_vm7, %v7630_v6  ;;  %3025 = vmatprep.subr.mxu0 %v7634_v57  ;;  %v1903_v1 = vpop.f32.mrf.mxu0  ;;  %v6867_v8 = vand.u32 4294901760, %v2874_v52 }
 0x208   :  { %2891 = vmatprep.subr.mxu1 %v7634_v57  ;;  %3031 = vmatpush1.msra.mxu0 %v7859_v3  ;;  %v7862_v3 = vld [vmem:[#allocation27_spill] sm:$0xff] }
 0x209   :  { %4613 = vmatpush1.msk.msra.mxu1 %vm7694_vm14, %v7630_v6  ;;  %3032 = vmatprep.subr.mxu0 %v7634_v57  ;;  %v1905_v53 = vpop.f32.mrf.mxu0  ;;  %vm7863_vm14 = vnez %v7593_v47  ;;  %v6883_v60 = vsub.f32 %v2874_v52, %v6867_v8  ;;  %v7887_v47 = vld [vmem:[#allocation26_spill] sm:$0xff] }
 0x20a   :  { %2894 = vmatprep.subr.mxu1 %v7634_v57  ;;  %3038 = vmatpush1.msra.mxu0 %v7861_v21  ;;  %v7864_v21 = vld [vmem:[#allocation30_spill] sm:$0xff] }
 0x20b   :  { %4614 = vmatpush1.msk.msra.mxu1 %vm7830_vm13, %v7630_v6  ;;  %3039 = vmatprep.subr.mxu0 %v7634_v57  ;;  %v2962_v52 = vand.u32 4294901760, %v6883_v60 }
 0x20c   :  { %2897 = vmatprep.subr.mxu1 %v7634_v57  ;;  %3045 = vmatpush1.msra.mxu0 %v7862_v3 }
 0x20d   :  { %4615 = vmatpush1.msk.msra.mxu1 %vm7863_vm14, %v7630_v6  ;;  %3046 = vmatprep.subr.mxu0 %v7634_v57 }
 0x20e   :  { %2900 = vmatprep.subr.mxu1 %v7634_v57  ;;  %3052 = vmatpush1.msra.mxu0 %v7864_v21 }
 0x20f   :  { %4616 = vmatpush1.msk.msra.mxu1 %vm7684_vm15, %v7630_v6  ;;  %3053 = vmatprep.subr.mxu0 %v7634_v57  ;;  %v1803_v53 = vpop.f32.mrf.mxu1 }
 0x210   :  { %2903 = vmatprep.subr.mxu1 %v7634_v57  ;;  %3059 = vmatpush1.msra.mxu0 %v7865_v50  ;;  %v1804_v3 = vadd.f32 %v1803_v53, %v6730_v9  ;;  %v7867_v9 = vld [vmem:[#allocation35_spill] sm:$0xff]  ;;  %v2963_v50 = vsub.f32 %v6883_v60, %v2962_v52 }
 0x211   :  { %4617 = vmatpush1.msk.msra.mxu1 %vm7837_vm4, %v7630_v6  ;;  %3060 = vmatprep.subr.mxu0 %v7634_v57  ;;  %v1805_v21 = vpop.f32.mrf.mxu1  ;;  %v7869_v53 = vld [vmem:[#allocation39_spill] sm:$0xff] }
 0x212   :  { %2906 = vmatprep.subr.mxu1 %v7634_v57  ;;  %v6892_v27 = vadd.f32 %v1903_v1, %v1804_v3  ;;  %3066 = vmatpush1.msra.mxu0 %v7866_v32  ;;  %v6907_v32 = vsub.f32 %v2871_v0, %v6889_v13  ;;  %v7868_v1 = vld [vmem:[#allocation37_spill] sm:$0xff]  ;;  %v7871_v21 = vld [vmem:[#allocation50_spill] sm:$0xff] }
 0x213   :  { %4618 = vmatpush1.msk.msra.mxu1 %vm7763_vm0, %v7630_v6  ;;  %3067 = vmatprep.subr.mxu0 %v7634_v57  ;;  %v7870_v0 = vld [vmem:[#allocation49_spill] sm:$0xff] }
 0x214   :  { %2909 = vmatprep.subr.mxu1 %v7634_v57  ;;  %3073 = vmatpush1.msra.mxu0 %v7867_v9  ;;  %v2968_v3 = vand.u32 4294901760, %v6907_v32  ;;  %v2964_v9 = vand.u32 4294901760, %v2963_v50  ;;  %v7875_v50 = vld [vmem:[#allocation52_spill] sm:$0xff] }
 0x215   :  { %4619 = vmatpush1.msk.msra.mxu1 %vm7704_vm3, %v7630_v6  ;;  %3074 = vmatprep.subr.mxu0 %v7634_v57 }
 0x216   :  { %2912 = vmatprep.subr.mxu1 %v7634_v57  ;;  %3080 = vmatpush1.msra.mxu0 %v7868_v1  ;;  %v7873_v1 = vld [vmem:[#allocation51_spill] sm:$0xff] }
 0x217   :  { %4620 = vmatpush1.msk.msra.mxu1 %vm7831_vm6, %v7630_v6  ;;  %3081 = vmatprep.subr.mxu0 %v7634_v57 }
 0x218   :  { %2915 = vmatprep.subr.mxu1 %v7634_v57  ;;  %3087 = vmatpush1.msra.mxu0 %v7869_v53  ;;  %v2969_v53 = vsub.f32 %v6907_v32, %v2968_v3 }
 0x219   :  { %4621 = vmatpush1.msk.msra.mxu1 %vm7822_vm5, %v7630_v6  ;;  %3112 = vmatprep.subr.mxu0 %v7634_v57 }
 0x21a   :  { %2918 = vmatprep.subr.mxu1 %v7634_v57  ;;  %3118 = vmatpush2.msra.mxu0 %v7870_v0  ;;  %v2970_v0 = vand.u32 4294901760, %v2969_v53  ;;  %v7900_v53 = vld [vmem:[#allocation3_spill] sm:$0xff] }
 0x21b   :  { %4622 = vmatpush1.msk.msra.mxu1 %vm7824_vm9, %v7630_v6  ;;  %3119 = vmatprep.subr.mxu0 %v7634_v57  ;;  %vm7874_vm9 = vnez %v7649_v14  ;;  %v7897_v14 = vld [vmem:[#allocation48_spill] sm:$0xff] }
 0x21c   :  { %2921 = vmatprep.subr.mxu1 %v7634_v57  ;;  %3125 = vmatpush2.msra.mxu0 %v7871_v21 }
 0x21d   :  { %4623 = vmatpush1.msk.msra.mxu1 %vm7872_vm8, %v7630_v6  ;;  %3126 = vmatprep.subr.mxu0 %v7634_v57 }
 0x21e   :  { %2948 = vmatprep.subr.mxu1 %v7634_v57  ;;  %3132 = vmatpush2.msra.mxu0 %v7873_v1 }
 0x21f   :  { %4624 = vmatpush2.msk.msra.mxu1 %vm7874_vm9, %v7630_v6  ;;  %3133 = vmatprep.subr.mxu0 %v7634_v57 }
 0x220   :  { %2951 = vmatprep.subr.mxu1 %v7634_v57  ;;  %2965 = vmatprep.mubr.f32.mxu1 %v2964_v9 }
 0x221   :  { %4625 = vmatpush2.msk.msra.mxu1 %vm7756_vm2, %v7630_v6  ;;  %3139 = vmatpush2.msra.mxu0 %v7875_v50  ;;  %vm7876_vm2 = vnez %v7576_v19  ;;  %v7901_v50 = vld [vmem:[#allocation2_spill] sm:$0xff] }
 0x222   :  { %2954 = vmatprep.subr.mxu1 %v7634_v57  ;;  %3141 = vmatprep.mubr.f32.mxu0 %v6867_v8 }
 0x223   :  { %4626 = vmatpush2.msk.msra.mxu1 %vm7843_vm1, %v7630_v6  ;;  %3262 = vmatprep.subr.mxu0 %v7634_v57 }
 0x224   :  { %2957 = vmatprep.subr.mxu1 %v7634_v57  ;;  %3143 = vmatmul.mubr.f32.vlgmr.msra.gmra.mxu0 %v6889_v13 }
 0x225   :  { %4627 = vmatpush2.msk.msra.mxu1 %vm7845_vm10, %v7630_v6  ;;  %4628 = vmatpush1.msk.msra.mxu0 %vm7876_vm2, %v7630_v6  ;;  %vm7877_vm2 = vnez %v7582_v31 }
 0x226   :  { %2971 = vmatmul.mubr.f32.vlgmr.msra.gmra.mxu1 %v2970_v0  ;;  %3148 = vmatprep.subr.mxu1 %v7634_v57 }
 0x227   :  { %3151 = vmatpush1.msra.mxu1 %v4971_v24  ;;  %3265 = vmatprep.subr.mxu0 %v7634_v57 }
 0x228   :  { %3152 = vmatprep.subr.mxu1 %v7634_v57  ;;  %4629 = vmatpush1.msk.msra.mxu0 %vm7835_vm11, %v7630_v6 }
 0x229   :  { %3155 = vmatpush1.msra.mxu1 %v4987_v29  ;;  %3268 = vmatprep.subr.mxu0 %v7634_v57 }
 0x22a   :  { %3156 = vmatprep.subr.mxu1 %v7634_v57  ;;  %4630 = vmatpush1.msk.msra.mxu0 %vm7856_vm12, %v7630_v6  ;;  %vm7878_vm12 = vnez %v7587_v36 }
 0x22b   :  { %3159 = vmatpush1.msra.mxu1 %v5004_v33  ;;  %3271 = vmatprep.subr.mxu0 %v7634_v57 }
 0x22c   :  { %3160 = vmatprep.subr.mxu1 %v7634_v57  ;;  %4631 = vmatpush1.msk.msra.mxu0 %vm7877_vm2, %v7630_v6 }
 0x22d   :  { %3163 = vmatpush1.msra.mxu1 %v5029_v37  ;;  %3274 = vmatprep.subr.mxu0 %v7634_v57 }
 0x22e   :  { %3164 = vmatprep.subr.mxu1 %v7634_v57  ;;  %4632 = vmatpush1.msk.msra.mxu0 %vm7836_vm7, %v7630_v6 }
 0x22f   :  { %3167 = vmatpush1.msra.mxu1 %v5062_v46  ;;  %3277 = vmatprep.subr.mxu0 %v7634_v57 }
 0x230   :  { %3168 = vmatprep.subr.mxu1 %v7634_v57  ;;  %4633 = vmatpush1.msk.msra.mxu0 %vm7878_vm12, %v7630_v6 }
 0x231   :  { %3171 = vmatpush1.msra.mxu1 %v5076_v49  ;;  %3280 = vmatprep.subr.mxu0 %v7634_v57 }
 0x232   :  { %3172 = vmatprep.subr.mxu1 %v7634_v57  ;;  %4634 = vmatpush1.msk.msra.mxu0 %vm7830_vm13, %v7630_v6 }
 0x233   :  { %3175 = vmatpush1.msra.mxu1 %v5121_v61  ;;  %3283 = vmatprep.subr.mxu0 %v7634_v57  ;;  %v7057_v61 = vpop.permute.xlu1 %2149 }
 0x234   :  { %3176 = vmatprep.subr.mxu1 %v7634_v57  ;;  %4635 = vmatpush1.msk.msra.mxu0 %vm7863_vm14, %v7630_v6 }
 0x235   :  { %3179 = vmatpush1.msra.mxu1 %v5132_v2  ;;  %3286 = vmatprep.subr.mxu0 %v7634_v57 }
 0x236   :  { %3180 = vmatprep.subr.mxu1 %v7634_v57  ;;  %4636 = vmatpush1.msk.msra.mxu0 %vm7684_vm15, %v7630_v6 }
 0x237   :  { %3183 = vmatpush1.msra.mxu1 %v5143_v11  ;;  %3289 = vmatprep.subr.mxu0 %v7634_v57 }
 0x238   :  { %3184 = vmatprep.subr.mxu1 %v7634_v57  ;;  %4637 = vmatpush1.msk.msra.mxu0 %vm7837_vm4, %v7630_v6 }
 0x239   :  { %3187 = vmatpush1.msra.mxu1 %v5194_v28  ;;  %3292 = vmatprep.subr.mxu0 %v7634_v57  ;;  %v2143_v24 = vpop.f32.mrf.mxu0 }
 0x23a   :  { %3188 = vmatprep.subr.mxu1 %v7634_v57  ;;  %4638 = vmatpush1.msk.msra.mxu0 %vm7763_vm0, %v7630_v6 }
 0x23b   :  { %3191 = vmatpush1.msra.mxu1 %v5225_v41  ;;  %3295 = vmatprep.subr.mxu0 %v7634_v57  ;;  %v2145_v29 = vpop.f32.mrf.mxu0  ;;  %v7894_v41 = vld [vmem:[#allocation44_spill] sm:$0xff] }
 0x23c   :  { %3192 = vmatprep.subr.mxu1 %v7634_v57  ;;  %4639 = vmatpush1.msk.msra.mxu0 %vm7704_vm3, %v7630_v6 }
 0x23d   :  { %3195 = vmatpush1.msra.mxu1 %v5262_v59  ;;  %3298 = vmatprep.subr.mxu0 %v7634_v57 }
 0x23e   :  { %3196 = vmatprep.subr.mxu1 %v7634_v57  ;;  %4640 = vmatpush1.msk.msra.mxu0 %vm7831_vm6, %v7630_v6  ;;  %vm7879_vm6 = vnez %v7625_v63 }
 0x23f   :  { %3199 = vmatpush1.msra.mxu1 %v5287_v18  ;;  %3301 = vmatprep.subr.mxu0 %v7634_v57 }
 0x240   :  { %3200 = vmatprep.subr.mxu1 %v7634_v57  ;;  %4641 = vmatpush1.msk.msra.mxu0 %vm7822_vm5, %v7630_v6 }
 0x241   :  { %3203 = vmatpush1.msra.mxu1 %v5312_v38  ;;  %3304 = vmatprep.subr.mxu0 %v7634_v57  ;;  %v2047_v33 = vpop.f32.mrf.mxu1  ;;  %v7893_v38 = vld [vmem:[#allocation42_spill] sm:$0xff] }
 0x242   :  { %3204 = vmatprep.subr.mxu1 %v7634_v57  ;;  %4642 = vmatpush1.msk.msra.mxu0 %vm7879_vm6, %v7630_v6  ;;  %v2048_v37 = vadd.f32 %v2047_v33, %v6892_v27 }
 0x243   :  { %3207 = vmatpush1.msra.mxu1 %v5324_v54  ;;  %3307 = vmatprep.subr.mxu0 %v7634_v57  ;;  %v2049_v46 = vpop.f32.mrf.mxu1 }
 0x244   :  { %3208 = vmatprep.subr.mxu1 %v7634_v57  ;;  %4643 = vmatpush1.msk.msra.mxu0 %vm7872_vm8, %v7630_v6  ;;  %v2144_v49 = vadd.f32 %v2143_v24, %v2048_v37  ;;  %vm7880_vm8 = vnez %v7655_v56 }
 0x245   :  { %3211 = vmatpush1.msra.mxu1 %v5338_v20  ;;  %3334 = vmatprep.subr.mxu0 %v7634_v57 }
 0x246   :  { %3236 = vmatprep.subr.mxu1 %v7634_v57  ;;  %v2152_v2 = vmul.f32 %v7057_v61, %v2144_v49  ;;  %4644 = vmatpush2.msk.msra.mxu0 %vm7874_vm9, %v7630_v6 }
 0x247   :  { %3239 = vmatpush2.msra.mxu1 %v5480_v5  ;;  %3337 = vmatprep.subr.mxu0 %v7634_v57 }
 0x248   :  { %v2153_v11 = vmax.f32 %v2152_v2, 1e-16  ;;  %3240 = vmatprep.subr.mxu1 %v7634_v57  ;;  %4645 = vmatpush2.msk.msra.mxu0 %vm7880_vm8, %v7630_v6 }
 0x249   :  { %3243 = vmatpush2.msra.mxu1 %v5504_v4  ;;  %3340 = vmatprep.subr.mxu0 %v7634_v57 }
 0x24a   :  { %4842 = vrsqrt.f32 %v2153_v11  ;;  %3244 = vmatprep.subr.mxu1 %v7634_v57  ;;  %4646 = vmatpush2.msk.msra.mxu0 %vm7843_vm1, %v7630_v6  ;;  %vm7881_vm1 = vnez %v7576_v19 }
 0x24b   :  { %3247 = vmatpush2.msra.mxu1 %v5526_v58  ;;  %3343 = vmatprep.subr.mxu0 %v7634_v57 }
 0x24c   :  { %3248 = vmatprep.subr.mxu1 %v7634_v57  ;;  %3254 = vmatprep.mubr.f32.mxu1 %v6883_v60 }
 0x24d   :  { %3251 = vmatpush2.msra.mxu1 %v5541_v45  ;;  %4647 = vmatpush2.msk.msra.mxu0 %vm7845_vm10, %v7630_v6  ;;  %vm7882_vm10 = vnez %v7580_v26  ;;  %v7884_v26 = vld [vmem:[#allocation20_spill] sm:$0xff] }
 0x24e   :  { %3257 = vmatmul.mubr.f32.vlgmr.msra.gmra.mxu1 %v6907_v32  ;;  %3349 = vmatprep.mubr.f32.mxu0 %v2962_v52 }
 0x24f   :  { %3358 = vmatprep.subr.mxu1 %v7634_v57  ;;  %3490 = vmatprep.subr.mxu0 %v7634_v57 }
 0x250   :  { %3353 = vmatmul.mubr.f32.vlgmr.msra.gmra.mxu0 %v2968_v3  ;;  %3362 = vmatpush1.msra.mxu1 %v7691_v39 }
 0x251   :  { %4648 = vmatpush1.msk.msra.mxu0 %vm7881_vm1, %v7630_v6  ;;  %3363 = vmatprep.subr.mxu1 %v7634_v57  ;;  %vm7892_vm1 = vnez %v7620_v51 }
 0x252   :  { %3493 = vmatprep.subr.mxu0 %v7634_v57  ;;  %3367 = vmatpush1.msra.mxu1 %v7693_v16 }
 0x253   :  { %4649 = vmatpush1.msk.msra.mxu0 %vm7835_vm11, %v7630_v6  ;;  %3368 = vmatprep.subr.mxu1 %v7634_v57  ;;  %vm3592_vm11 = vcmp.eq.s32.totalorder %v7901_v50, %v7900_v53 }
 0x254   :  { %3496 = vmatprep.subr.mxu0 %v7634_v57  ;;  %3372 = vmatpush1.msra.mxu1 %v7695_v34  ;;  %v4668_v0 = vsel %vm3592_vm11, 1.0, %v7634_v57 }
 0x255   :  { %4650 = vmatpush1.msk.msra.mxu0 %vm7882_vm10, %v7630_v6  ;;  %3373 = vmatprep.subr.mxu1 %v7634_v57 }
 0x256   :  { %3499 = vmatprep.subr.mxu0 %v7634_v57  ;;  %3377 = vmatpush1.msra.mxu1 %v7773_v40 }
 0x257   :  { %v4843_v5 = vpop.eup %4842  ;;  %4651 = vmatpush1.msk.msra.mxu0 %vm7877_vm2, %v7630_v6  ;;  %3378 = vmatprep.subr.mxu1 %v7634_v57  ;;  %vm3598_vm2 = vcmask 89088  }
 0x258   :  { %3502 = vmatprep.subr.mxu0 %v7634_v57  ;;  %3382 = vmatpush1.msra.mxu1 %v7775_v10  ;;  %v7119_v19 = vmul.f32 %v4843_v5, %v6584_v25  ;;  %v3600_v24 = vsel %vm3598_vm2, %v4668_v0, 0 }
 0x259   :  { %4652 = vmatpush1.msk.msra.mxu0 %vm7836_vm7, %v7630_v6  ;;  %3383 = vmatprep.subr.mxu1 %v7634_v57  ;;  %v3675_v29 = vsub.f32 %v3600_v24, %v3600_v24 }
 0x25a   :  { %3505 = vmatprep.subr.mxu0 %v7634_v57  ;;  %3387 = vmatpush1.msra.mxu1 %v7776_v15 }
 0x25b   :  { %4653 = vmatpush1.msk.msra.mxu0 %vm7878_vm12, %v7630_v6  ;;  %3388 = vmatprep.subr.mxu1 %v7634_v57  ;;  %v3676_v33 = vand.u32 4294901760, %v3675_v29 }
 0x25c   :  { %3508 = vmatprep.subr.mxu0 %v7634_v57  ;;  %3392 = vmatpush1.msra.mxu1 %v7777_v7 }
 0x25d   :  { %4654 = vmatpush1.msk.msra.mxu0 %vm7830_vm13, %v7630_v6  ;;  %3393 = vmatprep.subr.mxu1 %v7634_v57  ;;  %v3677_v37 = vsub.f32 %v3675_v29, %v3676_v33 }
 0x25e   :  { %3511 = vmatprep.subr.mxu0 %v7634_v57  ;;  %3397 = vmatpush1.msra.mxu1 %v7778_v22 }
 0x25f   :  { %4655 = vmatpush1.msk.msra.mxu0 %vm7863_vm14, %v7630_v6  ;;  %3398 = vmatprep.subr.mxu1 %v7634_v57  ;;  %v3678_v46 = vand.u32 4294901760, %v3677_v37  ;;  %vm3590_vm14 = vcmask 48128  }
 0x260   :  { %3514 = vmatprep.subr.mxu0 %v7634_v57  ;;  %3402 = vmatpush1.msra.mxu1 %v7883_v23 }
 0x261   :  { %4656 = vmatpush1.msk.msra.mxu0 %vm7684_vm15, %v7630_v6  ;;  %3403 = vmatprep.subr.mxu1 %v7634_v57  ;;  %vm7888_vm15 = vnez %v7614_v30  ;;  %v7891_v30 = vld [vmem:[#allocation31_spill] sm:$0xff] }
 0x262   :  { %3517 = vmatprep.subr.mxu0 %v7634_v57  ;;  %3407 = vmatpush1.msra.mxu1 %v7884_v26  ;;  %v2433_v31 = vpop.f32.mrf.mxu0 }
 0x263   :  { %4657 = vmatpush1.msk.msra.mxu0 %vm7837_vm4, %v7630_v6  ;;  %3408 = vmatprep.subr.mxu1 %v7634_v57  ;;  %vm7896_vm4 = vnez %v7659_v48  ;;  %v7899_v48 = vmov 0  }
 0x264   :  { %3520 = vmatprep.subr.mxu0 %v7634_v57  ;;  %3412 = vmatpush1.msra.mxu1 %v7885_v35  ;;  %v2435_v36 = vpop.f32.mrf.mxu0 }
 0x265   :  { %4658 = vmatpush1.msk.msra.mxu0 %vm7763_vm0, %v7630_v6  ;;  %3413 = vmatprep.subr.mxu1 %v7634_v57 }
 0x266   :  { %3523 = vmatprep.subr.mxu0 %v7634_v57  ;;  %3417 = vmatpush1.msra.mxu1 %v7886_v44 }
 0x267   :  { %4659 = vmatpush1.msk.msra.mxu0 %vm7704_vm3, %v7630_v6  ;;  %3418 = vmatprep.subr.mxu1 %v7634_v57 }
 0x268   :  { %3526 = vmatprep.subr.mxu0 %v7634_v57  ;;  %3422 = vmatpush1.msra.mxu1 %v7887_v47 }
 0x269   :  { %4660 = vmatpush1.msk.msra.mxu0 %vm7888_vm15, %v7630_v6  ;;  %3423 = vmatprep.subr.mxu1 %v7634_v57 }
 0x26a   :  { %3529 = vmatprep.subr.mxu0 %v7634_v57  ;;  %3427 = vmatpush1.msra.mxu1 %v7889_v55 }
 0x26b   :  { %4661 = vmatpush1.msk.msra.mxu0 %vm7822_vm5, %v7630_v6  ;;  %3428 = vmatprep.subr.mxu1 %v7634_v57  ;;  %v2261_v62 = vpop.f32.mrf.mxu1 }
 0x26c   :  { %3532 = vmatprep.subr.mxu0 %v7634_v57  ;;  %3432 = vmatpush1.msra.mxu1 %v7890_v12  ;;  %v2434_v17 = vadd.f32 %v2433_v31, %v2261_v62 }
 0x26d   :  { %4662 = vmatpush1.msk.msra.mxu0 %vm7879_vm6, %v7630_v6  ;;  %3433 = vmatprep.subr.mxu1 %v7634_v57  ;;  %v2263_v28 = vpop.f32.mrf.mxu1 }
 0x26e   :  { %3535 = vmatprep.subr.mxu0 %v7634_v57  ;;  %3437 = vmatpush1.msra.mxu1 %v7891_v30 }
 0x26f   :  { %4663 = vmatpush1.msk.msra.mxu0 %vm7892_vm1, %v7630_v6  ;;  %3462 = vmatprep.subr.mxu1 %v7634_v57 }
 0x270   :  { %3562 = vmatprep.subr.mxu0 %v7634_v57  ;;  %3466 = vmatpush2.msra.mxu1 %v7893_v38 }
 0x271   :  { %4664 = vmatpush2.msk.msra.mxu0 %vm7874_vm9, %v7630_v6  ;;  %3467 = vmatprep.subr.mxu1 %v7634_v57  ;;  %vm7898_vm9 = vnez %v7663_v43 }
 0x272   :  { %3565 = vmatprep.subr.mxu0 %v7634_v57  ;;  %3471 = vmatpush2.msra.mxu1 %v7894_v41 }
 0x273   :  { %4665 = vmatpush2.msk.msra.mxu0 %vm7880_vm8, %v7630_v6  ;;  %3472 = vmatprep.subr.mxu1 %v7634_v57 }
 0x274   :  { %3568 = vmatprep.subr.mxu0 %v7634_v57  ;;  %3476 = vmatpush2.msra.mxu1 %v7895_v42 }
 0x275   :  { %4666 = vmatpush2.msk.msra.mxu0 %vm7896_vm4, %v7630_v6  ;;  %3477 = vmatprep.subr.mxu1 %v7634_v57 }
 0x276   :  { %3571 = vmatprep.subr.mxu0 %v7634_v57  ;;  %3481 = vmatpush2.msra.mxu1 %v7897_v14 }
 0x277   :  { %3483 = vmatprep.mubr.f32.mxu1 %v6867_v8  ;;  %4667 = vmatpush2.msk.msra.mxu0 %vm7898_vm9, %v7630_v6 }
 0x278   :  { %3575 = vmatprep.mubr.f32.mxu0 %v6867_v8  ;;  %3485 = vmatmul.mubr.f32.vlgmr.msra.gmra.mxu1 %v6889_v13 }
 0x279   :  { %3577 = vmatmul.mubr.f32.vlgmr.msra.gmra.mxu0 %v6889_v13  ;;  %4839 = vset.pattern.permute.xlu0 %v7899_v48 }
 0x27a   :  { %4812 = vmatprep.mubr.f32.mxu0 %v3675_v29  ;;  %4802 = vmatprep.mubr.f32.mxu1 %v3678_v46 }
 0x28c   :  { %v2643_v56 = vpop.f32.mrf.mxu0 }
 0x28e   :  { %v2645_v51 = vpop.f32.mrf.mxu0 }
 0x295   :  { %v2547_v54 = vpop.f32.mrf.mxu1 }
 0x296   :  { %v2548_v58 = vadd.f32 %v2547_v54, %v2434_v17 }
 0x297   :  { %v2549_v59 = vpop.f32.mrf.mxu1 }
 0x298   :  { %v2644_v63 = vadd.f32 %v2643_v56, %v2548_v58 }
 0x2b6   :  { %v2867_v18 = vpop.f32.mrf.mxu0 }
 0x2b8   :  { %v2869_v20 = vpop.f32.mrf.mxu0 }
 0x2be   :  { %v2775_v4 = vpop.f32.mrf.mxu1 }
 0x2bf   :  { %v2776_v45 = vadd.f32 %v2775_v4, %v2644_v63 }
 0x2c0   :  { %v2777_v43 = vpop.f32.mrf.mxu1 }
 0x2c1   :  { %v2868_v6 = vadd.f32 %v2867_v18, %v2776_v45 }
 0x2e4   :  { %v3144_v39 = vpop.f32.mrf.mxu0 }
 0x2e6   :  { %v2972_v16 = vpop.f32.mrf.mxu1  ;;  %v3146_v34 = vpop.f32.mrf.mxu0 }
 0x2e7   :  { %v3145_v40 = vadd.f32 %v3144_v39, %v2972_v16 }
 0x2e8   :  { %v2974_v10 = vpop.f32.mrf.mxu1 }
 0x30e   :  { %v3258_v15 = vpop.f32.mrf.mxu1 }
 0x30f   :  { %v3259_v25 = vadd.f32 %v3258_v15, %v3145_v40 }
 0x310   :  { %v3354_v7 = vpop.f32.mrf.mxu0  ;;  %v3260_v22 = vpop.f32.mrf.mxu1 }
 0x311   :  { %v3355_v13 = vadd.f32 %v3354_v7, %v3259_v25 }
 0x312   :  { %v3356_v27 = vpop.f32.mrf.mxu0 }
 0x338   :  { %v3486_v60 = vpop.f32.mrf.mxu1 }
 0x339   :  { %v3487_v8 = vadd.f32 %v3486_v60, %v3355_v13  ;;  %v3578_v52 = vpop.f32.mrf.mxu0 }
 0x33a   :  { %v3488_v32 = vpop.f32.mrf.mxu1 }
 0x33b   :  { %v3579_v3 = vadd.f32 %v3578_v52, %v3487_v8  ;;  %v3580_v21 = vpop.f32.mrf.mxu0 }
 0x33d   :  { %v3582_v9 = vmul.f32 %v3579_v3, %v7057_v61  ;;  %v7902_v61 = vld [vmem:[#allocation16_spill] sm:$0xff] }
 0x33e   :  { %vm3593_vm0 = vcmp.eq.s32.totalorder %v7902_v61, %v7900_v53 }
 0x33f   :  { %v3583_v1 = vmax.f32 %v3582_v9, 1e-16  ;;  %v4669_v11 = vsel %vm3593_vm0, 1.0, %v7634_v57 }
 0x340   :  { %v3603_v5 = vsel %vm3598_vm2, %v4669_v11, 0 }
 0x341   :  { %4844 = vrsqrt.f32 %v3583_v1  ;;  %v3685_v23 = vsub.f32 %v3603_v5, %v3603_v5 }
 0x343   :  { %v3686_v26 = vand.u32 4294901760, %v3685_v23 }
 0x345   :  { %v3687_v36 = vsub.f32 %v3685_v23, %v3686_v26 }
 0x347   :  { %v3688_v62 = vand.u32 4294901760, %v3687_v36 }
 0x34e   :  { %v4845_v49 = vpop.eup %4844 }
 0x34f   :  { %v3585_v2 = vmul.f32 %v4845_v49, %v2868_v6 }
 0x351   :  { %3587 = vrot.lane.b32.xlu0 %v3585_v2, %s4862_s0 }
 0x3c3   :  { %v3588_v31 = vpop.permute.xlu0 %3587 }
 0x3c4   :  { %v3591_v35 = vsel %vm3590_vm14, %v7119_v19, %v3588_v31 }
 0x3c5   :  { %v3606_v44 = vsel %vm3598_vm2, %v3591_v35, 0 }
 0x3c6   :  { %v3639_v47 = vand.u32 4294901760, %v3606_v44 }
 0x3c8   :  { %v3726_v55 = vsub.f32 %v3606_v44, %v3639_v47  ;;  %4800 = vmatprep.subr.mxu1 %v3639_v47 }
 0x3c9   :  { %4801 = vmatpush3.xpose.msra.mxu1 %v3639_v47 }
 0x3ca   :  { %4810 = vmatprep.subr.mxu0 %v3726_v55  ;;  %v3727_v12 = vand.u32 4294901760, %v3726_v55 }
 0x3cb   :  { %4811 = vmatpush3.xpose.msra.mxu0 %v3726_v55 }
 0x3cc   :  { %4820 = vmatprep.subr.mxu0 %v3727_v12  ;;  %4803 = vmatmul.mubr.f32.vlgmr.msra.gmra.mxu1 %v3688_v62  ;;  %v3728_v17 = vsub.f32 %v3726_v55, %v3727_v12 }
 0x3cd   :  { %4807 = vmatprep.mubr.msk.f32.mxu1 %vm3598_vm2, %v4668_v0 }
 0x3ce   :  { %4813 = vmatmul.mubr.f32.vlgmr.msra.gmra.mxu0 %v3685_v23  ;;  %v3729_v28 = vand.u32 4294901760, %v3728_v17 }
 0x3cf   :  { %4821 = vmatpush3.xpose.msra.mxu0 %v3727_v12  ;;  %4822 = vmatprep.mubr.msk.f32.mxu0 %vm3598_vm2, %v4668_v0 }
 0x3d0   :  { %4805 = vmatprep.subr.mxu1 %v3729_v28 }
 0x3d1   :  { %4806 = vmatpush3.xpose.msra.mxu1 %v3729_v28 }
 0x3d2   :  { %4815 = vmatprep.subr.mxu1 %v3639_v47  ;;  %4823 = vmatmul.mubr.msk.f32.vlgmr.msra.gmra.mxu0 %vm3598_vm2, %v4669_v11 }
 0x3d4   :  { %4808 = vmatmul.mubr.msk.f32.vlgmr.msra.gmra.mxu1 %vm3598_vm2, %v4669_v11 }
 0x3d5   :  { %4816 = vmatpush3.xpose.msra.mxu1 %v3639_v47  ;;  %4817 = vmatprep.mubr.f32.mxu1 %v3676_v33 }
 0x3d6   :  { %4825 = vmatprep.subr.mxu1 %v3639_v47 }
 0x3d8   :  { %4818 = vmatmul.mubr.f32.vlgmr.msra.gmra.mxu1 %v3686_v26 }
 0x3d9   :  { %4826 = vmatpush3.xpose.msra.mxu1 %v3639_v47  ;;  %4827 = vmatprep.mubr.msk.f32.mxu1 %vm3598_vm2, %v4668_v0 }
 0x3dc   :  { %4828 = vmatmul.mubr.msk.f32.vlgmr.msra.gmra.mxu1 %vm3598_vm2, %v4669_v11 }
 0x48c   :  { %v4804_v19 = vpop.f32.mrf.mxu1 }
 0x48e   :  { %v4814_v30 = vpop.f32.mrf.mxu0  ;;  %v3680_v38 = vpop.f32.mrf.mxu1 }
 0x490   :  { %v3846_v42 = vpop.f32.mrf.mxu0 }
 0x492   :  { %v4824_v58 = vpop.f32.mrf.mxu0 }
 0x494   :  { %v4809_v41 = vpop.f32.mrf.mxu1  ;;  %v4009_v45 = vpop.f32.mrf.mxu0 }
 0x495   :  { %v3773_v14 = vadd.f32 %v4809_v41, %v4804_v19 }
 0x496   :  { %v3766_v48 = vpop.f32.mrf.mxu1 }
 0x497   :  { %v3854_v56 = vadd.f32 %v4814_v30, %v3773_v14  ;;  %v3767_v51 = vadd.f32 %v3766_v48, %v3680_v38  ;;  %v4171_v48 = vsub.s32 1, %v7901_v50 }
 0x498   :  { %v4819_v54 = vpop.f32.mrf.mxu1 }
 0x499   :  { %v3847_v59 = vadd.f32 %v3846_v42, %v3767_v51  ;;  %v3936_v63 = vadd.f32 %v4819_v54, %v3854_v56  ;;  %v4159_v42 = vsub.s32 0, %v7901_v50  ;;  %v4183_v56 = vsub.s32 2, %v7901_v50 }
 0x49a   :  { %v3927_v18 = vpop.f32.mrf.mxu1 }
 0x49b   :  { %v4016_v20 = vadd.f32 %v4824_v58, %v3936_v63  ;;  %v3928_v4 = vadd.f32 %v3927_v18, %v3847_v59 }
 0x49c   :  { %v4829_v43 = vpop.f32.mrf.mxu1 }
 0x49d   :  { %v4010_v6 = vadd.f32 %v4009_v45, %v3928_v4  ;;  %v4094_v39 = vadd.f32 %v4829_v43, %v4016_v20  ;;  %v4195_v43 = vsub.s32 3, %v7901_v50 }
 0x49e   :  { %v4087_v16 = vpop.f32.mrf.mxu1 }
 0x49f   :  { %v4677_v34 = vclamps-f32 %v4094_v39, 1.0  ;;  %v7236_v40 = vadd.f32 %v4087_v16, %v4010_v6  ;;  %v4207_v6 = vsub.s32 4, %v7901_v50  ;;  %v4219_v39 = vsub.s32 5, %v7901_v50 }
 0x4a1   :  { %v4102_v10 = vand.u32 2147483647, %v4677_v34  ;;  %v4676_v15 = vclamps-f32 %v7236_v40, 1.0  ;;  %vm4152_vm13 = vcmp.lt.f32.partialorder %v4677_v34, 0.0  ;;  %v4245_v34 = vsub.s32 6, %v7901_v50 }
 0x4a3   :  { %v4104_v7 = vmul.f32 -0.0012624911, %v4102_v10  ;;  %v4132_v22 = vsub.f32 1.0, %v4102_v10  ;;  %v4101_v27 = vand.u32 2147483647, %v4676_v15  ;;  %vm4151_vm1 = vcmp.lt.f32.partialorder %v4676_v15, 0.0 }
 0x4a5   :  { %v4106_v25 = vadd.f32 0.00667009, %v4104_v7  ;;  %v4134_v13 = vmax.f32 %v4132_v22, 0.0  ;;  %v4103_v60 = vmul.f32 -0.0012624911, %v4101_v27  ;;  %v4131_v8 = vsub.f32 1.0, %v4101_v27 }
 0x4a7   :  { %v4108_v52 = vmul.f32 %v4106_v25, %v4102_v10  ;;  %4846 = vrsqrt.f32 %v4134_v13  ;;  %v4105_v32 = vadd.f32 0.00667009, %v4103_v60  ;;  %v4133_v3 = vmax.f32 %v4131_v8, 0.0 }
 0x4a8   :  { %vm4144_vm3 = vcmp.eq.f32.partialorder %v4134_v13, inf  ;;  %v4147_v12 = vand.u32 2147483648, %v4134_v13  ;;  %vm4146_vm6 = vcmp.eq.f32.partialorder %v4134_v13, 0.0 }
 0x4a9   :  { %v4110_v21 = vadd.f32 -0.017088126, %v4108_v52  ;;  %v4107_v9 = vmul.f32 %v4105_v32, %v4101_v27  ;;  %4848 = vrsqrt.f32 %v4133_v3  ;;  %vm4137_vm10 = vcmp.eq.f32.partialorder %v4133_v3, inf }
 0x4aa   :  { %v4140_v14 = vand.u32 2147483648, %v4133_v3  ;;  %vm4139_vm12 = vcmp.eq.f32.partialorder %v4133_v3, 0.0 }
 0x4ab   :  { %v4112_v1 = vmul.f32 %v4110_v21, %v4102_v10  ;;  %v4109_v53 = vadd.f32 -0.017088126, %v4107_v9 }
 0x4ad   :  { %v4114_v0 = vadd.f32 0.03089188, %v4112_v1  ;;  %v4111_v24 = vmul.f32 %v4109_v53, %v4101_v27 }
 0x4af   :  { %v4116_v29 = vmul.f32 %v4114_v0, %v4102_v10  ;;  %v4113_v33 = vadd.f32 0.03089188, %v4111_v24 }
 0x4b1   :  { %v4118_v37 = vadd.f32 -0.050174303, %v4116_v29  ;;  %v4115_v46 = vmul.f32 %v4113_v33, %v4101_v27 }
 0x4b3   :  { %v4120_v49 = vmul.f32 %v4118_v37, %v4102_v10  ;;  %v4117_v61 = vadd.f32 -0.050174303, %v4115_v46 }
 0x4b4   :  { %v4847_v2 = vpop.eup %4846 }
 0x4b5   :  { %v4122_v11 = vadd.f32 0.08897899, %v4120_v49  ;;  %v4119_v5 = vmul.f32 %v4117_v61, %v4101_v27  ;;  %v4143_v31 = vmul.f32 %v4847_v2, %v4134_v13 }
 0x4b6   :  { %v4849_v23 = vpop.eup %4848 }
 0x4b7   :  { %v4124_v26 = vmul.f32 %v4122_v11, %v4102_v10  ;;  %v4121_v35 = vadd.f32 0.08897899, %v4119_v5  ;;  %v4136_v47 = vmul.f32 %v4849_v23, %v4133_v3  ;;  %v4145_v62 = vsel %vm4144_vm3, %v4134_v13, %v4143_v31 }
 0x4b8   :  { %v4148_v19 = vsel %vm4146_vm6, %v4147_v12, %v4145_v62 }
 0x4b9   :  { %v4126_v36 = vadd.f32 -0.2145988, %v4124_v26  ;;  %v4123_v44 = vmul.f32 %v4121_v35, %v4101_v27  ;;  %v4138_v38 = vsel %vm4137_vm10, %v4133_v3, %v4136_v47 }
 0x4ba   :  { %v4141_v58 = vsel %vm4139_vm12, %v4140_v14, %v4138_v38 }
 0x4bb   :  { %v4128_v55 = vmul.f32 %v4126_v36, %v4102_v10  ;;  %v4125_v17 = vadd.f32 -0.2145988, %v4123_v44  ;;  %v4265_v10 = vsub.s32 7, %v7901_v50 }
 0x4bd   :  { %v4130_v28 = vadd.f32 1.5707963, %v4128_v55  ;;  %v4127_v30 = vmul.f32 %v4125_v17, %v4101_v27 }
 0x4bf   :  { %v4150_v41 = vmul.f32 %v4148_v19, %v4130_v28  ;;  %v4129_v51 = vadd.f32 1.5707963, %v4127_v30 }
 0x4c1   :  { %v4154_v54 = vsub.f32 3.1415927, %v4150_v41  ;;  %v4149_v59 = vmul.f32 %v4141_v58, %v4129_v51 }
 0x4c3   :  { %v7244_v63 = vsel %vm4152_vm13, %v4154_v54, %v4150_v41  ;;  %v4153_v45 = vsub.f32 3.1415927, %v4149_v59 }
 0x4c4   :  { %v7247_v18 = vrot.slane %v7244_v63, %v4159_v42  ;;  %v7250_v20 = vrot.slane %v7244_v63, %v4171_v48  ;;  %v7253_v4 = vrot.slane %v7244_v63, %v4183_v56 }
 0x4c5   :  { %v7281_v27 = vsel %vm4151_vm1, %v4153_v45, %v4149_v59 }
 0x4c6   :  { %vm4288_vm7 = vcmp.lt.f32.partialorder %v7247_v18, %v7244_v63  ;;  %vm4296_vm5 = vcmp.le.f32.partialorder %v7247_v18, %v7244_v63  ;;  %vm4308_vm8 = vcmp.lt.f32.partialorder %v7250_v20, %v7244_v63  ;;  %vm4316_vm15 = vcmp.le.f32.partialorder %v7250_v20, %v7244_v63 }
 0x4c7   :  { %v7267_v16 = vsel %vm4288_vm7, 1.0, %v7634_v57  ;;  %v7274_v7 = vsel %vm4296_vm5, 1.0, %v7634_v57  ;;  %v7277_v22 = vsel %vm4308_vm8, 1.0, %v7634_v57  ;;  %vm4328_vm4 = vcmp.lt.f32.partialorder %v7253_v4, %v7244_v63 }
 0x4c8   :  { %v7284_v25 = vsel %vm4316_vm15, 1.0, %v7634_v57  ;;  %v7287_v40 = vsel %vm4328_vm4, 1.0, %v7634_v57  ;;  %v4160_v15 = vrot.slane %v7281_v27, %v4159_v42  ;;  %v4172_v50 = vrot.slane %v7281_v27, %v4171_v48 }
 0x4c9   :  { %v4184_v13 = vrot.slane %v7281_v27, %v4183_v56  ;;  %v4196_v60 = vrot.slane %v7281_v27, %v4195_v43  ;;  %v4208_v8 = vrot.slane %v7281_v27, %v4207_v6  ;;  %v4220_v52 = vrot.slane %v7281_v27, %v4219_v39 }
 0x4ca   :  { %vm4161_vm9 = vcmp.lt.f32.partialorder %v4160_v15, %v7281_v27  ;;  %vm4165_vm2 = vcmp.le.f32.partialorder %v4160_v15, %v7281_v27  ;;  %vm4173_vm11 = vcmp.lt.f32.partialorder %v4172_v50, %v7281_v27  ;;  %vm4177_vm0 = vcmp.le.f32.partialorder %v4172_v50, %v7281_v27 }
 0x4cb   :  { %v4678_v32 = vsel %vm4161_vm9, 1.0, %v7634_v57  ;;  %v4679_v3 = vsel %vm4165_vm2, 1.0, %v7634_v57  ;;  %v4680_v21 = vsel %vm4173_vm11, 1.0, %v7634_v57  ;;  %v4681_v9 = vsel %vm4177_vm0, 1.0, %v7634_v57 }
 0x4cc   :  { %v4176_v1 = vadd.f32 %v4680_v21, %v4678_v32  ;;  %v4180_v53 = vadd.f32 %v4681_v9, %v4679_v3  ;;  %vm4185_vm14 = vcmp.lt.f32.partialorder %v4184_v13, %v7281_v27  ;;  %vm4189_vm3 = vcmp.le.f32.partialorder %v4184_v13, %v7281_v27 }
 0x4cd   :  { %v4682_v0 = vsel %vm4185_vm14, 1.0, %v7634_v57  ;;  %v4683_v24 = vsel %vm4189_vm3, 1.0, %v7634_v57  ;;  %vm4197_vm6 = vcmp.lt.f32.partialorder %v4196_v60, %v7281_v27  ;;  %vm4201_vm10 = vcmp.le.f32.partialorder %v4196_v60, %v7281_v27 }
 0x4ce   :  { %v4188_v29 = vadd.f32 %v4682_v0, %v4176_v1  ;;  %v4192_v33 = vadd.f32 %v4683_v24, %v4180_v53  ;;  %v4684_v37 = vsel %vm4197_vm6, 1.0, %v7634_v57  ;;  %v4685_v46 = vsel %vm4201_vm10, 1.0, %v7634_v57 }
 0x4cf   :  { %vm4209_vm12 = vcmp.lt.f32.partialorder %v4208_v8, %v7281_v27  ;;  %vm4213_vm13 = vcmp.le.f32.partialorder %v4208_v8, %v7281_v27  ;;  %vm4221_vm7 = vcmp.lt.f32.partialorder %v4220_v52, %v7281_v27  ;;  %vm4225_vm5 = vcmp.le.f32.partialorder %v4220_v52, %v7281_v27 }
 0x4d0   :  { %v4200_v49 = vadd.f32 %v4684_v37, %v4188_v29  ;;  %v4204_v2 = vadd.f32 %v4685_v46, %v4192_v33  ;;  %v4686_v61 = vsel %vm4209_vm12, 1.0, %v7634_v57  ;;  %v4687_v11 = vsel %vm4213_vm13, 1.0, %v7634_v57 }
 0x4d1   :  { %vm4235_vm8 = vcmask 29696   ;;  %vm4336_vm15 = vcmp.le.f32.partialorder %v7253_v4, %v7244_v63  ;;  %v4688_v5 = vsel %vm4221_vm7, 1.0, %v7634_v57  ;;  %v4689_v23 = vsel %vm4225_vm5, 1.0, %v7634_v57 }
 0x4d2   :  { %v4246_v26 = vrot.slane %v7281_v27, %v4245_v34  ;;  %v4266_v31 = vrot.slane %v7281_v27, %v4265_v10  ;;  %v4212_v35 = vadd.f32 %v4686_v61, %v4200_v49  ;;  %v4216_v36 = vadd.f32 %v4687_v11, %v4204_v2 }
 0x4d3   :  { %vm4287_vm1 = vcmp.lt.f32.partialorder %v7247_v18, %v7281_v27  ;;  %vm4295_vm4 = vcmp.le.f32.partialorder %v7247_v18, %v7281_v27  ;;  %vm4307_vm5 = vcmp.lt.f32.partialorder %v7250_v20, %v7281_v27 }
 0x4d4   :  { %vm4247_vm9 = vcmp.lt.f32.partialorder %v4246_v26, %v7281_v27  ;;  %vm4248_vm2 = vcmp.lt.f32.partialorder %v4246_v26, %v7244_v63  ;;  %vm4255_vm11 = vcmp.le.f32.partialorder %v4246_v26, %v7281_v27  ;;  %vm4256_vm0 = vcmp.le.f32.partialorder %v4246_v26, %v7244_v63 }
 0x4d5   :  { %v4224_v44 = vadd.f32 %v4688_v5, %v4212_v35  ;;  %v4228_v47 = vadd.f32 %v4689_v23, %v4216_v36  ;;  %v4691_v55 = vsel %vm4247_vm9, 1.0, %v7634_v57  ;;  %v4692_v62 = vsel %vm4248_vm2, 1.0, %v7634_v57 }
 0x4d6   :  { %v4693_v12 = vsel %vm4255_vm11, 1.0, %v7634_v57  ;;  %v4694_v17 = vsel %vm4256_vm0, 1.0, %v7634_v57  ;;  %vm4267_vm14 = vcmp.lt.f32.partialorder %v4266_v31, %v7281_v27  ;;  %vm4268_vm3 = vcmp.lt.f32.partialorder %v4266_v31, %v7244_v63 }
 0x4d7   :  { %vm4229_vm6 = vcmp.le.f32.partialorder %v4224_v44, 2.0  ;;  %vm4230_vm10 = vcmp.gt.f32.partialorder %v4228_v47, 2.0  ;;  %v4695_v28 = vsel %vm4267_vm14, 1.0, %v7634_v57  ;;  %v4696_v19 = vsel %vm4268_vm3, 1.0, %v7634_v57 }
 0x4d8   :  { %vm4231_vm12 = vmand %vm4229_vm6, %vm4230_vm10  ;;  %v4273_v30 = vadd.f32 %v4695_v28, %v4691_v55  ;;  %v4274_v38 = vadd.f32 %v4696_v19, %v4692_v62  ;;  %vm4275_vm13 = vcmp.le.f32.partialorder %v4266_v31, %v7281_v27  ;;  %vm4276_vm7 = vcmp.le.f32.partialorder %v4266_v31, %v7244_v63 }
 0x4d9   :  { %v4690_v41 = vsel %vm4231_vm12, 1.0, %v7634_v57  ;;  %v4697_v42 = vsel %vm4275_vm13, 1.0, %v7634_v57  ;;  %v4698_v14 = vsel %vm4276_vm7, 1.0, %v7634_v57  ;;  %v4699_v48 = vsel %vm4287_vm1, 1.0, %v7634_v57 }
 0x4da   :  { %v4234_v56 = vmul.f32 %v4690_v41, %v7281_v27  ;;  %v4281_v51 = vadd.f32 %v4697_v42, %v4693_v12  ;;  %v4282_v54 = vadd.f32 %v4698_v14, %v4694_v17  ;;  %v4293_v58 = vadd.f32 %v4699_v48, %v4273_v30 }
 0x4db   :  { %v4294_v59 = vadd.f32 %v7267_v16, %v4274_v38  ;;  %v4701_v45 = vsel %vm4295_vm4, 1.0, %v7634_v57  ;;  %vm4315_vm9 = vcmp.le.f32.partialorder %v7250_v20, %v7281_v27  ;;  %v4703_v34 = vsel %vm4307_vm5, 1.0, %v7634_v57 }
 0x4dc   :  { %v4236_v43 = vsel %vm4235_vm8, %v4234_v56, -inf  ;;  %v4301_v6 = vadd.f32 %v4701_v45, %v4281_v51  ;;  %v4302_v39 = vadd.f32 %v7274_v7, %v4282_v54  ;;  %v4710_v16 = vsel %vm4336_vm15, 1.0, %v7634_v57 }
 0x4dd   :  { %v4313_v18 = vadd.f32 %v4703_v34, %v4293_v58  ;;  %v4314_v10 = vadd.f32 %v7277_v22, %v4294_v59  ;;  %v4705_v15 = vsel %vm4315_vm9, 1.0, %v7634_v57  ;;  %vm4327_vm8 = vcmp.lt.f32.partialorder %v7253_v4, %v7281_v27 }
 0x4de   :  { %v4321_v50 = vadd.f32 %v4705_v15, %v4301_v6  ;;  %v4322_v20 = vadd.f32 %v7284_v25, %v4302_v39  ;;  %vm4335_vm1 = vcmp.le.f32.partialorder %v7253_v4, %v7281_v27  ;;  %v4237_v7 = vrot.slane %v4236_v43, 4 }
 0x4df   :  { %v4707_v13 = vsel %vm4327_vm8, 1.0, %v7634_v57  ;;  %v4334_v60 = vadd.f32 %v7287_v40, %v4314_v10  ;;  %v4709_v8 = vsel %vm4335_vm1, 1.0, %v7634_v57  ;;  %vm4355_vm3 = vcmask 31750  }
 0x4e0   :  { %v4333_v52 = vadd.f32 %v4707_v13, %v4313_v18  ;;  %v4341_v22 = vadd.f32 %v4709_v8, %v4321_v50  ;;  %v4342_v32 = vadd.f32 %v4710_v16, %v4322_v20  ;;  %v4238_v25 = vmax.f32 %v4236_v43, %v4237_v7 }
 0x4e1   :  { %vm4344_vm15 = vcmp.le.f32.partialorder %v4334_v60, 2.0  ;;  %vm4357_vm6 = vcmask 26624   ;;  %vm4374_vm10 = vcmask 24576  }
 0x4e2   :  { %vm4343_vm4 = vcmp.le.f32.partialorder %v4333_v52, 2.0  ;;  %vm4345_vm2 = vcmp.gt.f32.partialorder %v4341_v22, 2.0  ;;  %vm4346_vm11 = vcmp.gt.f32.partialorder %v4342_v32, 2.0  ;;  %v4239_v9 = vrot.slane %v4238_v25, 2 }
 0x4e3   :  { %vm4347_vm0 = vmand %vm4343_vm4, %vm4345_vm2 }
 0x4e4   :  { %vm4348_vm14 = vmand %vm4344_vm15, %vm4346_vm11  ;;  %v4711_v3 = vsel %vm4347_vm0, 1.0, %v7634_v57  ;;  %v4240_v24 = vmax.f32 %v4238_v25, %v4239_v9 }
 0x4e5   :  { %v4712_v4 = vsel %vm4348_vm14, 1.0, %v7634_v57  ;;  %v4353_v21 = vmul.f32 %v4711_v3, %v7281_v27 }
 0x4e6   :  { %v4354_v40 = vmul.f32 %v4712_v4, %v7244_v63  ;;  %v4241_v37 = vrot.slane %v4240_v24, 1 }
 0x4e7   :  { %v4356_v1 = vsel %vm4355_vm3, %v4353_v21, -inf }
 0x4e8   :  { %v4358_v53 = vsel %vm4357_vm6, %v4354_v40, -inf  ;;  %v4242_v2 = vmax.f32 %v4240_v24, %v4241_v37 }
 0x4e9   :  { %v4359_v0 = vmax.f32 %v4356_v1, %v4358_v53 }
 0x4eb   :  { %v4360_v29 = vrot.slane %v4359_v0, 4 }
 0x4ed   :  { %v4361_v33 = vmax.f32 %v4359_v0, %v4360_v29 }
 0x4ef   :  { %v4362_v46 = vrot.slane %v4361_v33, 2 }
 0x4f1   :  { %v4363_v49 = vmax.f32 %v4361_v33, %v4362_v46 }
 0x4f3   :  { %v4364_v61 = vrot.slane %v4363_v49, 1 }
 0x4f5   :  { %v4365_v11 = vmax.f32 %v4363_v49, %v4364_v61 }
 0x4f7   :  { %v4366_v5 = vsub.f32 %v4242_v2, %v4365_v11 }
 0x4f9   :  { %v4367_v57 = vadd.f32 0.2, %v4366_v5 }
 0x4fb   :  { %v4368_v23 = vmax.f32 %v4367_v57, 0.0 }
 0x4fd   :  { %v4369_v27 = vmul.f32 1.442695, %v4368_v23 }
 0x4ff   :  { %4850 = vpow2.f32 %v4369_v27 }
 0x50c   :  { %v4851_v26 = vpop.eup %4850 }
 0x50d   :  { %v4371_v63 = vadd.f32 1.0, %v4851_v26 }
 0x50f   :  { %4852 = vlog2.f32 %v4371_v63 }
 0x51c   :  { %v4853_v31 = vpop.eup %4852 }
 0x51d   :  { %v4373_v35 = vmul.f32 0.6931472, %v4853_v31 }
 0x51f   :  { %4375 = vst.msk [vmem:[%s7385_s3] sm:$0x1] %vm4374_vm10, %v4373_v35 }

</bundles_post_ra>
